<compile_context>
chip_gen: v7x
topology: tpu7x:2x2x1
jax: 0.10.0
libtpu: 0.0.40
codegen_flags: <defaults>
</compile_context>

<pallas_src>
import functools

import jax
import jax.numpy as jnp
from jax import lax
from jax.experimental import pallas as pl
from jax.experimental.pallas import tpu as pltpu

EPS = 1e-5                      # nn.BatchNorm2d default eps
COMPUTE_DTYPE = jnp.bfloat16    # MXU input dtype (f32 accumulate / f32 BN math)
VMEM_LIMIT = 48 * 1024 * 1024   # > default scoped limit, < v7x physical 64 MiB


def _round_up(v, m):
    return -(-v // m) * m


def _pad_rows(a, mp):
    return jnp.pad(a, ((0, mp - a.shape[0]), (0, 0))) if mp != a.shape[0] else a


# ---------------------------------------------------------------------------
# In-kernel helpers.
# ---------------------------------------------------------------------------
def _row_mask(i, tile_m, rows_total):
    row = i * tile_m + lax.broadcasted_iota(jnp.int32, (tile_m, 1), 0)
    return (row < rows_total).astype(jnp.float32)


def _partial_stats(y, y_masked, stats_shape):
    """Pack per-channel sum (row 0) and sum-of-squares (row 1) into one
    lane-dense (8, C) store."""
    ridx = lax.broadcasted_iota(jnp.int32, stats_shape, 0)
    s = jnp.sum(y_masked, axis=0, keepdims=True)
    ss = jnp.sum(y_masked * y, axis=0, keepdims=True)
    return jnp.where(ridx == 0, s, jnp.where(ridx == 1, ss, 0.0))


# ---------------------------------------------------------------------------
# Pass 1 kernels: conv-as-matmul (+ bias) and per-tile per-channel stats.
# ---------------------------------------------------------------------------
def _conv_stats_kernel(p_ref, w_ref, b_ref, y_ref, st_ref, *, rows_total, tile_m):
    i = pl.program_id(0)
    y = jnp.dot(p_ref[...], w_ref[...],
                preferred_element_type=jnp.float32) + b_ref[...]
    y_ref[...] = y
    ym = y * _row_mask(i, tile_m, rows_total) if rows_total % tile_m else y
    st_ref[...] = _partial_stats(y, ym, st_ref.shape)


def _conv_pair_stats_kernel(p_ref, x_ref, w1_ref, wsc_ref, b1_ref, bsc_ref,
                            y1_ref, ysc_ref, st1_ref, stsc_ref,
                            *, rows_total, tile_m):
    """Fused: conv1 (k x k, via im2col patches) + 1x1 shortcut conv, same M grid."""
    i = pl.program_id(0)
    y1 = jnp.dot(p_ref[...], w1_ref[...],
                 preferred_element_type=jnp.float32) + b1_ref[...]
    ysc = jnp.dot(x_ref[...], wsc_ref[...],
                  preferred_element_type=jnp.float32) + bsc_ref[...]
    y1_ref[...] = y1
    ysc_ref[...] = ysc
    if rows_total % tile_m:
        m = _row_mask(i, tile_m, rows_total)
        y1m, yscm = y1 * m, ysc * m
    else:
        y1m, yscm = y1, ysc
    st1_ref[...] = _partial_stats(y1, y1m, st1_ref.shape)
    stsc_ref[...] = _partial_stats(ysc, yscm, stsc_ref.shape)


def conv_matmul_stats(patches, w_mat, bias, *, tile_m):
    """patches (M,K) bf16, w_mat (K,C) bf16, bias (1,C) f32 ->
    raw conv output (M,C) f32 plus per-channel sum / sum-of-squares."""
    M, K = patches.shape
    C = w_mat.shape[1]
    tile_m = min(tile_m, _round_up(M, 16))
    mp = _round_up(M, tile_m)
    patches = _pad_rows(patches, mp)
    grid_m = mp // tile_m

    y, st = pl.pallas_call(
        functools.partial(_conv_stats_kernel, rows_total=M, tile_m=tile_m),
        out_shape=(jax.ShapeDtypeStruct((mp, C), jnp.float32),
                   jax.ShapeDtypeStruct((grid_m * 8, C), jnp.float32)),
        grid=(grid_m,),
        in_specs=[
            pl.BlockSpec((tile_m, K), lambda i: (i, 0)),   # patches tile
            pl.BlockSpec((K, C), lambda i: (0, 0)),        # weights (resident)
            pl.BlockSpec((1, C), lambda i: (0, 0)),        # bias
        ],
        out_specs=(
            pl.BlockSpec((tile_m, C), lambda i: (i, 0)),   # raw conv output
            pl.BlockSpec((8, C), lambda i: (i, 0)),        # per-tile partial stats
        ),
        compiler_params=pltpu.CompilerParams(
            dimension_semantics=("parallel",),
            vmem_limit_bytes=VMEM_LIMIT),
    )(patches, w_mat, bias)

    if mp != M:
        y = y[:M]
    st = st.reshape(grid_m, 8, C)
    return (y,
            jnp.sum(st[:, 0, :], axis=0, keepdims=True),
            jnp.sum(st[:, 1, :], axis=0, keepdims=True))


def conv_pair_matmul_stats(patches, x_rows, w1, wsc, b1, bsc, *, tile_m):
    """Fused conv1 + 1x1-shortcut pass: one grid over M, two matmuls, two stats."""
    M, K = patches.shape
    cin = x_rows.shape[1]
    C = w1.shape[1]
    tile_m = min(tile_m, _round_up(M, 16))
    mp = _round_up(M, tile_m)
    patches = _pad_rows(patches, mp)
    x_rows = _pad_rows(x_rows, mp)
    grid_m = mp // tile_m

    y1, ysc, st1, stsc = pl.pallas_call(
        functools.partial(_conv_pair_stats_kernel, rows_total=M, tile_m=tile_m),
        out_shape=(jax.ShapeDtypeStruct((mp, C), jnp.float32),
                   jax.ShapeDtypeStruct((mp, C), jnp.float32),
                   jax.ShapeDtypeStruct((grid_m * 8, C), jnp.float32),
                   jax.ShapeDtypeStruct((grid_m * 8, C), jnp.float32)),
        grid=(grid_m,),
        in_specs=[
            pl.BlockSpec((tile_m, K), lambda i: (i, 0)),   # conv1 patches tile
            pl.BlockSpec((tile_m, cin), lambda i: (i, 0)), # shortcut x rows tile
            pl.BlockSpec((K, C), lambda i: (0, 0)),        # conv1 weights
            pl.BlockSpec((cin, C), lambda i: (0, 0)),      # shortcut weights
            pl.BlockSpec((1, C), lambda i: (0, 0)),        # conv1 bias
            pl.BlockSpec((1, C), lambda i: (0, 0)),        # shortcut bias
        ],
        out_specs=(
            pl.BlockSpec((tile_m, C), lambda i: (i, 0)),
            pl.BlockSpec((tile_m, C), lambda i: (i, 0)),
            pl.BlockSpec((8, C), lambda i: (i, 0)),
            pl.BlockSpec((8, C), lambda i: (i, 0)),
        ),
        compiler_params=pltpu.CompilerParams(
            dimension_semantics=("parallel",),
            vmem_limit_bytes=VMEM_LIMIT),
    )(patches, x_rows, w1, wsc, b1, bsc)

    if mp != M:
        y1, ysc = y1[:M], ysc[:M]
    st1 = st1.reshape(grid_m, 8, C)
    stsc = stsc.reshape(grid_m, 8, C)
    return (y1,
            jnp.sum(st1[:, 0, :], axis=0, keepdims=True),
            jnp.sum(st1[:, 1, :], axis=0, keepdims=True),
            ysc,
            jnp.sum(stsc[:, 0, :], axis=0, keepdims=True),
            jnp.sum(stsc[:, 1, :], axis=0, keepdims=True))


# ---------------------------------------------------------------------------
# Pass 2 kernels: elementwise BN apply (+ shortcut BN + residual) + ReLU.
# ---------------------------------------------------------------------------
def _bn_relu_kernel(y_ref, scale_ref, shift_ref, o_ref):
    y = y_ref[...] * scale_ref[...] + shift_ref[...]
    o_ref[...] = jnp.maximum(y, 0.0).astype(o_ref.dtype)


def _dual_bn_add_relu_kernel(y_ref, sc_ref, a_ref, b_ref, a_s_ref, b_s_ref, o_ref):
    # Conv2d_BN(conv2) ends in a ReLU *before* the residual add.
    main = jnp.maximum(y_ref[...] * a_ref[...] + b_ref[...], 0.0)
    short = sc_ref[...] * a_s_ref[...] + b_s_ref[...]      # BN_shortcut(1x1 out)
    # TODO(synk): training-mode nn.Dropout (random masking via pltpu.prng_*)
    # is not implemented; eval-mode dropout is the identity.
    o_ref[...] = jnp.maximum(main + short, 0.0).astype(o_ref.dtype)


def _elementwise_rows(kernel, row_args, chan_args, out_dtype, tile_m):
    M, C = row_args[0].shape
    tile_m = min(tile_m, _round_up(M, 16))
    mp = _round_up(M, tile_m)
    row_args = [_pad_rows(a, mp) for a in row_args]
    grid_m = mp // tile_m
    row_spec = pl.BlockSpec((tile_m, C), lambda i: (i, 0))
    chan_spec = pl.BlockSpec((1, C), lambda i: (0, 0))
    out = pl.pallas_call(
        kernel,
        out_shape=jax.ShapeDtypeStruct((mp, C), out_dtype),
        grid=(grid_m,),
        in_specs=[row_spec] * len(row_args) + [chan_spec] * len(chan_args),
        out_specs=pl.BlockSpec((tile_m, C), lambda i: (i, 0)),
        compiler_params=pltpu.CompilerParams(
            dimension_semantics=("parallel",),
            vmem_limit_bytes=VMEM_LIMIT),
    )(*row_args, *chan_args)
    return out[:M] if mp != M else out


# ---------------------------------------------------------------------------
# Tiny per-channel glue: batch stats -> BN scale/shift (all f32, size (1, C)).
# ---------------------------------------------------------------------------
def _bn_scale_shift(s, ss, count, gamma, beta):
    mean = s / count
    var = jnp.maximum(ss / count - mean * mean, 0.0)       # biased variance
    scale = gamma.reshape(1, -1) * lax.rsqrt(var + EPS)
    shift = beta.reshape(1, -1) - mean * scale
    return scale, shift


# ---------------------------------------------------------------------------
# JAX-side im2col (k x k, stride s, symmetric padding), channels-last, bf16.
# ---------------------------------------------------------------------------
def _im2col(x_nhwc, k, stride, pad):
    N, H, W, C = x_nhwc.shape
    ho = (H + 2 * pad - k) // stride + 1
    wo = (W + 2 * pad - k) // stride + 1
    xp = jnp.pad(x_nhwc, ((0, 0), (pad, pad), (pad, pad), (0, 0)))
    cols = []
    for kh in range(k):
        for kw in range(k):
            cols.append(xp[:, kh:kh + stride * (ho - 1) + 1:stride,
                           kw:kw + stride * (wo - 1) + 1:stride, :])
    patches = jnp.concatenate(cols, axis=-1)               # (N, ho, wo, k*k*C)
    return patches.reshape(N * ho * wo, k * k * C), ho, wo


# ---------------------------------------------------------------------------
# Conv_Block forward.  Conv weights are HWIO; public layout is NCHW.
# ---------------------------------------------------------------------------
def conv_block_forward(x_nchw, params, *, kernel_size=3, stride=1, tile_m=256):
    N, cin, H, W = x_nchw.shape
    k = kernel_size
    pad = (k - 1) // 2
    cout = params["w1"].shape[-1]

    x = jnp.transpose(x_nchw, (0, 2, 3, 1)).astype(COMPUTE_DTYPE)   # NHWC, bf16

    w1 = params["w1"].astype(COMPUTE_DTYPE).reshape(k * k * cin, cout)
    w2 = params["w2"].astype(COMPUTE_DTYPE).reshape(k * k * cout, cout)
    wsc = params["w_sc"].astype(COMPUTE_DTYPE).reshape(cin, cout)

    # ---- conv1 (k x k, stride) + 1x1 shortcut conv, fused in one pass ----
    p1, h_out, w_out = _im2col(x, k, stride, pad)
    m1 = N * h_out * w_out
    x_sc = x[:, ::stride, ::stride, :].reshape(m1, cin)
    y1, s1, ss1, y_sc, s_sc, ss_sc = conv_pair_matmul_stats(
        p1, x_sc, w1, wsc,
        params["b1"].reshape(1, cout), params["b_sc"].reshape(1, cout),
        tile_m=tile_m)
    sc1, sh1 = _bn_scale_shift(s1, ss1, m1, params["g1"], params["be1"])
    scs, shs = _bn_scale_shift(s_sc, ss_sc, m1, params["g_sc"], params["be_sc"])

    # ---- bn1 + relu (fully parallel elementwise); bf16 handoff to conv2 ----
    a1 = _elementwise_rows(_bn_relu_kernel, [y1], [sc1, sh1],
                           COMPUTE_DTYPE, tile_m)

    # ---- conv2 (k x k, stride 1) + batch stats ----
    p2, _, _ = _im2col(a1.reshape(N, h_out, w_out, cout), k, 1, pad)
    y2, s2, ss2 = conv_matmul_stats(p2, w2, params["b2"].reshape(1, cout),
                                    tile_m=tile_m)
    sc2, sh2 = _bn_scale_shift(s2, ss2, m1, params["g2"], params["be2"])

    # ---- relu(bn2) + bn_shortcut + add + dropout(identity) + relu, fused ----
    out = _elementwise_rows(_dual_bn_add_relu_kernel, [y2, y_sc],
                            [sc2, sh2, scs, shs], jnp.float32, tile_m)
    return jnp.transpose(out.reshape(N, h_out, w_out, cout), (0, 3, 1, 2))


# ---------------------------------------------------------------------------
# Pure-JAX reference (no Pallas).  Mirrors the kernel's bf16 MXU inputs so the
# comparison validates indexing / BN / fusion rather than bf16 quantization.
# ---------------------------------------------------------------------------
def conv_block_reference(x_nchw, params, *, kernel_size=3, stride=1):
    k = kernel_size
    pad = (k - 1) // 2
    x = jnp.transpose(x_nchw, (0, 2, 3, 1)).astype(COMPUTE_DTYPE)

    def conv(inp, w, b, s, pd):
        y = lax.conv_general_dilated(
            inp.astype(COMPUTE_DTYPE), w.astype(COMPUTE_DTYPE),
            window_strides=(s, s), padding=((pd, pd), (pd, pd)),
            dimension_numbers=("NHWC", "HWIO", "NHWC"),
            preferred_element_type=jnp.float32)
        return y + b.reshape(1, 1, 1, -1)

    def bn(y, g, b):
        mean = y.mean(axis=(0, 1, 2))
        var = jnp.mean(jnp.square(y - mean), axis=(0, 1, 2))
        return (y - mean) * lax.rsqrt(var + EPS) * g + b

    shortcut = bn(conv(x, params["w_sc"], params["b_sc"], stride, 0),
                  params["g_sc"], params["be_sc"])
    a1 = jnp.maximum(bn(conv(x, params["w1"], params["b1"], stride, pad),
                        params["g1"], params["be1"]), 0.0)
    a1 = a1.astype(COMPUTE_DTYPE)            # mirror the kernel's bf16 handoff
    a2 = jnp.maximum(bn(conv(a1, params["w2"], params["b2"], 1, pad),
                        params["g2"], params["be2"]), 0.0)   # Conv2d_BN ReLU
    out = jnp.maximum(a2 + shortcut, 0.0)    # eval-mode dropout == identity
    return jnp.transpose(out, (0, 3, 1, 2))


# ---------------------------------------------------------------------------
if __name__ == "__main__":
    N, CIN, COUT, H, W, K = 2, 8, 16, 16, 16, 3
    keys = jax.random.split(jax.random.PRNGKey(0), 13)

    x = jax.random.normal(keys[0], (N, CIN, H, W), jnp.float32)
    params = dict(
        # conv1: k x k, in->out, with bias (nn.Conv2d default)
        w1=jax.random.normal(keys[1], (K, K, CIN, COUT), jnp.float32) * 0.1,
        b1=jax.random.normal(keys[2], (COUT,), jnp.float32) * 0.1,
        g1=1.0 + 0.1 * jax.random.normal(keys[3], (COUT,), jnp.float32),
        be1=0.1 * jax.random.normal(keys[4], (COUT,), jnp.float32),
        # conv2: k x k, out->out
        w2=jax.random.normal(keys[5], (K, K, COUT, COUT), jnp.float32) * 0.1,
        b2=jax.random.normal(keys[6], (COUT,), jnp.float32) * 0.1,
        g2=1.0 + 0.1 * jax.random.normal(keys[7], (COUT,), jnp.float32),
        be2=0.1 * jax.random.normal(keys[8], (COUT,), jnp.float32),
        # conv shortcut: 1x1, in->out, + its BatchNorm
        w_sc=jax.random.normal(keys[9], (1, 1, CIN, COUT), jnp.float32) * 0.1,
        b_sc=jax.random.normal(keys[10], (COUT,), jnp.float32) * 0.1,
        g_sc=1.0 + 0.1 * jax.random.normal(keys[11], (COUT,), jnp.float32),
        be_sc=0.1 * jax.random.normal(keys[12], (COUT,), jnp.float32),
    )

    fwd = jax.jit(functools.partial(conv_block_forward,
                                    kernel_size=K, stride=1, tile_m=256))
    ref_fn = jax.jit(functools.partial(conv_block_reference,
                                       kernel_size=K, stride=1))

    out = jax.block_until_ready(fwd(x, params))
    ref = jax.block_until_ready(ref_fn(x, params))

    assert out.shape == (N, COUT, H, W), out.shape
    max_err = float(jnp.max(jnp.abs(out - ref)))
    assert jnp.allclose(out, ref, atol=5e-3, rtol=5e-3), (
        f"max abs err = {max_err}")

    print("KERNEL_OK")
</pallas_src>

<mosaic_0001>
module attributes {stable_mosaic.version = 11 : i64} {
  func.func @_conv_pair_stats_kernel(%arg0: i32, %arg1: memref<256x72xbf16, #tpu.memory_space<vmem>>, %arg2: memref<256x8xbf16, #tpu.memory_space<vmem>>, %arg3: memref<72x16xbf16, #tpu.memory_space<vmem>>, %arg4: memref<8x16xbf16, #tpu.memory_space<vmem>>, %arg5: memref<1x16xf32, #tpu.memory_space<vmem>>, %arg6: memref<1x16xf32, #tpu.memory_space<vmem>>, %arg7: memref<256x16xf32, #tpu.memory_space<vmem>>, %arg8: memref<256x16xf32, #tpu.memory_space<vmem>>, %arg9: memref<8x16xf32, #tpu.memory_space<vmem>>, %arg10: memref<8x16xf32, #tpu.memory_space<vmem>>) attributes {dimension_semantics = [#tpu.dimension_semantics<parallel>], iteration_bounds = array<i64: 2>, scalar_prefetch = 0 : i64, scratch_operands = 0 : i64, tpu.core_type = #tpu.core_type<tc>, window_params = [{transform_indices = @transform_0, window_bounds = array<i64: 256, 72>}, {transform_indices = @transform_1, window_bounds = array<i64: 256, 8>}, {pipeline_mode = #tpu.pipeline_mode<synchronous>, transform_indices = @transform_2, window_bounds = array<i64: 72, 16>}, {pipeline_mode = #tpu.pipeline_mode<synchronous>, transform_indices = @transform_3, window_bounds = array<i64: 8, 16>}, {pipeline_mode = #tpu.pipeline_mode<synchronous>, transform_indices = @transform_4, window_bounds = array<i64: 1, 16>}, {pipeline_mode = #tpu.pipeline_mode<synchronous>, transform_indices = @transform_5, window_bounds = array<i64: 1, 16>}, {transform_indices = @transform_6, window_bounds = array<i64: 256, 16>}, {transform_indices = @transform_7, window_bounds = array<i64: 256, 16>}, {transform_indices = @transform_8, window_bounds = array<i64: 8, 16>}, {transform_indices = @transform_9, window_bounds = array<i64: 8, 16>}]} {
    %c0 = arith.constant 0 : index
    %c0_0 = arith.constant 0 : index
    %0 = vector.load %arg1[%c0, %c0_0] : memref<256x72xbf16, #tpu.memory_space<vmem>>, vector<256x72xbf16>
    %c0_1 = arith.constant 0 : index
    %c0_2 = arith.constant 0 : index
    %1 = vector.load %arg3[%c0_1, %c0_2] : memref<72x16xbf16, #tpu.memory_space<vmem>>, vector<72x16xbf16>
    %cst = arith.constant dense<0.000000e+00> : vector<256x16xf32>
    %2 = tpu.matmul %0, %1, %cst {dimension_numbers = #tpu.dot_dimension_numbers<[1], [0], [0], [1], [0, 0, 1, 1], [], []>} : vector<256x72xbf16>, vector<72x16xbf16>, vector<256x16xf32> -> vector<256x16xf32>
    %c0_3 = arith.constant 0 : index
    %c0_4 = arith.constant 0 : index
    %3 = vector.load %arg5[%c0_3, %c0_4] : memref<1x16xf32, #tpu.memory_space<vmem>>, vector<1x16xf32>
    %4 = vector.broadcast %3 : vector<1x16xf32> to vector<256x16xf32>
    %5 = arith.addf %2, %4 : vector<256x16xf32>
    %c0_5 = arith.constant 0 : index
    %c0_6 = arith.constant 0 : index
    %6 = vector.load %arg2[%c0_5, %c0_6] : memref<256x8xbf16, #tpu.memory_space<vmem>>, vector<256x8xbf16>
    %c0_7 = arith.constant 0 : index
    %c0_8 = arith.constant 0 : index
    %7 = vector.load %arg4[%c0_7, %c0_8] : memref<8x16xbf16, #tpu.memory_space<vmem>>, vector<8x16xbf16>
    %cst_9 = arith.constant dense<0.000000e+00> : vector<256x16xf32>
    %8 = tpu.matmul %6, %7, %cst_9 {dimension_numbers = #tpu.dot_dimension_numbers<[1], [0], [0], [1], [0, 0, 1, 1], [], []>} : vector<256x8xbf16>, vector<8x16xbf16>, vector<256x16xf32> -> vector<256x16xf32>
    %c0_10 = arith.constant 0 : index
    %c0_11 = arith.constant 0 : index
    %9 = vector.load %arg6[%c0_10, %c0_11] : memref<1x16xf32, #tpu.memory_space<vmem>>, vector<1x16xf32>
    %10 = vector.broadcast %9 : vector<1x16xf32> to vector<256x16xf32>
    %11 = arith.addf %8, %10 : vector<256x16xf32>
    %c0_12 = arith.constant 0 : index
    %c0_13 = arith.constant 0 : index
    %12 = vector.load %arg7[%c0_12, %c0_13] : memref<256x16xf32, #tpu.memory_space<vmem>>, vector<256x16xf32>
    tpu.vector_store %arg7[%c0_12, %c0_13], %5 {strides = array<i32>} : memref<256x16xf32, #tpu.memory_space<vmem>>, vector<256x16xf32>,
    %c0_14 = arith.constant 0 : index
    %c0_15 = arith.constant 0 : index
    %13 = vector.load %arg8[%c0_14, %c0_15] : memref<256x16xf32, #tpu.memory_space<vmem>>, vector<256x16xf32>
    tpu.vector_store %arg8[%c0_14, %c0_15], %11 {strides = array<i32>} : memref<256x16xf32, #tpu.memory_space<vmem>>, vector<256x16xf32>,
    %14 = tpu.iota {dimensions = array<i32: 0>} : vector<8x16xi32>
    %cst_16 = arith.constant dense<0.000000e+00> : vector<16xf32>
    %15 = vector.multi_reduction <add>, %5, %cst_16 [0] : vector<256x16xf32> to vector<16xf32>
    %16 = vector.shape_cast %15 : vector<16xf32> to vector<1x16xf32>
    %17 = arith.mulf %5, %5 : vector<256x16xf32>
    %cst_17 = arith.constant dense<0.000000e+00> : vector<16xf32>
    %18 = vector.multi_reduction <add>, %17, %cst_17 [0] : vector<256x16xf32> to vector<16xf32>
    %19 = vector.shape_cast %18 : vector<16xf32> to vector<1x16xf32>
    %c0_i32 = arith.constant 0 : i32
    %20 = vector.broadcast %c0_i32 : i32 to vector<8x16xi32>
    %21 = arith.cmpi eq, %14, %20 : vector<8x16xi32>
    %c1_i32 = arith.constant 1 : i32
    %22 = vector.broadcast %c1_i32 : i32 to vector<8x16xi32>
    %23 = arith.cmpi eq, %14, %22 : vector<8x16xi32>
    %cst_18 = arith.constant 0.000000e+00 : f32
    %24 = vector.shape_cast %19 : vector<1x16xf32> to vector<1x16xf32>
    %25 = vector.broadcast %24 : vector<1x16xf32> to vector<8x16xf32>
    %26 = vector.broadcast %cst_18 : f32 to vector<8x16xf32>
    %27 = arith.select %23, %25, %26 : vector<8x16xi1>, vector<8x16xf32>
    %28 = vector.shape_cast %16 : vector<1x16xf32> to vector<1x16xf32>
    %29 = vector.broadcast %28 : vector<1x16xf32> to vector<8x16xf32>
    %30 = arith.select %21, %29, %27 : vector<8x16xi1>, vector<8x16xf32>
    %c0_19 = arith.constant 0 : index
    %c0_20 = arith.constant 0 : index
    %31 = vector.load %arg9[%c0_19, %c0_20] : memref<8x16xf32, #tpu.memory_space<vmem>>, vector<8x16xf32>
    tpu.vector_store %arg9[%c0_19, %c0_20], %30 {strides = array<i32>} : memref<8x16xf32, #tpu.memory_space<vmem>>, vector<8x16xf32>,
    %32 = tpu.iota {dimensions = array<i32: 0>} : vector<8x16xi32>
    %cst_21 = arith.constant dense<0.000000e+00> : vector<16xf32>
    %33 = vector.multi_reduction <add>, %11, %cst_21 [0] : vector<256x16xf32> to vector<16xf32>
    %34 = vector.shape_cast %33 : vector<16xf32> to vector<1x16xf32>
    %35 = arith.mulf %11, %11 : vector<256x16xf32>
    %cst_22 = arith.constant dense<0.000000e+00> : vector<16xf32>
    %36 = vector.multi_reduction <add>, %35, %cst_22 [0] : vector<256x16xf32> to vector<16xf32>
    %37 = vector.shape_cast %36 : vector<16xf32> to vector<1x16xf32>
    %c0_i32_23 = arith.constant 0 : i32
    %38 = vector.broadcast %c0_i32_23 : i32 to vector<8x16xi32>
    %39 = arith.cmpi eq, %32, %38 : vector<8x16xi32>
    %c1_i32_24 = arith.constant 1 : i32
    %40 = vector.broadcast %c1_i32_24 : i32 to vector<8x16xi32>
    %41 = arith.cmpi eq, %32, %40 : vector<8x16xi32>
    %cst_25 = arith.constant 0.000000e+00 : f32
    %42 = vector.shape_cast %37 : vector<1x16xf32> to vector<1x16xf32>
    %43 = vector.broadcast %42 : vector<1x16xf32> to vector<8x16xf32>
    %44 = vector.broadcast %cst_25 : f32 to vector<8x16xf32>
    %45 = arith.select %41, %43, %44 : vector<8x16xi1>, vector<8x16xf32>
    %46 = vector.shape_cast %34 : vector<1x16xf32> to vector<1x16xf32>
    %47 = vector.broadcast %46 : vector<1x16xf32> to vector<8x16xf32>
    %48 = arith.select %39, %47, %45 : vector<8x16xi1>, vector<8x16xf32>
    %c0_26 = arith.constant 0 : index
    %c0_27 = arith.constant 0 : index
    %49 = vector.load %arg10[%c0_26, %c0_27] : memref<8x16xf32, #tpu.memory_space<vmem>>, vector<8x16xf32>
    tpu.vector_store %arg10[%c0_26, %c0_27], %48 {strides = array<i32>} : memref<8x16xf32, #tpu.memory_space<vmem>>, vector<8x16xf32>,
    return
  }
  func.func @transform_0(%arg0: i32) -> (i32, i32) {
    %c0_i32 = arith.constant 0 : i32
    %c0_i32_0 = arith.constant 0 : i32
    return %arg0, %c0_i32 : i32, i32
  }
  func.func @transform_1(%arg0: i32) -> (i32, i32) {
    %c0_i32 = arith.constant 0 : i32
    %c0_i32_0 = arith.constant 0 : i32
    return %arg0, %c0_i32 : i32, i32
  }
  func.func @transform_2(%arg0: i32) -> (i32, i32) {
    %c0_i32 = arith.constant 0 : i32
    %c0_i32_0 = arith.constant 0 : i32
    %c0_i32_1 = arith.constant 0 : i32
    return %c0_i32, %c0_i32_0 : i32, i32
  }
  func.func @transform_3(%arg0: i32) -> (i32, i32) {
    %c0_i32 = arith.constant 0 : i32
    %c0_i32_0 = arith.constant 0 : i32
    %c0_i32_1 = arith.constant 0 : i32
    return %c0_i32, %c0_i32_0 : i32, i32
  }
  func.func @transform_4(%arg0: i32) -> (i32, i32) {
    %c0_i32 = arith.constant 0 : i32
    %c0_i32_0 = arith.constant 0 : i32
    %c0_i32_1 = arith.constant 0 : i32
    return %c0_i32, %c0_i32_0 : i32, i32
  }
  func.func @transform_5(%arg0: i32) -> (i32, i32) {
    %c0_i32 = arith.constant 0 : i32
    %c0_i32_0 = arith.constant 0 : i32
    %c0_i32_1 = arith.constant 0 : i32
    return %c0_i32, %c0_i32_0 : i32, i32
  }
  func.func @transform_6(%arg0: i32) -> (i32, i32) {
    %c0_i32 = arith.constant 0 : i32
    %c0_i32_0 = arith.constant 0 : i32
    return %arg0, %c0_i32 : i32, i32
  }
  func.func @transform_7(%arg0: i32) -> (i32, i32) {
    %c0_i32 = arith.constant 0 : i32
    %c0_i32_0 = arith.constant 0 : i32
    return %arg0, %c0_i32 : i32, i32
  }
  func.func @transform_8(%arg0: i32) -> (i32, i32) {
    %c0_i32 = arith.constant 0 : i32
    %c0_i32_0 = arith.constant 0 : i32
    return %arg0, %c0_i32 : i32, i32
  }
  func.func @transform_9(%arg0: i32) -> (i32, i32) {
    %c0_i32 = arith.constant 0 : i32
    %c0_i32_0 = arith.constant 0 : i32
    return %arg0, %c0_i32 : i32, i32
  }
}

module attributes {stable_mosaic.version = 11 : i64} {
  func.func @_bn_relu_kernel(%arg0: i32, %arg1: memref<256x16xf32, #tpu.memory_space<vmem>>, %arg2: memref<1x16xf32, #tpu.memory_space<vmem>>, %arg3: memref<1x16xf32, #tpu.memory_space<vmem>>, %arg4: memref<256x16xbf16, #tpu.memory_space<vmem>>) attributes {dimension_semantics = [#tpu.dimension_semantics<parallel>], iteration_bounds = array<i64: 2>, scalar_prefetch = 0 : i64, scratch_operands = 0 : i64, tpu.core_type = #tpu.core_type<tc>, window_params = [{transform_indices = @transform_0, window_bounds = array<i64: 256, 16>}, {pipeline_mode = #tpu.pipeline_mode<synchronous>, transform_indices = @transform_1, window_bounds = array<i64: 1, 16>}, {pipeline_mode = #tpu.pipeline_mode<synchronous>, transform_indices = @transform_2, window_bounds = array<i64: 1, 16>}, {transform_indices = @transform_3, window_bounds = array<i64: 256, 16>}]} {
    %c0 = arith.constant 0 : index
    %c0_0 = arith.constant 0 : index
    %0 = vector.load %arg1[%c0, %c0_0] : memref<256x16xf32, #tpu.memory_space<vmem>>, vector<256x16xf32>
    %c0_1 = arith.constant 0 : index
    %c0_2 = arith.constant 0 : index
    %1 = vector.load %arg2[%c0_1, %c0_2] : memref<1x16xf32, #tpu.memory_space<vmem>>, vector<1x16xf32>
    %2 = vector.broadcast %1 : vector<1x16xf32> to vector<256x16xf32>
    %3 = arith.mulf %0, %2 : vector<256x16xf32>
    %c0_3 = arith.constant 0 : index
    %c0_4 = arith.constant 0 : index
    %4 = vector.load %arg3[%c0_3, %c0_4] : memref<1x16xf32, #tpu.memory_space<vmem>>, vector<1x16xf32>
    %5 = vector.broadcast %4 : vector<1x16xf32> to vector<256x16xf32>
    %6 = arith.addf %3, %5 : vector<256x16xf32>
    %cst = arith.constant 0.000000e+00 : f32
    %7 = vector.broadcast %cst : f32 to vector<256x16xf32>
    %8 = arith.maximumf %6, %7 : vector<256x16xf32>
    %9 = arith.truncf %8 : vector<256x16xf32> to vector<256x16xbf16>
    %c0_5 = arith.constant 0 : index
    %c0_6 = arith.constant 0 : index
    %10 = vector.load %arg4[%c0_5, %c0_6] : memref<256x16xbf16, #tpu.memory_space<vmem>>, vector<256x16xbf16>
    tpu.vector_store %arg4[%c0_5, %c0_6], %9 {strides = array<i32>} : memref<256x16xbf16, #tpu.memory_space<vmem>>, vector<256x16xbf16>,
    return
  }
  func.func @transform_0(%arg0: i32) -> (i32, i32) {
    %c0_i32 = arith.constant 0 : i32
    %c0_i32_0 = arith.constant 0 : i32
    return %arg0, %c0_i32 : i32, i32
  }
  func.func @transform_1(%arg0: i32) -> (i32, i32) {
    %c0_i32 = arith.constant 0 : i32
    %c0_i32_0 = arith.constant 0 : i32
    %c0_i32_1 = arith.constant 0 : i32
    return %c0_i32, %c0_i32_0 : i32, i32
  }
  func.func @transform_2(%arg0: i32) -> (i32, i32) {
    %c0_i32 = arith.constant 0 : i32
    %c0_i32_0 = arith.constant 0 : i32
    %c0_i32_1 = arith.constant 0 : i32
    return %c0_i32, %c0_i32_0 : i32, i32
  }
  func.func @transform_3(%arg0: i32) -> (i32, i32) {
    %c0_i32 = arith.constant 0 : i32
    %c0_i32_0 = arith.constant 0 : i32
    return %arg0, %c0_i32 : i32, i32
  }
}

module attributes {stable_mosaic.version = 11 : i64} {
  func.func @_conv_stats_kernel(%arg0: i32, %arg1: memref<256x144xbf16, #tpu.memory_space<vmem>>, %arg2: memref<144x16xbf16, #tpu.memory_space<vmem>>, %arg3: memref<1x16xf32, #tpu.memory_space<vmem>>, %arg4: memref<256x16xf32, #tpu.memory_space<vmem>>, %arg5: memref<8x16xf32, #tpu.memory_space<vmem>>) attributes {dimension_semantics = [#tpu.dimension_semantics<parallel>], iteration_bounds = array<i64: 2>, scalar_prefetch = 0 : i64, scratch_operands = 0 : i64, tpu.core_type = #tpu.core_type<tc>, window_params = [{transform_indices = @transform_0, window_bounds = array<i64: 256, 144>}, {pipeline_mode = #tpu.pipeline_mode<synchronous>, transform_indices = @transform_1, window_bounds = array<i64: 144, 16>}, {pipeline_mode = #tpu.pipeline_mode<synchronous>, transform_indices = @transform_2, window_bounds = array<i64: 1, 16>}, {transform_indices = @transform_3, window_bounds = array<i64: 256, 16>}, {transform_indices = @transform_4, window_bounds = array<i64: 8, 16>}]} {
    %c0 = arith.constant 0 : index
    %c0_0 = arith.constant 0 : index
    %0 = vector.load %arg1[%c0, %c0_0] : memref<256x144xbf16, #tpu.memory_space<vmem>>, vector<256x144xbf16>
    %c0_1 = arith.constant 0 : index
    %c0_2 = arith.constant 0 : index
    %1 = vector.load %arg2[%c0_1, %c0_2] : memref<144x16xbf16, #tpu.memory_space<vmem>>, vector<144x16xbf16>
    %cst = arith.constant dense<0.000000e+00> : vector<256x16xf32>
    %2 = tpu.matmul %0, %1, %cst {dimension_numbers = #tpu.dot_dimension_numbers<[1], [0], [0], [1], [0, 0, 1, 1], [], []>} : vector<256x144xbf16>, vector<144x16xbf16>, vector<256x16xf32> -> vector<256x16xf32>
    %c0_3 = arith.constant 0 : index
    %c0_4 = arith.constant 0 : index
    %3 = vector.load %arg3[%c0_3, %c0_4] : memref<1x16xf32, #tpu.memory_space<vmem>>, vector<1x16xf32>
    %4 = vector.broadcast %3 : vector<1x16xf32> to vector<256x16xf32>
    %5 = arith.addf %2, %4 : vector<256x16xf32>
    %c0_5 = arith.constant 0 : index
    %c0_6 = arith.constant 0 : index
    %6 = vector.load %arg4[%c0_5, %c0_6] : memref<256x16xf32, #tpu.memory_space<vmem>>, vector<256x16xf32>
    tpu.vector_store %arg4[%c0_5, %c0_6], %5 {strides = array<i32>} : memref<256x16xf32, #tpu.memory_space<vmem>>, vector<256x16xf32>,
    %7 = tpu.iota {dimensions = array<i32: 0>} : vector<8x16xi32>
    %cst_7 = arith.constant dense<0.000000e+00> : vector<16xf32>
    %8 = vector.multi_reduction <add>, %5, %cst_7 [0] : vector<256x16xf32> to vector<16xf32>
    %9 = vector.shape_cast %8 : vector<16xf32> to vector<1x16xf32>
    %10 = arith.mulf %5, %5 : vector<256x16xf32>
    %cst_8 = arith.constant dense<0.000000e+00> : vector<16xf32>
    %11 = vector.multi_reduction <add>, %10, %cst_8 [0] : vector<256x16xf32> to vector<16xf32>
    %12 = vector.shape_cast %11 : vector<16xf32> to vector<1x16xf32>
    %c0_i32 = arith.constant 0 : i32
    %13 = vector.broadcast %c0_i32 : i32 to vector<8x16xi32>
    %14 = arith.cmpi eq, %7, %13 : vector<8x16xi32>
    %c1_i32 = arith.constant 1 : i32
    %15 = vector.broadcast %c1_i32 : i32 to vector<8x16xi32>
    %16 = arith.cmpi eq, %7, %15 : vector<8x16xi32>
    %cst_9 = arith.constant 0.000000e+00 : f32
    %17 = vector.shape_cast %12 : vector<1x16xf32> to vector<1x16xf32>
    %18 = vector.broadcast %17 : vector<1x16xf32> to vector<8x16xf32>
    %19 = vector.broadcast %cst_9 : f32 to vector<8x16xf32>
    %20 = arith.select %16, %18, %19 : vector<8x16xi1>, vector<8x16xf32>
    %21 = vector.shape_cast %9 : vector<1x16xf32> to vector<1x16xf32>
    %22 = vector.broadcast %21 : vector<1x16xf32> to vector<8x16xf32>
    %23 = arith.select %14, %22, %20 : vector<8x16xi1>, vector<8x16xf32>
    %c0_10 = arith.constant 0 : index
    %c0_11 = arith.constant 0 : index
    %24 = vector.load %arg5[%c0_10, %c0_11] : memref<8x16xf32, #tpu.memory_space<vmem>>, vector<8x16xf32>
    tpu.vector_store %arg5[%c0_10, %c0_11], %23 {strides = array<i32>} : memref<8x16xf32, #tpu.memory_space<vmem>>, vector<8x16xf32>,
    return
  }
  func.func @transform_0(%arg0: i32) -> (i32, i32) {
    %c0_i32 = arith.constant 0 : i32
    %c0_i32_0 = arith.constant 0 : i32
    return %arg0, %c0_i32 : i32, i32
  }
  func.func @transform_1(%arg0: i32) -> (i32, i32) {
    %c0_i32 = arith.constant 0 : i32
    %c0_i32_0 = arith.constant 0 : i32
    %c0_i32_1 = arith.constant 0 : i32
    return %c0_i32, %c0_i32_0 : i32, i32
  }
  func.func @transform_2(%arg0: i32) -> (i32, i32) {
    %c0_i32 = arith.constant 0 : i32
    %c0_i32_0 = arith.constant 0 : i32
    %c0_i32_1 = arith.constant 0 : i32
    return %c0_i32, %c0_i32_0 : i32, i32
  }
  func.func @transform_3(%arg0: i32) -> (i32, i32) {
    %c0_i32 = arith.constant 0 : i32
    %c0_i32_0 = arith.constant 0 : i32
    return %arg0, %c0_i32 : i32, i32
  }
  func.func @transform_4(%arg0: i32) -> (i32, i32) {
    %c0_i32 = arith.constant 0 : i32
    %c0_i32_0 = arith.constant 0 : i32
    return %arg0, %c0_i32 : i32, i32
  }
}

module attributes {stable_mosaic.version = 11 : i64} {
  func.func @_dual_bn_add_relu_kernel(%arg0: i32, %arg1: memref<256x16xf32, #tpu.memory_space<vmem>>, %arg2: memref<256x16xf32, #tpu.memory_space<vmem>>, %arg3: memref<1x16xf32, #tpu.memory_space<vmem>>, %arg4: memref<1x16xf32, #tpu.memory_space<vmem>>, %arg5: memref<1x16xf32, #tpu.memory_space<vmem>>, %arg6: memref<1x16xf32, #tpu.memory_space<vmem>>, %arg7: memref<256x16xf32, #tpu.memory_space<vmem>>) attributes {dimension_semantics = [#tpu.dimension_semantics<parallel>], iteration_bounds = array<i64: 2>, scalar_prefetch = 0 : i64, scratch_operands = 0 : i64, tpu.core_type = #tpu.core_type<tc>, window_params = [{transform_indices = @transform_0, window_bounds = array<i64: 256, 16>}, {transform_indices = @transform_1, window_bounds = array<i64: 256, 16>}, {pipeline_mode = #tpu.pipeline_mode<synchronous>, transform_indices = @transform_2, window_bounds = array<i64: 1, 16>}, {pipeline_mode = #tpu.pipeline_mode<synchronous>, transform_indices = @transform_3, window_bounds = array<i64: 1, 16>}, {pipeline_mode = #tpu.pipeline_mode<synchronous>, transform_indices = @transform_4, window_bounds = array<i64: 1, 16>}, {pipeline_mode = #tpu.pipeline_mode<synchronous>, transform_indices = @transform_5, window_bounds = array<i64: 1, 16>}, {transform_indices = @transform_6, window_bounds = array<i64: 256, 16>}]} {
    %c0 = arith.constant 0 : index
    %c0_0 = arith.constant 0 : index
    %0 = vector.load %arg1[%c0, %c0_0] : memref<256x16xf32, #tpu.memory_space<vmem>>, vector<256x16xf32>
    %c0_1 = arith.constant 0 : index
    %c0_2 = arith.constant 0 : index
    %1 = vector.load %arg3[%c0_1, %c0_2] : memref<1x16xf32, #tpu.memory_space<vmem>>, vector<1x16xf32>
    %2 = vector.broadcast %1 : vector<1x16xf32> to vector<256x16xf32>
    %3 = arith.mulf %0, %2 : vector<256x16xf32>
    %c0_3 = arith.constant 0 : index
    %c0_4 = arith.constant 0 : index
    %4 = vector.load %arg4[%c0_3, %c0_4] : memref<1x16xf32, #tpu.memory_space<vmem>>, vector<1x16xf32>
    %5 = vector.broadcast %4 : vector<1x16xf32> to vector<256x16xf32>
    %6 = arith.addf %3, %5 : vector<256x16xf32>
    %cst = arith.constant 0.000000e+00 : f32
    %7 = vector.broadcast %cst : f32 to vector<256x16xf32>
    %8 = arith.maximumf %6, %7 : vector<256x16xf32>
    %c0_5 = arith.constant 0 : index
    %c0_6 = arith.constant 0 : index
    %9 = vector.load %arg2[%c0_5, %c0_6] : memref<256x16xf32, #tpu.memory_space<vmem>>, vector<256x16xf32>
    %c0_7 = arith.constant 0 : index
    %c0_8 = arith.constant 0 : index
    %10 = vector.load %arg5[%c0_7, %c0_8] : memref<1x16xf32, #tpu.memory_space<vmem>>, vector<1x16xf32>
    %11 = vector.broadcast %10 : vector<1x16xf32> to vector<256x16xf32>
    %12 = arith.mulf %9, %11 : vector<256x16xf32>
    %c0_9 = arith.constant 0 : index
    %c0_10 = arith.constant 0 : index
    %13 = vector.load %arg6[%c0_9, %c0_10] : memref<1x16xf32, #tpu.memory_space<vmem>>, vector<1x16xf32>
    %14 = vector.broadcast %13 : vector<1x16xf32> to vector<256x16xf32>
    %15 = arith.addf %12, %14 : vector<256x16xf32>
    %16 = arith.addf %8, %15 : vector<256x16xf32>
    %cst_11 = arith.constant 0.000000e+00 : f32
    %17 = vector.broadcast %cst_11 : f32 to vector<256x16xf32>
    %18 = arith.maximumf %16, %17 : vector<256x16xf32>
    %c0_12 = arith.constant 0 : index
    %c0_13 = arith.constant 0 : index
    %19 = vector.load %arg7[%c0_12, %c0_13] : memref<256x16xf32, #tpu.memory_space<vmem>>, vector<256x16xf32>
    tpu.vector_store %arg7[%c0_12, %c0_13], %18 {strides = array<i32>} : memref<256x16xf32, #tpu.memory_space<vmem>>, vector<256x16xf32>,
    return
  }
  func.func @transform_0(%arg0: i32) -> (i32, i32) {
    %c0_i32 = arith.constant 0 : i32
    %c0_i32_0 = arith.constant 0 : i32
    return %arg0, %c0_i32 : i32, i32
  }
  func.func @transform_1(%arg0: i32) -> (i32, i32) {
    %c0_i32 = arith.constant 0 : i32
    %c0_i32_0 = arith.constant 0 : i32
    return %arg0, %c0_i32 : i32, i32
  }
  func.func @transform_2(%arg0: i32) -> (i32, i32) {
    %c0_i32 = arith.constant 0 : i32
    %c0_i32_0 = arith.constant 0 : i32
    %c0_i32_1 = arith.constant 0 : i32
    return %c0_i32, %c0_i32_0 : i32, i32
  }
  func.func @transform_3(%arg0: i32) -> (i32, i32) {
    %c0_i32 = arith.constant 0 : i32
    %c0_i32_0 = arith.constant 0 : i32
    %c0_i32_1 = arith.constant 0 : i32
    return %c0_i32, %c0_i32_0 : i32, i32
  }
  func.func @transform_4(%arg0: i32) -> (i32, i32) {
    %c0_i32 = arith.constant 0 : i32
    %c0_i32_0 = arith.constant 0 : i32
    %c0_i32_1 = arith.constant 0 : i32
    return %c0_i32, %c0_i32_0 : i32, i32
  }
  func.func @transform_5(%arg0: i32) -> (i32, i32) {
    %c0_i32 = arith.constant 0 : i32
    %c0_i32_0 = arith.constant 0 : i32
    %c0_i32_1 = arith.constant 0 : i32
    return %c0_i32, %c0_i32_0 : i32, i32
  }
  func.func @transform_6(%arg0: i32) -> (i32, i32) {
    %c0_i32 = arith.constant 0 : i32
    %c0_i32_0 = arith.constant 0 : i32
    return %arg0, %c0_i32 : i32, i32
  }
}

</mosaic_0001>

<bundles_post_ra>
// kernel: conv_block_forward.5
= control target key start
LH: loop header
LB: loop body
LE: loop exit
PB: predicated region body
PF: predicated region fallthrough
CT: control target
= control target key end

     0   :  { %s646_s12 = smov 0   ;;  %s841_s0 = inlined_call_operand.vmem [shape: f32[512,16], index: 0, kind: input, shape index: {}]   ;;  %s842_s1 = inlined_call_operand.vmem [shape: f32[1,16], index: 1, kind: input, shape index: {}]   ;;  %s843_s2 = inlined_call_operand.vmem [shape: f32[1,16], index: 2, kind: input, shape index: {}]   ;;  %s844_s3 = inlined_call_operand.vmem [shape: bf16[512,16], index: 3, kind: output, shape index: {}]  }
   0x1 LB: > { %s533_s13 = sadd.s32 4294967295, %s624_s12   ;;  %p537_p0 = scmp.ge.s32.totalorder %s624_s12, 1  ;;  %s624_s12 = sphi %s646_s12, %s13_s12  }
   0x2   : > { %p138_p1 = scmp.lt.s32.totalorder %s624_s12, 3 }
   0x4   : > { %p139_p2 = pnand %p537_p0, %p138_p1 }
   0x5   : > { %s538_s14 = sshll.u32 (!%p139_p2), %s533_s13, 5  ;;  %v660_v0 = vld [vmem:[%s842_s1] ss:$0 sm:$0xff] (!%p139_p2)  ;;  %vm444_vm0 = vcmask (!%p139_p2), 125952  }
   0x6   : > { %142 = sbr.rel (%p139_p2) target bundleno = 56 (0x38), region = 32  ;;  %p163_p3 = scmp.lt.s32.totalorder (!%p139_p2), %s538_s14, 63  ;;  %v670_v1 = vld [vmem:[%s843_s2] ss:$0 sm:$0xff] (!%p139_p2) }
   0xd   : > { %s846_s14 = smov (!%p163_p3, %s538_s14), 63 }
   0xe   : > { %s539_s15 = sshll.u32 %s846_s14, 3  ;;  %s541_s23 = sshll.u32 %s846_s14, 2 }
   0xf   : > { %s665_s20 = scalar_lea.vmem %s841_s0, %s539_s15  ;;  %s699_s26 = scalar_lea.vmem %s844_s3, %s541_s23 }
  0x10   : > { %v174_v2 = vld [vmem:[%s665_s20] sm:$0xff]  ;;  %v175_v3 = vld [vmem:[%s665_s20 + $0x8] sm:$0xff]  ;;  %v176_v4 = vld [vmem:[%s665_s20 + $0x10] sm:$0xff] }
  0x11   : > { %v213_v5 = vmul.f32 %v660_v0, %v174_v2  ;;  %v214_v6 = vmul.f32 %v660_v0, %v175_v3  ;;  %v215_v7 = vmul.f32 %v660_v0, %v176_v4  ;;  %v177_v8 = vld [vmem:[%s665_s20 + $0x18] sm:$0xff]  ;;  %v178_v9 = vld [vmem:[%s665_s20 + $0x20] sm:$0xff]  ;;  %v179_v10 = vld [vmem:[%s665_s20 + $0x28] sm:$0xff] }
  0x12   : > { %v216_v11 = vmul.f32 %v660_v0, %v177_v8  ;;  %v217_v12 = vmul.f32 %v660_v0, %v178_v9  ;;  %v218_v13 = vmul.f32 %v660_v0, %v179_v10  ;;  %v180_v14 = vld [vmem:[%s665_s20 + $0x30] sm:$0xff]  ;;  %v181_v15 = vld [vmem:[%s665_s20 + $0x38] sm:$0xff]  ;;  %v182_v32 = vld [vmem:[%s665_s20 + $0x40] sm:$0xff] }
  0x13   : > { %v252_v16 = vadd.f32 %v670_v1, %v213_v5  ;;  %v253_v17 = vadd.f32 %v670_v1, %v214_v6  ;;  %v254_v18 = vadd.f32 %v670_v1, %v215_v7  ;;  %v219_v19 = vmul.f32 %v660_v0, %v180_v14  ;;  %v183_v33 = vld [vmem:[%s665_s20 + $0x48] sm:$0xff]  ;;  %v184_v34 = vld [vmem:[%s665_s20 + $0x50] sm:$0xff]  ;;  %v185_v39 = vld [vmem:[%s665_s20 + $0x58] sm:$0xff] }
  0x14   : > { %v255_v20 = vadd.f32 %v670_v1, %v216_v11  ;;  %v256_v21 = vadd.f32 %v670_v1, %v217_v12  ;;  %v257_v22 = vadd.f32 %v670_v1, %v218_v13  ;;  %v220_v23 = vmul.f32 %v660_v0, %v181_v15  ;;  %v186_v40 = vld [vmem:[%s665_s20 + $0x60] sm:$0xff]  ;;  %v187_v41 = vld [vmem:[%s665_s20 + $0x68] sm:$0xff]  ;;  %v188_v46 = vld [vmem:[%s665_s20 + $0x70] sm:$0xff] }
  0x15   : > { %v284_v24 = vmax.f32 %v252_v16, 0.0  ;;  %v285_v25 = vmax.f32 %v253_v17, 0.0  ;;  %v286_v26 = vmax.f32 %v254_v18, 0.0  ;;  %v258_v27 = vadd.f32 %v670_v1, %v219_v19  ;;  %v189_v51 = vld [vmem:[%s665_s20 + $0x78] sm:$0xff]  ;;  %v190_v10 = vld [vmem:[%s665_s20 + $0x80] sm:$0xff]  ;;  %v191_v11 = vld [vmem:[%s665_s20 + $0x88] sm:$0xff] }
  0x16   : > { %v287_v28 = vmax.f32 %v255_v20, 0.0  ;;  %v288_v29 = vmax.f32 %v256_v21, 0.0  ;;  %v289_v30 = vmax.f32 %v257_v22, 0.0  ;;  %v259_v31 = vadd.f32 %v670_v1, %v220_v23  ;;  %v192_v12 = vld [vmem:[%s665_s20 + $0x90] sm:$0xff]  ;;  %v193_v17 = vld [vmem:[%s665_s20 + $0x98] sm:$0xff]  ;;  %v194_v18 = vld [vmem:[%s665_s20 + $0xa0] sm:$0xff] }
  0x17   : > { %v578_v35 = vpack.c.bf16 %v284_v24, %v284_v24  ;;  %v579_v36 = vpack.c.bf16 %v285_v25, %v285_v25  ;;  %v580_v37 = vpack.c.bf16 %v286_v26, %v286_v26  ;;  %v290_v38 = vmax.f32 %v258_v27, 0.0  ;;  %v195_v19 = vld [vmem:[%s665_s20 + $0xa8] sm:$0xff]  ;;  %v196_v24 = vld [vmem:[%s665_s20 + $0xb0] sm:$0xff] }
  0x18   : > { %v581_v42 = vpack.c.bf16 %v287_v28, %v287_v28  ;;  %v582_v43 = vpack.c.bf16 %v288_v29, %v288_v29  ;;  %v583_v44 = vpack.c.bf16 %v289_v30, %v289_v30  ;;  %v291_v45 = vmax.f32 %v259_v31, 0.0  ;;  %v197_v29 = vld [vmem:[%s665_s20 + $0xb8] sm:$0xff] }
  0x19   : > { %445 = vst.msk [vmem:[%s699_s26] sm:$0xf] %vm444_vm0, %v578_v35  ;;  %446 = vst.msk [vmem:[%s699_s26 + $0x4] sm:$0xf] %vm444_vm0, %v579_v36  ;;  %v584_v47 = vpack.c.bf16 %v290_v38, %v290_v38  ;;  %v221_v48 = vmul.f32 %v660_v0, %v182_v32  ;;  %v222_v49 = vmul.f32 %v660_v0, %v183_v33 }
  0x1a   : > { %447 = vst.msk [vmem:[%s699_s26 + $0x8] sm:$0xf] %vm444_vm0, %v580_v37  ;;  %v223_v50 = vmul.f32 %v660_v0, %v184_v34  ;;  %448 = vst.msk [vmem:[%s699_s26 + $0xc] sm:$0xf] %vm444_vm0, %v581_v42  ;;  %v585_v52 = vpack.c.bf16 %v291_v45, %v291_v45  ;;  %v224_v53 = vmul.f32 %v660_v0, %v185_v39 }
  0x1b   : > { %449 = vst.msk [vmem:[%s699_s26 + $0x10] sm:$0xf] %vm444_vm0, %v582_v43  ;;  %450 = vst.msk [vmem:[%s699_s26 + $0x14] sm:$0xf] %vm444_vm0, %v583_v44  ;;  %v225_v54 = vmul.f32 %v660_v0, %v186_v40  ;;  %v226_v55 = vmul.f32 %v660_v0, %v187_v41  ;;  %v260_v56 = vadd.f32 %v670_v1, %v221_v48 }
  0x1c   : > { %451 = vst.msk [vmem:[%s699_s26 + $0x18] sm:$0xf] %vm444_vm0, %v584_v47  ;;  %v261_v57 = vadd.f32 %v670_v1, %v222_v49  ;;  %v262_v58 = vadd.f32 %v670_v1, %v223_v50  ;;  %v227_v59 = vmul.f32 %v660_v0, %v188_v46  ;;  %452 = vst.msk [vmem:[%s699_s26 + $0x1c] sm:$0xf] %vm444_vm0, %v585_v52  ;;  %v198_v50 = vld [vmem:[%s665_s20 + $0xc0] sm:$0xff]  ;;  %v200_v52 = vld [vmem:[%s665_s20 + $0xd0] sm:$0xff] }
  0x1d   : > { %v263_v60 = vadd.f32 %v670_v1, %v224_v53  ;;  %v264_v61 = vadd.f32 %v670_v1, %v225_v54  ;;  %v265_v62 = vadd.f32 %v670_v1, %v226_v55  ;;  %v228_v63 = vmul.f32 %v660_v0, %v189_v51  ;;  %v199_v51 = vld [vmem:[%s665_s20 + $0xc8] sm:$0xff] }
  0x1e   : > { %v292_v2 = vmax.f32 %v260_v56, 0.0  ;;  %v293_v3 = vmax.f32 %v261_v57, 0.0  ;;  %v294_v4 = vmax.f32 %v262_v58, 0.0  ;;  %v266_v5 = vadd.f32 %v670_v1, %v227_v59  ;;  %v201_v57 = vld [vmem:[%s665_s20 + $0xd8] sm:$0xff]  ;;  %v202_v58 = vld [vmem:[%s665_s20 + $0xe0] sm:$0xff]  ;;  %v203_v59 = vld [vmem:[%s665_s20 + $0xe8] sm:$0xff] }
  0x1f   : > { %v295_v6 = vmax.f32 %v263_v60, 0.0  ;;  %v296_v7 = vmax.f32 %v264_v61, 0.0  ;;  %v297_v8 = vmax.f32 %v265_v62, 0.0  ;;  %v267_v9 = vadd.f32 %v670_v1, %v228_v63 }
  0x20   : > { %v586_v13 = vpack.c.bf16 %v292_v2, %v292_v2  ;;  %v587_v14 = vpack.c.bf16 %v293_v3, %v293_v3  ;;  %v588_v15 = vpack.c.bf16 %v294_v4, %v294_v4  ;;  %v298_v16 = vmax.f32 %v266_v5, 0.0  ;;  %v204_v2 = vld [vmem:[%s665_s20 + $0xf0] sm:$0xff] }
  0x21   : > { %v589_v20 = vpack.c.bf16 %v295_v6, %v295_v6  ;;  %v590_v21 = vpack.c.bf16 %v296_v7, %v296_v7  ;;  %v591_v22 = vpack.c.bf16 %v297_v8, %v297_v8  ;;  %v299_v23 = vmax.f32 %v267_v9, 0.0  ;;  %v205_v7 = vld [vmem:[%s665_s20 + $0xf8] sm:$0xff] }
  0x22   : > { %453 = vst.msk [vmem:[%s699_s26 + $0x20] sm:$0xf] %vm444_vm0, %v586_v13  ;;  %454 = vst.msk [vmem:[%s699_s26 + $0x24] sm:$0xf] %vm444_vm0, %v587_v14  ;;  %v592_v25 = vpack.c.bf16 %v298_v16, %v298_v16  ;;  %v229_v26 = vmul.f32 %v660_v0, %v190_v10  ;;  %v230_v27 = vmul.f32 %v660_v0, %v191_v11 }
  0x23   : > { %455 = vst.msk [vmem:[%s699_s26 + $0x28] sm:$0xf] %vm444_vm0, %v588_v15  ;;  %v231_v28 = vmul.f32 %v660_v0, %v192_v12  ;;  %456 = vst.msk [vmem:[%s699_s26 + $0x2c] sm:$0xf] %vm444_vm0, %v589_v20  ;;  %v593_v30 = vpack.c.bf16 %v299_v23, %v299_v23  ;;  %v232_v31 = vmul.f32 %v660_v0, %v193_v17 }
  0x24   : > { %457 = vst.msk [vmem:[%s699_s26 + $0x30] sm:$0xf] %vm444_vm0, %v590_v21  ;;  %458 = vst.msk [vmem:[%s699_s26 + $0x34] sm:$0xf] %vm444_vm0, %v591_v22  ;;  %v233_v32 = vmul.f32 %v660_v0, %v194_v18  ;;  %v234_v33 = vmul.f32 %v660_v0, %v195_v19  ;;  %v268_v34 = vadd.f32 %v670_v1, %v229_v26 }
  0x25   : > { %459 = vst.msk [vmem:[%s699_s26 + $0x38] sm:$0xf] %vm444_vm0, %v592_v25  ;;  %v269_v35 = vadd.f32 %v670_v1, %v230_v27  ;;  %v270_v36 = vadd.f32 %v670_v1, %v231_v28  ;;  %v235_v37 = vmul.f32 %v660_v0, %v196_v24  ;;  %460 = vst.msk [vmem:[%s699_s26 + $0x3c] sm:$0xf] %vm444_vm0, %v593_v30 }
  0x26   : > { %v271_v38 = vadd.f32 %v670_v1, %v232_v31  ;;  %v272_v39 = vadd.f32 %v670_v1, %v233_v32  ;;  %v273_v40 = vadd.f32 %v670_v1, %v234_v33  ;;  %v236_v41 = vmul.f32 %v660_v0, %v197_v29 }
  0x27   : > { %v300_v42 = vmax.f32 %v268_v34, 0.0  ;;  %v301_v43 = vmax.f32 %v269_v35, 0.0  ;;  %v302_v44 = vmax.f32 %v270_v36, 0.0  ;;  %v274_v45 = vadd.f32 %v670_v1, %v235_v37 }
  0x28   : > { %v303_v46 = vmax.f32 %v271_v38, 0.0  ;;  %v304_v47 = vmax.f32 %v272_v39, 0.0  ;;  %v305_v48 = vmax.f32 %v273_v40, 0.0  ;;  %v275_v49 = vadd.f32 %v670_v1, %v236_v41 }
  0x29   : > { %v594_v53 = vpack.c.bf16 %v300_v42, %v300_v42  ;;  %v595_v54 = vpack.c.bf16 %v301_v43, %v301_v43  ;;  %v596_v55 = vpack.c.bf16 %v302_v44, %v302_v44  ;;  %v306_v56 = vmax.f32 %v274_v45, 0.0 }
  0x2a   : > { %v597_v60 = vpack.c.bf16 %v303_v46, %v303_v46  ;;  %v598_v61 = vpack.c.bf16 %v304_v47, %v304_v47  ;;  %v599_v62 = vpack.c.bf16 %v305_v48, %v305_v48  ;;  %v307_v63 = vmax.f32 %v275_v49, 0.0 }
  0x2b   : > { %461 = vst.msk [vmem:[%s699_s26 + $0x40] sm:$0xf] %vm444_vm0, %v594_v53  ;;  %462 = vst.msk [vmem:[%s699_s26 + $0x44] sm:$0xf] %vm444_vm0, %v595_v54  ;;  %v600_v3 = vpack.c.bf16 %v306_v56, %v306_v56  ;;  %v237_v4 = vmul.f32 %v660_v0, %v198_v50  ;;  %v238_v5 = vmul.f32 %v660_v0, %v199_v51 }
  0x2c   : > { %463 = vst.msk [vmem:[%s699_s26 + $0x48] sm:$0xf] %vm444_vm0, %v596_v55  ;;  %v239_v6 = vmul.f32 %v660_v0, %v200_v52  ;;  %464 = vst.msk [vmem:[%s699_s26 + $0x4c] sm:$0xf] %vm444_vm0, %v597_v60  ;;  %v601_v8 = vpack.c.bf16 %v307_v63, %v307_v63  ;;  %v240_v9 = vmul.f32 %v660_v0, %v201_v57 }
  0x2d   : > { %465 = vst.msk [vmem:[%s699_s26 + $0x50] sm:$0xf] %vm444_vm0, %v598_v61  ;;  %466 = vst.msk [vmem:[%s699_s26 + $0x54] sm:$0xf] %vm444_vm0, %v599_v62  ;;  %v241_v10 = vmul.f32 %v660_v0, %v202_v58  ;;  %v242_v11 = vmul.f32 %v660_v0, %v203_v59  ;;  %v276_v12 = vadd.f32 %v670_v1, %v237_v4 }
  0x2e   : > { %467 = vst.msk [vmem:[%s699_s26 + $0x58] sm:$0xf] %vm444_vm0, %v600_v3  ;;  %v277_v13 = vadd.f32 %v670_v1, %v238_v5  ;;  %v278_v14 = vadd.f32 %v670_v1, %v239_v6  ;;  %v243_v15 = vmul.f32 %v660_v0, %v204_v2  ;;  %468 = vst.msk [vmem:[%s699_s26 + $0x5c] sm:$0xf] %vm444_vm0, %v601_v8 }
  0x2f   : > { %v279_v16 = vadd.f32 %v670_v1, %v240_v9  ;;  %v280_v17 = vadd.f32 %v670_v1, %v241_v10  ;;  %v281_v18 = vadd.f32 %v670_v1, %v242_v11  ;;  %v244_v19 = vmul.f32 %v660_v0, %v205_v7 }
  0x30   : > { %v308_v20 = vmax.f32 %v276_v12, 0.0  ;;  %v309_v21 = vmax.f32 %v277_v13, 0.0  ;;  %v310_v22 = vmax.f32 %v278_v14, 0.0  ;;  %v282_v23 = vadd.f32 %v670_v1, %v243_v15 }
  0x31   : > { %v311_v24 = vmax.f32 %v279_v16, 0.0  ;;  %v312_v25 = vmax.f32 %v280_v17, 0.0  ;;  %v313_v26 = vmax.f32 %v281_v18, 0.0  ;;  %v283_v27 = vadd.f32 %v670_v1, %v244_v19 }
  0x32   : > { %v602_v28 = vpack.c.bf16 %v308_v20, %v308_v20  ;;  %v603_v29 = vpack.c.bf16 %v309_v21, %v309_v21  ;;  %v604_v0 = vpack.c.bf16 %v310_v22, %v310_v22  ;;  %v314_v30 = vmax.f32 %v282_v23, 0.0 }
  0x33   : > { %v605_v31 = vpack.c.bf16 %v311_v24, %v311_v24  ;;  %v606_v32 = vpack.c.bf16 %v312_v25, %v312_v25  ;;  %v607_v33 = vpack.c.bf16 %v313_v26, %v313_v26  ;;  %v315_v34 = vmax.f32 %v283_v27, 0.0 }
  0x34   : > { %469 = vst.msk [vmem:[%s699_s26 + $0x60] sm:$0xf] %vm444_vm0, %v602_v28  ;;  %470 = vst.msk [vmem:[%s699_s26 + $0x64] sm:$0xf] %vm444_vm0, %v603_v29  ;;  %v608_v35 = vpack.c.bf16 %v314_v30, %v314_v30 }
  0x35   : > { %471 = vst.msk [vmem:[%s699_s26 + $0x68] sm:$0xf] %vm444_vm0, %v604_v0  ;;  %472 = vst.msk [vmem:[%s699_s26 + $0x6c] sm:$0xf] %vm444_vm0, %v605_v31  ;;  %v609_v1 = vpack.c.bf16 %v315_v34, %v315_v34 }
  0x36   : > { %473 = vst.msk [vmem:[%s699_s26 + $0x70] sm:$0xf] %vm444_vm0, %v606_v32  ;;  %474 = vst.msk [vmem:[%s699_s26 + $0x74] sm:$0xf] %vm444_vm0, %v607_v33 }
  0x37   : > { %475 = vst.msk [vmem:[%s699_s26 + $0x78] sm:$0xf] %vm444_vm0, %v608_v35  ;;  %476 = vst.msk [vmem:[%s699_s26 + $0x7c] sm:$0xf] %vm444_vm0, %v609_v1 }
  0x38 PF: > { %s13_s12 = sadd.s32 1, %s624_s12  }
  0x39   : > { %p10_p4 = scmp.ge.s32.totalorder %s13_s12, 4  }
  0x3b   :  { %12 = sbr.rel (!%p10_p4) target bundleno = 1 (0x1), region = 62 }

// kernel: conv_block_forward.4
= control target key start
LH: loop header
LB: loop body
LE: loop exit
PB: predicated region body
PF: predicated region fallthrough
CT: control target
= control target key end

     0   :  { %s1981_s30 = smov 0   ;;  %s2570_s0 = inlined_call_operand.vmem [shape: bf16[512,72], index: 0, kind: input, shape index: {}]   ;;  %s2571_s1 = inlined_call_operand.vmem [shape: bf16[512,8], index: 1, kind: input, shape index: {}]   ;;  %s2572_s2 = inlined_call_operand.vmem [shape: bf16[72,16], index: 2, kind: input, shape index: {}]   ;;  %s2573_s3 = inlined_call_operand.vmem [shape: bf16[8,16], index: 3, kind: input, shape index: {}]   ;;  %s2574_s4 = inlined_call_operand.vmem [shape: f32[1,16], index: 4, kind: input, shape index: {}]   ;;  %s2575_s5 = inlined_call_operand.vmem [shape: f32[1,16], index: 5, kind: input, shape index: {}]   ;;  %s2576_s6 = inlined_call_operand.vmem [shape: f32[512,16], index: 6, kind: output, shape index: {0}]   ;;  %s2577_s7 = inlined_call_operand.vmem [shape: f32[512,16], index: 7, kind: output, shape index: {1}]   ;;  %s2578_s8 = inlined_call_operand.vmem [shape: f32[16,16], index: 8, kind: output, shape index: {2}]   ;;  %s2579_s9 = inlined_call_operand.vmem [shape: f32[16,16], index: 9, kind: output, shape index: {3}]  }
   0x1 LB: > { %s1987_s10 = sadd.s32 4294967295, %s1929_s30   ;;  %p1678_p0 = scmp.ge.s32.totalorder %s1929_s30, 1  ;;  %s1929_s30 = sphi %s1981_s30, %s20_s30  }
   0x2   : > { %p306_p1 = scmp.lt.s32.totalorder %s1929_s30, 3 }
   0x4   : > { %p307_p2 = pnand %p1678_p0, %p306_p1 }
   0x5   : > { %v1886_v0 = vld [vmem:[%s2572_s2] sm:$0xff] (!%p307_p2)   ;;  %vm597_vm0 = vcmask (!%p307_p2), 1043456   ;;  %v1887_v1 = vld [vmem:[%s2572_s2 + $0x8] sm:$0xff] (!%p307_p2)   ;;  %s1679_s15 = sshll.u32 (!%p307_p2), %s1987_s10, 5  ;;  %v1889_v4 = vld [vmem:[%s2572_s2 + $0x10] sm:$0xff] (!%p307_p2)   ;;  %vm882_vm1 = vcmask (!%p307_p2), 64512  }
   0x6   : > { %310 = sbr.rel (%p307_p2) target bundleno = 352 (0x160), region = 44  ;;  %1800 = vmatprep.subr.bf16.mxu0 (!%p307_p2), %v1886_v0  ;;  %v794_v2 = vld [vmem:[%s2573_s3] sm:$0xf] (!%p307_p2)  ;;  %p361_p3 = scmp.lt.s32.totalorder (!%p307_p2), %s1679_s15, 63  ;;  %v1891_v5 = vld [vmem:[%s2572_s2 + $0x18] sm:$0xff] (!%p307_p2)   ;;  %vm548_vm2 = vcmask (!%p307_p2), 588800  }
   0x7   : > { %1801 = vmatpush3.bf16.msra.mxu0 (!%p307_p2), %v1886_v0  ;;  %1877 = vmatprep.subr.msk.bf16.mxu1 (!%p307_p2), %vm597_vm0, %v794_v2  ;;  %v932_v3 = vsel (!%p307_p2), %vm597_vm0, %v794_v2, 0  ;;  %v1893_v9 = vld [vmem:[%s2572_s2 + $0x20] ss:$0 sps:$4 sm:$0xff] (!%p307_p2)   ;;  %vm1095_vm3 = vcmask (!%p307_p2), 130048   ;;  %p384_p4 = scmp.lt.s32.totalorder (!%p307_p2), %s1987_s10, 1 }
   0x8   : > { %1802 = vmatprep.subr.bf16.mxu0 (!%p307_p2), %v1887_v1  ;;  %1843 = vmatpush3.bf16.msra.mxu1 (!%p307_p2), %v932_v3  ;;  %v599_v12 = vsel (!%p307_p2), %vm597_vm0, %v1893_v9, 0  ;;  %v2095_v40 = vld [vmem:[%s2575_s5] ss:$0 sm:$0xff] (!%p307_p2) }
   0xb   : > { %1803 = vmatpush3.bf16.msra.mxu0 (!%p307_p2), %v1887_v1 }
   0xc   : > { %1804 = vmatprep.subr.bf16.mxu0 (!%p307_p2), %v1889_v4 }
   0xd   : > { %s2581_s15 = smov (!%p361_p3, %s1679_s15), 63  ;;  %s2583_s10 = smov (!%p384_p4, %s1987_s10), 1 }
   0xe   : > { %s1680_s20 = sshll.u32 %s2581_s15, 2  ;;  %s1684_s12 = sshll.u32 %s2581_s15, 3 }
   0xf   : > { %s2012_s23 = scalar_lea.vmem %s2571_s1, %s1680_s20  ;;  %s2022_s28 = scalar_lea.vmem %s2570_s0, %s1680_s20  ;;  %1805 = vmatpush3.bf16.msra.mxu0 %v1889_v4 }
  0x10   : > { %v1888_v6 = vld [vmem:[%s2012_s23] sm:$0xff]   ;;  %v1890_v7 = vld [vmem:[%s2012_s23 + $0x8] sm:$0xff]   ;;  %v1892_v8 = vld [vmem:[%s2012_s23 + $0x10] sm:$0xff]   ;;  %1806 = vmatprep.subr.bf16.mxu0 %v1891_v5  ;;  %s2102_s18 = scalar_lea.vmem %s2577_s7, %s1684_s12  ;;  %s1687_s15 = sshll.u32 %s2583_s10, 3 }
  0x11   : > { %1844 = vmatprep.mubr.msk.bf16.mxu1 %vm882_vm1, %v1888_v6  ;;  %v1895_v10 = vld [vmem:[%s2022_s28] sm:$0xff]   ;;  %v1894_v11 = vld [vmem:[%s2012_s23 + $0x18] sm:$0xff]   ;;  %v1896_v14 = vld [vmem:[%s2022_s28 + $0x8] sm:$0xff]   ;;  %s391_s26 = scalar_lea.vmem %s2579_s9, %s1687_s15  ;;  %s387_s29 = scalar_lea.vmem %s2578_s8, %s1687_s15 }
  0x12   : > { %1845 = vmatmul.mubr.msk.bf16.vlgmr.msra.gmra.mrb[0].mxu1 %vm882_vm1, %v1890_v7  ;;  %1810 = vmatprep.mubr.msk.bf16.mxu0 %vm548_vm2, %v1895_v10  ;;  %v1897_v13 = vld [vmem:[%s2012_s23 + $0x20] sm:$0xff]   ;;  %v1899_v15 = vld [vmem:[%s2022_s28 + $0x10] sm:$0xff]   ;;  %v1898_v16 = vld [vmem:[%s2012_s23 + $0x28] sm:$0xff]  }
  0x13   : > { %1848 = vmatprep.mubr.msk.bf16.mxu1 %vm882_vm1, %v1892_v8  ;;  %1807 = vmatpush3.bf16.msra.mxu0 %v1891_v5  ;;  %v1901_v17 = vld [vmem:[%s2012_s23 + $0x30] sm:$0xff]   ;;  %v1900_v18 = vld [vmem:[%s2022_s28 + $0x18] sm:$0xff]   ;;  %v1903_v19 = vld [vmem:[%s2022_s28 + $0x20] sm:$0xff]  }
  0x14   : > { %1876 = vmatprep.subr.msk.bf16.mxu0 %vm597_vm0, %v1893_v9  ;;  %v1902_v20 = vld [vmem:[%s2012_s23 + $0x38] sm:$0xff]   ;;  %v1905_v21 = vld [vmem:[%s2012_s23 + $0x40] sm:$0xff]   ;;  %v1904_v22 = vld [vmem:[%s2022_s28 + $0x28] sm:$0xff]  }
  0x15   : > { %v1907_v23 = vld [vmem:[%s2022_s28 + $0x30] sm:$0xff]   ;;  %v1906_v24 = vld [vmem:[%s2012_s23 + $0x48] sm:$0xff]   ;;  %v1908_v26 = vld [vmem:[%s2022_s28 + $0x38] sm:$0xff]  }
  0x16   : > { %v1909_v25 = vld [vmem:[%s2012_s23 + $0x50] sm:$0xff]   ;;  %v1911_v27 = vld [vmem:[%s2022_s28 + $0x40] sm:$0xff]   ;;  %v1910_v28 = vld [vmem:[%s2012_s23 + $0x58] sm:$0xff]  }
  0x17   : > { %1809 = vmatpush3.bf16.msra.mxu0 %v599_v12  ;;  %v1913_v29 = vld [vmem:[%s2012_s23 + $0x60] sm:$0xff]   ;;  %v1912_v30 = vld [vmem:[%s2022_s28 + $0x48] sm:$0xff]   ;;  %v1915_v31 = vld [vmem:[%s2022_s28 + $0x50] sm:$0xff]  }
  0x18   : > { %v1914_v32 = vld [vmem:[%s2012_s23 + $0x68] sm:$0xff]   ;;  %v1917_v33 = vld [vmem:[%s2012_s23 + $0x70] sm:$0xff]   ;;  %v1916_v34 = vld [vmem:[%s2022_s28 + $0x58] sm:$0xff]  }
  0x19   : > { %v1919_v35 = vld [vmem:[%s2022_s28 + $0x60] sm:$0xff]   ;;  %v1918_v36 = vld [vmem:[%s2012_s23 + $0x78] sm:$0xff]   ;;  %v1920_v37 = vld [vmem:[%s2022_s28 + $0x68] sm:$0xff]   ;;  %s2143_s23 = scalar_lea.vmem %s2576_s6, %s1684_s12 }
  0x1a   : > { %1849 = vmatmul.mubr.msk.bf16.gmra.mrb[4].mxu1 %vm882_vm1, %v1894_v11  ;;  %1811 = vmatmul.mubr.msk.bf16.vlgmr.msra.gmra.mrb[0].mxu0 %vm548_vm2, %v1896_v14  ;;  %v1921_v38 = vld [vmem:[%s2022_s28 + $0x70] sm:$0xff]   ;;  %v1922_v39 = vld [vmem:[%s2022_s28 + $0x78] sm:$0xff]   ;;  %v2129_v5 = vld [vmem:[%s2574_s4] ss:$0 sm:$0xff] }
  0x1b   : > { %1852 = vmatprep.mubr.msk.bf16.mxu1 %vm882_vm1, %v1897_v13  ;;  %1814 = vmatprep.mubr.msk.bf16.mxu0 %vm548_vm2, %v1899_v15 }
  0x22   : > { %1853 = vmatmul.mubr.msk.bf16.gmra.mrb[8].mxu1 %vm882_vm1, %v1898_v16  ;;  %1815 = vmatmul.mubr.msk.bf16.gmra.mrb[4].mxu0 %vm548_vm2, %v1900_v18 }
  0x23   : > { %1856 = vmatprep.mubr.msk.bf16.mxu1 %vm882_vm1, %v1901_v17  ;;  %1818 = vmatprep.mubr.msk.bf16.mxu0 %vm548_vm2, %v1903_v19 }
  0x2a   : > { %1857 = vmatmul.mubr.msk.bf16.gmra.mrb[12].mxu1 %vm882_vm1, %v1902_v20  ;;  %1819 = vmatmul.mubr.msk.bf16.gmra.mrb[8].mxu0 %vm548_vm2, %v1904_v22 }
  0x2b   : > { %1860 = vmatprep.mubr.msk.bf16.mxu1 %vm882_vm1, %v1905_v21  ;;  %1822 = vmatprep.mubr.msk.bf16.mxu0 %vm548_vm2, %v1907_v23 }
  0x32   : > { %1861 = vmatmul.mubr.msk.bf16.gmra.mrb[16].mxu1 %vm882_vm1, %v1906_v24  ;;  %1823 = vmatmul.mubr.msk.bf16.gmra.mrb[12].mxu0 %vm548_vm2, %v1908_v26 }
  0x33   : > { %1864 = vmatprep.mubr.msk.bf16.mxu1 %vm882_vm1, %v1909_v25  ;;  %1826 = vmatprep.mubr.msk.bf16.mxu0 %vm548_vm2, %v1911_v27 }
  0x3a   : > { %1865 = vmatmul.mubr.msk.bf16.gmra.mrb[20].mxu1 %vm882_vm1, %v1910_v28  ;;  %1827 = vmatmul.mubr.msk.bf16.gmra.mrb[16].mxu0 %vm548_vm2, %v1912_v30 }
  0x3b   : > { %1868 = vmatprep.mubr.msk.bf16.mxu1 %vm882_vm1, %v1913_v29  ;;  %1830 = vmatprep.mubr.msk.bf16.mxu0 %vm548_vm2, %v1915_v31 }
  0x42   : > { %1869 = vmatmul.mubr.msk.bf16.gmra.mrb[24].mxu1 %vm882_vm1, %v1914_v32  ;;  %1831 = vmatmul.mubr.msk.bf16.gmra.mrb[20].mxu0 %vm548_vm2, %v1916_v34 }
  0x43   : > { %1872 = vmatprep.mubr.msk.bf16.mxu1 %vm882_vm1, %v1917_v33  ;;  %1834 = vmatprep.mubr.msk.bf16.mxu0 %vm548_vm2, %v1919_v35 }
  0x4a   : > { %1873 = vmatmul.mubr.msk.bf16.gmra.mrb[28].mxu1 %vm882_vm1, %v1918_v36  ;;  %1835 = vmatmul.mubr.msk.bf16.gmra.mrb[24].mxu0 %vm548_vm2, %v1920_v37 }
  0x4b   : > { %1838 = vmatprep.mubr.msk.bf16.mxu0 %vm548_vm2, %v1921_v38 }
  0x52   : > { %1839 = vmatmul.mubr.msk.bf16.gmra.mrb[28].mxu0 %vm548_vm2, %v1922_v39 }
  0xe5   : > { %v1846_v41 = vpop.f32.mrb[0].mxu1 }
  0xe6   : > { %v977_v42 = vadd.f32 %v1846_v41, %v2095_v40  ;;  %v968_v43 = vpop.f32.mrb[1].mxu1 }
  0xe7   : > { %v969_v44 = vadd.f32 %v2095_v40, %v968_v43  ;;  %v1847_v45 = vpop.f32.mrb[2].mxu1 }
  0xe8   : > { %1130 = vst.msk [vmem:[%s2102_s18 + $0x10] sm:$0xff] %vm1095_vm3, %v977_v42  ;;  %v980_v46 = vadd.f32 %v1847_v45, %v2095_v40  ;;  %v971_v47 = vpop.f32.mrb[3].mxu1  ;;  %v1408_v48 = vmul.f32 %v977_v42, %v977_v42  ;;  %v1340_v52 = vsel %vm1095_vm3, %v977_v42, 0.0 }
  0xe9   : > { %1128 = vst.msk [vmem:[%s2102_s18] sm:$0xff] %vm1095_vm3, %v969_v44  ;;  %v1337_v49 = vsel %vm1095_vm3, %v969_v44, 0.0  ;;  %v1406_v50 = vmul.f32 %v969_v44, %v969_v44  ;;  %v972_v51 = vadd.f32 %v2095_v40, %v971_v47 }
  0xea   : > { %1131 = vst.msk [vmem:[%s2102_s18 + $0x18] sm:$0xff] %vm1095_vm3, %v980_v46  ;;  %v1409_v54 = vmul.f32 %v980_v46, %v980_v46  ;;  %v1441_v58 = vsel %vm1095_vm3, %v1408_v48, 0.0  ;;  %v1342_v59 = vsel %vm1095_vm3, %v980_v46, 0.0 }
  0xeb   : > { %v1438_v53 = vsel %vm1095_vm3, %v1406_v50, 0.0  ;;  %1129 = vst.msk [vmem:[%s2102_s18 + $0x8] sm:$0xff] %vm1095_vm3, %v972_v51  ;;  %v1338_v55 = vsel %vm1095_vm3, %v972_v51, 0.0  ;;  %v1407_v56 = vmul.f32 %v972_v51, %v972_v51 }
  0xec   : > { %v1339_v57 = vadd.f32 %v1338_v55, %v1337_v49  ;;  %v1443_v2 = vsel %vm1095_vm3, %v1409_v54, 0.0 }
  0xed   : > { %v1439_v60 = vsel %vm1095_vm3, %v1407_v56, 0.0  ;;  %v1850_v61 = vpop.f32.mrb[4].mxu1  ;;  %v1812_v10 = vpop.f32.mrb[0].mxu0 }
  0xee   : > { %v1341_v62 = vadd.f32 %v1340_v52, %v1339_v57  ;;  %v1440_v63 = vadd.f32 %v1439_v60, %v1438_v53  ;;  %v993_v0 = vadd.f32 %v1850_v61, %v2095_v40  ;;  %v984_v1 = vpop.f32.mrb[5].mxu1  ;;  %v635_v15 = vpop.f32.mrb[1].mxu0  ;;  %v644_v18 = vadd.f32 %v1812_v10, %v2129_v5 }
  0xef   : > { %v985_v3 = vadd.f32 %v2095_v40, %v984_v1  ;;  %v1851_v4 = vpop.f32.mrb[6].mxu1  ;;  %v1813_v19 = vpop.f32.mrb[2].mxu0  ;;  %v636_v31 = vadd.f32 %v2129_v5, %v635_v15 }
  0xf0   : > { %v1442_v6 = vadd.f32 %v1441_v58, %v1440_v63  ;;  %1134 = vst.msk [vmem:[%s2102_s18 + $0x30] sm:$0xff] %vm1095_vm3, %v993_v0  ;;  %v1412_v7 = vmul.f32 %v993_v0, %v993_v0  ;;  %v1343_v8 = vadd.f32 %v1342_v59, %v1341_v62  ;;  %v987_v9 = vpop.f32.mrb[7].mxu1  ;;  %v996_v13 = vadd.f32 %v1851_v4, %v2095_v40  ;;  %v638_v24 = vpop.f32.mrb[3].mxu0 }
  0xf1   : > { %1132 = vst.msk [vmem:[%s2102_s18 + $0x20] sm:$0xff] %vm1095_vm3, %v985_v3  ;;  %v1344_v11 = vsel %vm1095_vm3, %v985_v3, 0.0  ;;  %v1410_v12 = vmul.f32 %v985_v3, %v985_v3  ;;  %v988_v14 = vadd.f32 %v2095_v40, %v987_v9  ;;  %v1348_v20 = vsel %vm1095_vm3, %v993_v0, 0.0  ;;  %1098 = vst.msk [vmem:[%s2143_s23 + $0x10] sm:$0xff] %vm1095_vm3, %v644_v18 }
  0xf2   : > { %v1345_v16 = vadd.f32 %v1344_v11, %v1343_v8  ;;  %v1444_v17 = vadd.f32 %v1443_v2, %v1442_v6  ;;  %1135 = vst.msk [vmem:[%s2102_s18 + $0x38] sm:$0xff] %vm1095_vm3, %v996_v13  ;;  %v1413_v22 = vmul.f32 %v996_v13, %v996_v13  ;;  %v1449_v25 = vsel %vm1095_vm3, %v1412_v7, 0.0  ;;  %1096 = vst.msk [vmem:[%s2143_s23] sm:$0xff] %vm1095_vm3, %v636_v31 }
  0xf3   : > { %v1445_v21 = vsel %vm1095_vm3, %v1410_v12, 0.0  ;;  %1133 = vst.msk [vmem:[%s2102_s18 + $0x28] sm:$0xff] %vm1095_vm3, %v988_v14  ;;  %v1346_v23 = vsel %vm1095_vm3, %v988_v14, 0.0  ;;  %v1411_v28 = vmul.f32 %v988_v14, %v988_v14  ;;  %v1350_v29 = vsel %vm1095_vm3, %v996_v13, 0.0 }
  0xf4   : > { %v1446_v26 = vadd.f32 %v1445_v21, %v1444_v17  ;;  %v1347_v27 = vadd.f32 %v1346_v23, %v1345_v16  ;;  %v1233_v30 = vmul.f32 %v644_v18, %v644_v18  ;;  %v647_v32 = vadd.f32 %v1813_v19, %v2129_v5 }
  0xf5   : > { %v1854_v33 = vpop.f32.mrb[8].mxu1  ;;  %v1447_v35 = vsel %vm1095_vm3, %v1411_v28, 0.0  ;;  %v639_v36 = vadd.f32 %v2129_v5, %v638_v24  ;;  %v1451_v39 = vsel %vm1095_vm3, %v1413_v22, 0.0  ;;  %v1165_v42 = vsel %vm1095_vm3, %v644_v18, 0.0  ;;  %v1816_v50 = vpop.f32.mrb[4].mxu0 }
  0xf6   : > { %v1349_v34 = vadd.f32 %v1348_v20, %v1347_v27  ;;  %v1009_v37 = vadd.f32 %v1854_v33, %v2095_v40  ;;  %v1000_v38 = vpop.f32.mrb[9].mxu1  ;;  %v1448_v41 = vadd.f32 %v1447_v35, %v1446_v26  ;;  %v1231_v43 = vmul.f32 %v636_v31, %v636_v31  ;;  %1099 = vst.msk [vmem:[%s2143_s23 + $0x18] sm:$0xff] %vm1095_vm3, %v647_v32  ;;  %v651_v55 = vpop.f32.mrb[5].mxu0 }
  0xf7   : > { %v1855_v44 = vpop.f32.mrb[10].mxu1  ;;  %v1266_v45 = vsel %vm1095_vm3, %v1233_v30, 0.0  ;;  %v1162_v46 = vsel %vm1095_vm3, %v636_v31, 0.0  ;;  %1097 = vst.msk [vmem:[%s2143_s23 + $0x8] sm:$0xff] %vm1095_vm3, %v639_v36  ;;  %v1163_v47 = vsel %vm1095_vm3, %v639_v36, 0.0  ;;  %v1232_v48 = vmul.f32 %v639_v36, %v639_v36  ;;  %v1817_v60 = vpop.f32.mrb[6].mxu0 }
  0xf8   : > { %1138 = vst.msk [vmem:[%s2102_s18 + $0x50] sm:$0xff] %vm1095_vm3, %v1009_v37  ;;  %v1003_v49 = vpop.f32.mrb[11].mxu1  ;;  %v1450_v51 = vadd.f32 %v1449_v25, %v1448_v41  ;;  %v1167_v52 = vsel %vm1095_vm3, %v647_v32, 0.0  ;;  %v1234_v53 = vmul.f32 %v647_v32, %v647_v32  ;;  %v1164_v54 = vadd.f32 %v1163_v47, %v1162_v46  ;;  %v654_v1 = vpop.f32.mrb[7].mxu0 }
  0xf9   : > { %v1263_v56 = vsel %vm1095_vm3, %v1231_v43, 0.0  ;;  %v1264_v57 = vsel %vm1095_vm3, %v1232_v48, 0.0  ;;  %v1416_v58 = vmul.f32 %v1009_v37, %v1009_v37  ;;  %v1001_v59 = vadd.f32 %v2095_v40, %v1000_v38 }
  0xfa   : > { %v1166_v61 = vadd.f32 %v1165_v42, %v1164_v54  ;;  %v1265_v62 = vadd.f32 %v1264_v57, %v1263_v56  ;;  %v1351_v63 = vadd.f32 %v1350_v29, %v1349_v34  ;;  %v1452_v0 = vadd.f32 %v1451_v39, %v1450_v51 }
  0xfb   : > { %v1356_v2 = vsel %vm1095_vm3, %v1009_v37, 0.0  ;;  %1136 = vst.msk [vmem:[%s2102_s18 + $0x40] sm:$0xff] %vm1095_vm3, %v1001_v59  ;;  %v1352_v3 = vsel %vm1095_vm3, %v1001_v59, 0.0  ;;  %v1414_v4 = vmul.f32 %v1001_v59, %v1001_v59  ;;  %v1012_v6 = vadd.f32 %v1855_v44, %v2095_v40 }
  0xfc   : > { %v1267_v7 = vadd.f32 %v1266_v45, %v1265_v62  ;;  %v1353_v8 = vadd.f32 %v1352_v3, %v1351_v63  ;;  %v1004_v9 = vadd.f32 %v2095_v40, %v1003_v49  ;;  %v660_v10 = vadd.f32 %v1816_v50, %v2129_v5 }
  0xfd   : > { %v1858_v11 = vpop.f32.mrb[12].mxu1  ;;  %v1268_v12 = vsel %vm1095_vm3, %v1234_v53, 0.0  ;;  %v1457_v13 = vsel %vm1095_vm3, %v1416_v58, 0.0  ;;  %v1453_v14 = vsel %vm1095_vm3, %v1414_v4, 0.0  ;;  %1139 = vst.msk [vmem:[%s2102_s18 + $0x58] sm:$0xff] %vm1095_vm3, %v1012_v6  ;;  %v652_v15 = vadd.f32 %v2129_v5, %v651_v55  ;;  %v1820_v27 = vpop.f32.mrb[8].mxu0 }
  0xfe   : > { %v1016_v16 = vpop.f32.mrb[13].mxu1  ;;  %v1454_v17 = vadd.f32 %v1453_v14, %v1452_v0  ;;  %v1358_v18 = vsel %vm1095_vm3, %v1012_v6, 0.0  ;;  %1137 = vst.msk [vmem:[%s2102_s18 + $0x48] sm:$0xff] %vm1095_vm3, %v1004_v9  ;;  %v1354_v19 = vsel %vm1095_vm3, %v1004_v9, 0.0  ;;  %v1415_v20 = vmul.f32 %v1004_v9, %v1004_v9  ;;  %1102 = vst.msk [vmem:[%s2143_s23 + $0x30] sm:$0xff] %vm1095_vm3, %v660_v10  ;;  %v667_v32 = vpop.f32.mrb[9].mxu0 }
  0xff   : > { %v1859_v21 = vpop.f32.mrb[14].mxu1  ;;  %v1417_v22 = vmul.f32 %v1012_v6, %v1012_v6  ;;  %v1355_v23 = vadd.f32 %v1354_v19, %v1353_v8  ;;  %v1237_v24 = vmul.f32 %v660_v10, %v660_v10  ;;  %1100 = vst.msk [vmem:[%s2143_s23 + $0x20] sm:$0xff] %vm1095_vm3, %v652_v15  ;;  %v1168_v25 = vadd.f32 %v1167_v52, %v1166_v61  ;;  %v2203_v37 = vpop.f32.mrb[10].mxu0 }
 0x100   : > { %v1019_v26 = vpop.f32.mrb[15].mxu1  ;;  %v1455_v28 = vsel %vm1095_vm3, %v1415_v20, 0.0  ;;  %v1169_v29 = vsel %vm1095_vm3, %v652_v15, 0.0  ;;  %v1235_v30 = vmul.f32 %v652_v15, %v652_v15  ;;  %v1269_v31 = vadd.f32 %v1268_v12, %v1267_v7  ;;  %v2209_v43 = vpop.f32.mrb[11].mxu0 }
 0x101   : > { %v1357_v33 = vadd.f32 %v1356_v2, %v1355_v23  ;;  %v1456_v34 = vadd.f32 %v1455_v28, %v1454_v17  ;;  %v1173_v35 = vsel %vm1095_vm3, %v660_v10, 0.0  ;;  %v1170_v36 = vadd.f32 %v1169_v29, %v1168_v25 }
 0x102   : > { %v1270_v38 = vsel %vm1095_vm3, %v1235_v30, 0.0  ;;  %v663_v39 = vadd.f32 %v1817_v60, %v2129_v5  ;;  %v655_v41 = vadd.f32 %v2129_v5, %v654_v1  ;;  %v1025_v42 = vadd.f32 %v1858_v11, %v2095_v40 }
 0x103   : > { %v1458_v44 = vadd.f32 %v1457_v13, %v1456_v34  ;;  %v1271_v45 = vadd.f32 %v1270_v38, %v1269_v31  ;;  %v1017_v46 = vadd.f32 %v2095_v40, %v1016_v16  ;;  %v1359_v47 = vadd.f32 %v1358_v18, %v1357_v33 }
 0x104   : > { %v1459_v48 = vsel %vm1095_vm3, %v1417_v22, 0.0  ;;  %v1274_v49 = vsel %vm1095_vm3, %v1237_v24, 0.0  ;;  %1103 = vst.msk [vmem:[%s2143_s23 + $0x38] sm:$0xff] %vm1095_vm3, %v663_v39  ;;  %1101 = vst.msk [vmem:[%s2143_s23 + $0x28] sm:$0xff] %vm1095_vm3, %v655_v41  ;;  %v1171_v50 = vsel %vm1095_vm3, %v655_v41, 0.0  ;;  %v1236_v51 = vmul.f32 %v655_v41, %v655_v41 }
 0x105   : > { %1142 = vst.msk [vmem:[%s2102_s18 + $0x70] sm:$0xff] %vm1095_vm3, %v1025_v42  ;;  %v1862_v52 = vpop.f32.mrb[16].mxu1  ;;  %v1175_v53 = vsel %vm1095_vm3, %v663_v39, 0.0  ;;  %v1238_v54 = vmul.f32 %v663_v39, %v663_v39  ;;  %v1172_v55 = vadd.f32 %v1171_v50, %v1170_v36  ;;  %1140 = vst.msk [vmem:[%s2102_s18 + $0x60] sm:$0xff] %vm1095_vm3, %v1017_v46  ;;  %v1360_v56 = vsel %vm1095_vm3, %v1017_v46, 0.0  ;;  %v2231_v4 = vpop.f32.mrb[12].mxu0 }
 0x106   : > { %v1032_v57 = vpop.f32.mrb[17].mxu1  ;;  %v1272_v58 = vsel %vm1095_vm3, %v1236_v51, 0.0  ;;  %v1420_v59 = vmul.f32 %v1025_v42, %v1025_v42  ;;  %v1361_v60 = vadd.f32 %v1360_v56, %v1359_v47  ;;  %v1418_v61 = vmul.f32 %v1017_v46, %v1017_v46  ;;  %v2237_v10 = vpop.f32.mrb[13].mxu0 }
 0x107   : > { %v2226_v62 = vpop.f32.mrb[18].mxu1  ;;  %v1174_v63 = vadd.f32 %v1173_v35, %v1172_v55  ;;  %v1273_v0 = vadd.f32 %v1272_v58, %v1271_v45  ;;  %v1364_v1 = vsel %vm1095_vm3, %v1025_v42, 0.0  ;;  %v1460_v2 = vadd.f32 %v1459_v48, %v1458_v44  ;;  %v2240_v15 = vpop.f32.mrb[14].mxu0 }
 0x108   : > { %v2229_v3 = vpop.f32.mrb[19].mxu1  ;;  %v1461_v6 = vsel %vm1095_vm3, %v1418_v61, 0.0  ;;  %v1028_v7 = vadd.f32 %v1859_v21, %v2095_v40  ;;  %v1020_v8 = vadd.f32 %v2095_v40, %v1019_v26  ;;  %v676_v9 = vadd.f32 %v1820_v27, %v2129_v5  ;;  %v2251_v20 = vpop.f32.mrb[15].mxu0 }
 0x109   : > { %v1275_v11 = vadd.f32 %v1274_v49, %v1273_v0  ;;  %v1462_v12 = vadd.f32 %v1461_v6, %v1460_v2  ;;  %v668_v13 = vadd.f32 %v2129_v5, %v667_v32  ;;  %v1176_v14 = vadd.f32 %v1175_v53, %v1174_v63 }
 0x10a   : > { %v1276_v16 = vsel %vm1095_vm3, %v1238_v54, 0.0  ;;  %v1465_v17 = vsel %vm1095_vm3, %v1420_v59, 0.0  ;;  %1143 = vst.msk [vmem:[%s2102_s18 + $0x78] sm:$0xff] %vm1095_vm3, %v1028_v7  ;;  %1141 = vst.msk [vmem:[%s2102_s18 + $0x68] sm:$0xff] %vm1095_vm3, %v1020_v8  ;;  %v1362_v18 = vsel %vm1095_vm3, %v1020_v8, 0.0  ;;  %v1419_v19 = vmul.f32 %v1020_v8, %v1020_v8 }
 0x10b   : > { %1106 = vst.msk [vmem:[%s2143_s23 + $0x50] sm:$0xff] %vm1095_vm3, %v676_v9  ;;  %v1366_v21 = vsel %vm1095_vm3, %v1028_v7, 0.0  ;;  %v1421_v22 = vmul.f32 %v1028_v7, %v1028_v7  ;;  %v1363_v23 = vadd.f32 %v1362_v18, %v1361_v60  ;;  %1104 = vst.msk [vmem:[%s2143_s23 + $0x40] sm:$0xff] %vm1095_vm3, %v668_v13  ;;  %v1177_v24 = vsel %vm1095_vm3, %v668_v13, 0.0 }
 0x10c   : > { %v1463_v25 = vsel %vm1095_vm3, %v1419_v19, 0.0  ;;  %v1241_v26 = vmul.f32 %v676_v9, %v676_v9  ;;  %v1178_v27 = vadd.f32 %v1177_v24, %v1176_v14  ;;  %v1239_v28 = vmul.f32 %v668_v13, %v668_v13 }
 0x10d   : > { %v2258_v29 = vpop.f32.mrb[20].mxu1  ;;  %v1365_v30 = vadd.f32 %v1364_v1, %v1363_v23  ;;  %v1464_v31 = vadd.f32 %v1463_v25, %v1462_v12  ;;  %v1181_v32 = vsel %vm1095_vm3, %v676_v9, 0.0  ;;  %v1277_v33 = vadd.f32 %v1276_v16, %v1275_v11  ;;  %v2274_v48 = vpop.f32.mrb[16].mxu0 }
 0x10e   : > { %v2261_v34 = vpop.f32.mrb[21].mxu1  ;;  %v1278_v35 = vsel %vm1095_vm3, %v1239_v28, 0.0  ;;  %v679_v36 = vadd.f32 %v2203_v37, %v2129_v5  ;;  %v671_v38 = vadd.f32 %v2129_v5, %v2209_v43  ;;  %v1041_v39 = vadd.f32 %v1862_v52, %v2095_v40  ;;  %v2285_v51 = vpop.f32.mrb[17].mxu0 }
 0x10f   : > { %v2269_v41 = vpop.f32.mrb[22].mxu1  ;;  %v1466_v42 = vadd.f32 %v1465_v17, %v1464_v31  ;;  %v1279_v44 = vadd.f32 %v1278_v35, %v1277_v33  ;;  %v1033_v45 = vadd.f32 %v2095_v40, %v1032_v57  ;;  %v1367_v46 = vadd.f32 %v1366_v21, %v1365_v30  ;;  %v2291_v56 = vpop.f32.mrb[18].mxu0 }
 0x110   : > { %v2272_v47 = vpop.f32.mrb[23].mxu1  ;;  %v1467_v37 = vsel %vm1095_vm3, %v1421_v22, 0.0  ;;  %v1282_v49 = vsel %vm1095_vm3, %v1241_v26, 0.0  ;;  %1107 = vst.msk [vmem:[%s2143_s23 + $0x58] sm:$0xff] %vm1095_vm3, %v679_v36  ;;  %1105 = vst.msk [vmem:[%s2143_s23 + $0x48] sm:$0xff] %vm1095_vm3, %v671_v38  ;;  %v1179_v43 = vsel %vm1095_vm3, %v671_v38, 0.0  ;;  %v1240_v50 = vmul.f32 %v671_v38, %v671_v38 }
 0x111   : > { %1146 = vst.msk [vmem:[%s2102_s18 + $0x90] sm:$0xff] %vm1095_vm3, %v1041_v39  ;;  %v1183_v52 = vsel %vm1095_vm3, %v679_v36, 0.0  ;;  %v1242_v53 = vmul.f32 %v679_v36, %v679_v36  ;;  %v1180_v54 = vadd.f32 %v1179_v43, %v1178_v27  ;;  %1144 = vst.msk [vmem:[%s2102_s18 + $0x80] sm:$0xff] %vm1095_vm3, %v1033_v45  ;;  %v1368_v55 = vsel %vm1095_vm3, %v1033_v45, 0.0  ;;  %v2294_v61 = vpop.f32.mrb[19].mxu0 }
 0x112   : > { %v1280_v57 = vsel %vm1095_vm3, %v1240_v50, 0.0  ;;  %v1424_v58 = vmul.f32 %v1041_v39, %v1041_v39  ;;  %v1369_v59 = vadd.f32 %v1368_v55, %v1367_v46  ;;  %v1422_v60 = vmul.f32 %v1033_v45, %v1033_v45 }
 0x113   : > { %v1182_v63 = vadd.f32 %v1181_v32, %v1180_v54  ;;  %v1281_v0 = vadd.f32 %v1280_v57, %v1279_v44  ;;  %v1372_v1 = vsel %vm1095_vm3, %v1041_v39, 0.0  ;;  %v1468_v2 = vadd.f32 %v1467_v37, %v1466_v42 }
 0x114   : > { %v1469_v6 = vsel %vm1095_vm3, %v1422_v60, 0.0  ;;  %v1044_v7 = vadd.f32 %v2226_v62, %v2095_v40  ;;  %v1036_v8 = vadd.f32 %v2095_v40, %v2229_v3  ;;  %v692_v9 = vadd.f32 %v2231_v4, %v2129_v5 }
 0x115   : > { %v2304_v11 = vpop.f32.mrb[24].mxu1  ;;  %v1283_v12 = vadd.f32 %v1282_v49, %v1281_v0  ;;  %v1470_v13 = vadd.f32 %v1469_v6, %v1468_v2  ;;  %v684_v14 = vadd.f32 %v2129_v5, %v2237_v10  ;;  %v1184_v16 = vadd.f32 %v1183_v52, %v1182_v63  ;;  %v2327_v25 = vpop.f32.mrb[20].mxu0 }
 0x116   : > { %v2308_v17 = vpop.f32.mrb[25].mxu1  ;;  %v1284_v18 = vsel %vm1095_vm3, %v1242_v53, 0.0  ;;  %v1473_v62 = vsel %vm1095_vm3, %v1424_v58, 0.0  ;;  %1147 = vst.msk [vmem:[%s2102_s18 + $0x98] sm:$0xff] %vm1095_vm3, %v1044_v7  ;;  %1145 = vst.msk [vmem:[%s2102_s18 + $0x88] sm:$0xff] %vm1095_vm3, %v1036_v8  ;;  %v1370_v3 = vsel %vm1095_vm3, %v1036_v8, 0.0  ;;  %v1423_v4 = vmul.f32 %v1036_v8, %v1036_v8 }
 0x117   : > { %1110 = vst.msk [vmem:[%s2143_s23 + $0x70] sm:$0xff] %vm1095_vm3, %v692_v9  ;;  %v2319_v19 = vpop.f32.mrb[26].mxu1  ;;  %v1374_v10 = vsel %vm1095_vm3, %v1044_v7, 0.0  ;;  %v1425_v21 = vmul.f32 %v1044_v7, %v1044_v7  ;;  %v1371_v22 = vadd.f32 %v1370_v3, %v1369_v59  ;;  %1108 = vst.msk [vmem:[%s2143_s23 + $0x60] sm:$0xff] %vm1095_vm3, %v684_v14  ;;  %v1185_v23 = vsel %vm1095_vm3, %v684_v14, 0.0  ;;  %v2330_v31 = vpop.f32.mrb[21].mxu0 }
 0x118   : > { %v2325_v24 = vpop.f32.mrb[27].mxu1  ;;  %v1471_v26 = vsel %vm1095_vm3, %v1423_v4, 0.0  ;;  %v1245_v27 = vmul.f32 %v692_v9, %v692_v9  ;;  %v1186_v28 = vadd.f32 %v1185_v23, %v1184_v16  ;;  %v1243_v30 = vmul.f32 %v684_v14, %v684_v14  ;;  %v2333_v38 = vpop.f32.mrb[22].mxu0 }
 0x119   : > { %v1373_v32 = vadd.f32 %v1372_v1, %v1371_v22  ;;  %v1472_v33 = vadd.f32 %v1471_v26, %v1470_v13  ;;  %v1189_v35 = vsel %vm1095_vm3, %v692_v9, 0.0  ;;  %v1285_v36 = vadd.f32 %v1284_v18, %v1283_v12  ;;  %v2342_v46 = vpop.f32.mrb[23].mxu0 }
 0x11a   : > { %v1286_v39 = vsel %vm1095_vm3, %v1243_v30, 0.0  ;;  %v695_v42 = vadd.f32 %v2240_v15, %v2129_v5  ;;  %v687_v44 = vadd.f32 %v2129_v5, %v2251_v20  ;;  %v1057_v45 = vadd.f32 %v2258_v29, %v2095_v40 }
 0x11b   : > { %v1474_v37 = vadd.f32 %v1473_v62, %v1472_v33  ;;  %v1287_v49 = vadd.f32 %v1286_v39, %v1285_v36  ;;  %v1049_v43 = vadd.f32 %v2095_v40, %v2261_v34  ;;  %v1375_v50 = vadd.f32 %v1374_v10, %v1373_v32 }
 0x11c   : > { %v1475_v52 = vsel %vm1095_vm3, %v1425_v21, 0.0  ;;  %v1290_v53 = vsel %vm1095_vm3, %v1245_v27, 0.0  ;;  %1111 = vst.msk [vmem:[%s2143_s23 + $0x78] sm:$0xff] %vm1095_vm3, %v695_v42  ;;  %1109 = vst.msk [vmem:[%s2143_s23 + $0x68] sm:$0xff] %vm1095_vm3, %v687_v44  ;;  %v1187_v15 = vsel %vm1095_vm3, %v687_v44, 0.0  ;;  %v1244_v20 = vmul.f32 %v687_v44, %v687_v44 }
 0x11d   : > { %1150 = vst.msk [vmem:[%s2102_s18 + $0xb0] sm:$0xff] %vm1095_vm3, %v1057_v45  ;;  %v2355_v29 = vpop.f32.mrb[28].mxu1  ;;  %v1191_v54 = vsel %vm1095_vm3, %v695_v42, 0.0  ;;  %v1246_v55 = vmul.f32 %v695_v42, %v695_v42  ;;  %v1188_v34 = vadd.f32 %v1187_v15, %v1186_v28  ;;  %1148 = vst.msk [vmem:[%s2102_s18 + $0xa0] sm:$0xff] %vm1095_vm3, %v1049_v43  ;;  %v1376_v57 = vsel %vm1095_vm3, %v1049_v43, 0.0  ;;  %v2369_v12 = vpop.f32.mrb[24].mxu0 }
 0x11e   : > { %v2361_v58 = vpop.f32.mrb[29].mxu1  ;;  %v1288_v59 = vsel %vm1095_vm3, %v1244_v20, 0.0  ;;  %v1428_v60 = vmul.f32 %v1057_v45, %v1057_v45  ;;  %v1377_v63 = vadd.f32 %v1376_v57, %v1375_v50  ;;  %v1426_v0 = vmul.f32 %v1049_v43, %v1049_v43  ;;  %v2378_v62 = vpop.f32.mrb[25].mxu0 }
 0x11f   : > { %v2364_v1 = vpop.f32.mrb[30].mxu1  ;;  %v1190_v2 = vadd.f32 %v1189_v35, %v1188_v34  ;;  %v1289_v6 = vadd.f32 %v1288_v59, %v1287_v49  ;;  %v1380_v7 = vsel %vm1095_vm3, %v1057_v45, 0.0  ;;  %v1476_v8 = vadd.f32 %v1475_v52, %v1474_v37  ;;  %v2382_v22 = vpop.f32.mrb[26].mxu0 }
 0x120   : > { %v2367_v9 = vpop.f32.mrb[31].mxu1  ;;  %v1477_v13 = vsel %vm1095_vm3, %v1426_v0, 0.0  ;;  %v1060_v14 = vadd.f32 %v2269_v41, %v2095_v40  ;;  %v1052_v16 = vadd.f32 %v2095_v40, %v2272_v47  ;;  %v708_v18 = vadd.f32 %v2274_v48, %v2129_v5  ;;  %v2393_v26 = vpop.f32.mrb[27].mxu0 }
 0x121   : > { %v1291_v3 = vadd.f32 %v1290_v53, %v1289_v6  ;;  %v1478_v4 = vadd.f32 %v1477_v13, %v1476_v8  ;;  %v700_v10 = vadd.f32 %v2129_v5, %v2285_v51  ;;  %v1192_v21 = vadd.f32 %v1191_v54, %v1190_v2 }
 0x122   : > { %v1292_v23 = vsel %vm1095_vm3, %v1246_v55, 0.0  ;;  %v1481_v41 = vsel %vm1095_vm3, %v1428_v60, 0.0  ;;  %1151 = vst.msk [vmem:[%s2102_s18 + $0xb8] sm:$0xff] %vm1095_vm3, %v1060_v14  ;;  %1149 = vst.msk [vmem:[%s2102_s18 + $0xa8] sm:$0xff] %vm1095_vm3, %v1052_v16  ;;  %v1378_v47 = vsel %vm1095_vm3, %v1052_v16, 0.0  ;;  %v1427_v48 = vmul.f32 %v1052_v16, %v1052_v16 }
 0x123   : > { %1114 = vst.msk [vmem:[%s2143_s23 + $0x90] sm:$0xff] %vm1095_vm3, %v708_v18  ;;  %v1382_v51 = vsel %vm1095_vm3, %v1060_v14, 0.0  ;;  %v1429_v27 = vmul.f32 %v1060_v14, %v1060_v14  ;;  %v1379_v28 = vadd.f32 %v1378_v47, %v1377_v63  ;;  %1112 = vst.msk [vmem:[%s2143_s23 + $0x80] sm:$0xff] %vm1095_vm3, %v700_v10  ;;  %v1193_v30 = vsel %vm1095_vm3, %v700_v10, 0.0 }
 0x124   : > { %v1479_v32 = vsel %vm1095_vm3, %v1427_v48, 0.0  ;;  %v1249_v33 = vmul.f32 %v708_v18, %v708_v18  ;;  %v1194_v35 = vadd.f32 %v1193_v30, %v1192_v21  ;;  %v1247_v36 = vmul.f32 %v700_v10, %v700_v10 }
 0x125   : > { %v1381_v39 = vadd.f32 %v1380_v7, %v1379_v28  ;;  %v1480_v42 = vadd.f32 %v1479_v32, %v1478_v4  ;;  %v1197_v44 = vsel %vm1095_vm3, %v708_v18, 0.0  ;;  %v1293_v45 = vadd.f32 %v1292_v23, %v1291_v3  ;;  %v2410_v54 = vpop.f32.mrb[28].mxu0 }
 0x126   : > { %v1294_v37 = vsel %vm1095_vm3, %v1247_v36, 0.0  ;;  %v711_v49 = vadd.f32 %v2291_v56, %v2129_v5  ;;  %v703_v43 = vadd.f32 %v2129_v5, %v2294_v61  ;;  %v1073_v50 = vadd.f32 %v2304_v11, %v2095_v40  ;;  %v2421_v11 = vpop.f32.mrb[29].mxu0 }
 0x127   : > { %v1482_v52 = vadd.f32 %v1481_v41, %v1480_v42  ;;  %v1295_v53 = vadd.f32 %v1294_v37, %v1293_v45  ;;  %v1065_v15 = vadd.f32 %v2095_v40, %v2308_v17  ;;  %v1383_v20 = vadd.f32 %v1382_v51, %v1381_v39  ;;  %v2427_v63 = vpop.f32.mrb[30].mxu0 }
 0x128   : > { %v1483_v55 = vsel %vm1095_vm3, %v1429_v27, 0.0  ;;  %v1298_v34 = vsel %vm1095_vm3, %v1249_v33, 0.0  ;;  %1115 = vst.msk [vmem:[%s2143_s23 + $0x98] sm:$0xff] %vm1095_vm3, %v711_v49  ;;  %1113 = vst.msk [vmem:[%s2143_s23 + $0x88] sm:$0xff] %vm1095_vm3, %v703_v43  ;;  %v1195_v56 = vsel %vm1095_vm3, %v703_v43, 0.0  ;;  %v1248_v61 = vmul.f32 %v703_v43, %v703_v43  ;;  %v2430_v8 = vpop.f32.mrb[31].mxu0 }
 0x129   : > { %1154 = vst.msk [vmem:[%s2102_s18 + $0xd0] sm:$0xff] %vm1095_vm3, %v1073_v50  ;;  %v1199_v17 = vsel %vm1095_vm3, %v711_v49, 0.0  ;;  %v1250_v57 = vmul.f32 %v711_v49, %v711_v49  ;;  %v1196_v59 = vadd.f32 %v1195_v56, %v1194_v35  ;;  %1152 = vst.msk [vmem:[%s2102_s18 + $0xc0] sm:$0xff] %vm1095_vm3, %v1065_v15  ;;  %v1384_v60 = vsel %vm1095_vm3, %v1065_v15, 0.0 }
 0x12a   : > { %v1296_v0 = vsel %vm1095_vm3, %v1248_v61, 0.0  ;;  %v1432_v2 = vmul.f32 %v1073_v50, %v1073_v50  ;;  %v1385_v6 = vadd.f32 %v1384_v60, %v1383_v20  ;;  %v1430_v7 = vmul.f32 %v1065_v15, %v1065_v15 }
 0x12b   : > { %v1198_v13 = vadd.f32 %v1197_v44, %v1196_v59  ;;  %v1297_v14 = vadd.f32 %v1296_v0, %v1295_v53  ;;  %v1388_v16 = vsel %vm1095_vm3, %v1073_v50, 0.0  ;;  %v1484_v18 = vadd.f32 %v1483_v55, %v1482_v52 }
 0x12c   : > { %v1485_v3 = vsel %vm1095_vm3, %v1430_v7, 0.0  ;;  %v1076_v4 = vadd.f32 %v2319_v19, %v2095_v40  ;;  %v1068_v10 = vadd.f32 %v2095_v40, %v2325_v24  ;;  %v724_v21 = vadd.f32 %v2327_v25, %v2129_v5 }
 0x12d   : > { %v1299_v23 = vadd.f32 %v1298_v34, %v1297_v14  ;;  %v1486_v41 = vadd.f32 %v1485_v3, %v1484_v18  ;;  %v716_v47 = vadd.f32 %v2129_v5, %v2330_v31  ;;  %v1200_v48 = vadd.f32 %v1199_v17, %v1198_v13 }
 0x12e   : > { %v1300_v51 = vsel %vm1095_vm3, %v1250_v57, 0.0  ;;  %v1489_v27 = vsel %vm1095_vm3, %v1432_v2, 0.0  ;;  %1155 = vst.msk [vmem:[%s2102_s18 + $0xd8] sm:$0xff] %vm1095_vm3, %v1076_v4  ;;  %1153 = vst.msk [vmem:[%s2102_s18 + $0xc8] sm:$0xff] %vm1095_vm3, %v1068_v10  ;;  %v1386_v19 = vsel %vm1095_vm3, %v1068_v10, 0.0  ;;  %v1431_v24 = vmul.f32 %v1068_v10, %v1068_v10 }
 0x12f   : > { %1118 = vst.msk [vmem:[%s2143_s23 + $0xb0] sm:$0xff] %vm1095_vm3, %v724_v21  ;;  %v1390_v25 = vsel %vm1095_vm3, %v1076_v4, 0.0  ;;  %v1433_v28 = vmul.f32 %v1076_v4, %v1076_v4  ;;  %v1387_v30 = vadd.f32 %v1386_v19, %v1385_v6  ;;  %1116 = vst.msk [vmem:[%s2143_s23 + $0xa0] sm:$0xff] %vm1095_vm3, %v716_v47  ;;  %v1201_v31 = vsel %vm1095_vm3, %v716_v47, 0.0 }
 0x130   : > { %v1487_v32 = vsel %vm1095_vm3, %v1431_v24, 0.0  ;;  %v1253_v33 = vmul.f32 %v724_v21, %v724_v21  ;;  %v1202_v35 = vadd.f32 %v1201_v31, %v1200_v48  ;;  %v1251_v36 = vmul.f32 %v716_v47, %v716_v47 }
 0x131   : > { %v1389_v39 = vadd.f32 %v1388_v16, %v1387_v30  ;;  %v1488_v42 = vadd.f32 %v1487_v32, %v1486_v41  ;;  %v1205_v44 = vsel %vm1095_vm3, %v724_v21, 0.0  ;;  %v1301_v45 = vadd.f32 %v1300_v51, %v1299_v23 }
 0x132   : > { %v1302_v37 = vsel %vm1095_vm3, %v1251_v36, 0.0  ;;  %v727_v49 = vadd.f32 %v2333_v38, %v2129_v5  ;;  %v719_v43 = vadd.f32 %v2129_v5, %v2342_v46  ;;  %v1089_v50 = vadd.f32 %v2355_v29, %v2095_v40 }
 0x133   : > { %v1490_v52 = vadd.f32 %v1489_v27, %v1488_v42  ;;  %v1303_v53 = vadd.f32 %v1302_v37, %v1301_v45  ;;  %v1081_v15 = vadd.f32 %v2095_v40, %v2361_v58  ;;  %v1391_v20 = vadd.f32 %v1390_v25, %v1389_v39 }
 0x134   : > { %v1491_v55 = vsel %vm1095_vm3, %v1433_v28, 0.0  ;;  %v1306_v34 = vsel %vm1095_vm3, %v1253_v33, 0.0  ;;  %1119 = vst.msk [vmem:[%s2143_s23 + $0xb8] sm:$0xff] %vm1095_vm3, %v727_v49  ;;  %1117 = vst.msk [vmem:[%s2143_s23 + $0xa8] sm:$0xff] %vm1095_vm3, %v719_v43  ;;  %v1203_v38 = vsel %vm1095_vm3, %v719_v43, 0.0  ;;  %v1252_v46 = vmul.f32 %v719_v43, %v719_v43 }
 0x135   : > { %1158 = vst.msk [vmem:[%s2102_s18 + $0xf0] sm:$0xff] %vm1095_vm3, %v1089_v50  ;;  %v1207_v29 = vsel %vm1095_vm3, %v727_v49, 0.0  ;;  %v1254_v56 = vmul.f32 %v727_v49, %v727_v49  ;;  %v1204_v61 = vadd.f32 %v1203_v38, %v1202_v35  ;;  %1156 = vst.msk [vmem:[%s2102_s18 + $0xe0] sm:$0xff] %vm1095_vm3, %v1081_v15  ;;  %v1392_v58 = vsel %vm1095_vm3, %v1081_v15, 0.0 }
 0x136   : > { %v1304_v17 = vsel %vm1095_vm3, %v1252_v46, 0.0  ;;  %v1396_v57 = vsel %vm1095_vm3, %v1089_v50, 0.0  ;;  %v1393_v59 = vadd.f32 %v1392_v58, %v1391_v20  ;;  %v1434_v60 = vmul.f32 %v1081_v15, %v1081_v15 }
 0x137   : > { %v1206_v0 = vadd.f32 %v1205_v44, %v1204_v61  ;;  %v1305_v2 = vadd.f32 %v1304_v17, %v1303_v53  ;;  %v1436_v6 = vmul.f32 %v1089_v50, %v1089_v50  ;;  %v1492_v7 = vadd.f32 %v1491_v55, %v1490_v52 }
 0x138   : > { %v1493_v13 = vsel %vm1095_vm3, %v1434_v60, 0.0  ;;  %v1092_v14 = vadd.f32 %v2364_v1, %v2095_v40  ;;  %v1084_v16 = vadd.f32 %v2095_v40, %v2367_v9  ;;  %v740_v18 = vadd.f32 %v2369_v12, %v2129_v5 }
 0x139   : > { %v1307_v3 = vadd.f32 %v1306_v34, %v1305_v2  ;;  %v1494_v4 = vadd.f32 %v1493_v13, %v1492_v7  ;;  %v732_v10 = vadd.f32 %v2129_v5, %v2378_v62  ;;  %v1208_v21 = vadd.f32 %v1207_v29, %v1206_v0 }
 0x13a   : > { %v1308_v23 = vsel %vm1095_vm3, %v1254_v56, 0.0  ;;  %1159 = vst.msk [vmem:[%s2102_s18 + $0xf8] sm:$0xff] %vm1095_vm3, %v1092_v14  ;;  %v1437_v41 = vmul.f32 %v1092_v14, %v1092_v14  ;;  %1157 = vst.msk [vmem:[%s2102_s18 + $0xe8] sm:$0xff] %vm1095_vm3, %v1084_v16  ;;  %v1394_v1 = vsel %vm1095_vm3, %v1084_v16, 0.0  ;;  %v1435_v40 = vmul.f32 %v1084_v16, %v1084_v16 }
 0x13b   : > { %1122 = vst.msk [vmem:[%s2143_s23 + $0xd0] sm:$0xff] %vm1095_vm3, %v740_v18  ;;  %v1497_v9 = vsel %vm1095_vm3, %v1436_v6, 0.0  ;;  %v1398_v12 = vsel %vm1095_vm3, %v1092_v14, 0.0  ;;  %v1395_v47 = vadd.f32 %v1394_v1, %v1393_v59  ;;  %1120 = vst.msk [vmem:[%s2143_s23 + $0xc0] sm:$0xff] %vm1095_vm3, %v732_v10  ;;  %v1209_v62 = vsel %vm1095_vm3, %v732_v10, 0.0 }
 0x13c   : > { %v1495_v48 = vsel %vm1095_vm3, %v1435_v40, 0.0  ;;  %v1257_v51 = vmul.f32 %v740_v18, %v740_v18  ;;  %v1210_v27 = vadd.f32 %v1209_v62, %v1208_v21  ;;  %v1255_v19 = vmul.f32 %v732_v10, %v732_v10 }
 0x13d   : > { %v1499_v24 = vsel %vm1095_vm3, %v1437_v41, 0.0  ;;  %v1397_v25 = vadd.f32 %v1396_v57, %v1395_v47  ;;  %v1496_v28 = vadd.f32 %v1495_v48, %v1494_v4  ;;  %v1309_v30 = vadd.f32 %v1308_v23, %v1307_v3 }
 0x13e   : > { %v1310_v31 = vsel %vm1095_vm3, %v1255_v19, 0.0  ;;  %v743_v32 = vadd.f32 %v2382_v22, %v2129_v5  ;;  %v735_v33 = vadd.f32 %v2129_v5, %v2393_v26  ;;  %v756_v35 = vadd.f32 %v2410_v54, %v2129_v5 }
 0x13f   : > { %v1399_v36 = vadd.f32 %v1398_v12, %v1397_v25  ;;  %v1498_v39 = vadd.f32 %v1497_v9, %v1496_v28  ;;  %v1311_v42 = vadd.f32 %v1310_v31, %v1309_v30  ;;  %v748_v44 = vadd.f32 %v2129_v5, %v2421_v11 }
 0x140   : > { %v1160_v45 = vlaneseq  ;;  %1123 = vst.msk [vmem:[%s2143_s23 + $0xd8] sm:$0xff] %vm1095_vm3, %v743_v32  ;;  %1121 = vst.msk [vmem:[%s2143_s23 + $0xc8] sm:$0xff] %vm1095_vm3, %v735_v33  ;;  %v1211_v22 = vsel %vm1095_vm3, %v735_v33, 0.0  ;;  %v1256_v37 = vmul.f32 %v735_v33, %v735_v33  ;;  %v1213_v54 = vsel %vm1095_vm3, %v740_v18, 0.0 }
 0x141   : > { %1126 = vst.msk [vmem:[%s2143_s23 + $0xf0] sm:$0xff] %vm1095_vm3, %v756_v35  ;;  %v1400_v26 = vrot.slane %v1399_v36, 4  ;;  %v1500_v49 = vadd.f32 %v1499_v24, %v1498_v39  ;;  %v1212_v43 = vadd.f32 %v1211_v22, %v1210_v27  ;;  %1124 = vst.msk [vmem:[%s2143_s23 + $0xe0] sm:$0xff] %vm1095_vm3, %v748_v44  ;;  %v1314_v11 = vsel %vm1095_vm3, %v1257_v51, 0.0 }
 0x142   : > { %v1215_v50 = vsel %vm1095_vm3, %v743_v32, 0.0  ;;  %v1258_v52 = vmul.f32 %v743_v32, %v743_v32  ;;  %v1312_v53 = vsel %vm1095_vm3, %v1256_v37, 0.0  ;;  %v1217_v38 = vsel %vm1095_vm3, %v748_v44, 0.0 }
 0x143   : > { %v1401_v15 = vadd.f32 %v1400_v26, %v1399_v36  ;;  %v1501_v20 = vrot.slane %v1500_v49, 4  ;;  %v1214_v55 = vadd.f32 %v1213_v54, %v1212_v43  ;;  %v1313_v34 = vadd.f32 %v1312_v53, %v1311_v42 }
 0x144   : > { %v1259_v46 = vmul.f32 %v748_v44, %v748_v44  ;;  %v759_v29 = vadd.f32 %v2427_v63, %v2129_v5  ;;  %v751_v56 = vadd.f32 %v2129_v5, %v2430_v8  ;;  %v1316_v59 = vsel %vm1095_vm3, %v1258_v52, 0.0 }
 0x145   : > { %v1402_v61 = vrot.slane %v1401_v15, 2  ;;  %v1502_v58 = vadd.f32 %v1501_v20, %v1500_v49  ;;  %v1315_v17 = vadd.f32 %v1314_v11, %v1313_v34  ;;  %v1216_v57 = vadd.f32 %v1215_v50, %v1214_v55 }
 0x146   : > { %v1318_v60 = vsel %vm1095_vm3, %v1259_v46, 0.0  ;;  %1127 = vst.msk [vmem:[%s2143_s23 + $0xf8] sm:$0xff] %vm1095_vm3, %v759_v29  ;;  %1125 = vst.msk [vmem:[%s2143_s23 + $0xe8] sm:$0xff] %vm1095_vm3, %v751_v56  ;;  %v1219_v0 = vsel %vm1095_vm3, %v751_v56, 0.0  ;;  %v1161_v6 = vshrl.u32 %v1160_v45, 7  ;;  %v1261_v7 = vmul.f32 %v756_v35, %v756_v35 }
 0x147   : > { %v1403_v63 = vadd.f32 %v1402_v61, %v1401_v15  ;;  %v1503_v5 = vrot.slane %v1502_v58, 2  ;;  %v1218_v8 = vadd.f32 %v1217_v38, %v1216_v57  ;;  %v1317_v2 = vadd.f32 %v1316_v59, %v1315_v17 }
 0x148   : > { %v1260_v13 = vmul.f32 %v751_v56, %v751_v56  ;;  %v1221_v4 = vsel %vm1095_vm3, %v756_v35, 0.0  ;;  %v1262_v10 = vmul.f32 %v759_v29, %v759_v29  ;;  %vm1333_vm4 = vcmp.eq.s32.totalorder %v1161_v6, 1 }
 0x149   : > { %v1504_v14 = vadd.f32 %v1503_v5, %v1502_v58  ;;  %v1319_v16 = vadd.f32 %v1318_v60, %v1317_v2  ;;  %v1220_v18 = vadd.f32 %v1219_v0, %v1218_v8  ;;  %v1404_v3 = vrot.slane %v1403_v63, 1 }
 0x14a   : > { %v1320_v21 = vsel %vm1095_vm3, %v1260_v13, 0.0  ;;  %v1322_v40 = vsel %vm1095_vm3, %v1261_v7, 0.0  ;;  %v1223_v9 = vsel %vm1095_vm3, %v759_v29, 0.0  ;;  %vm1332_vm5 = vcmp.eq.s32.totalorder %v1161_v6, 0 }
 0x14b   : > { %v1505_v23 = vrot.slane %v1504_v14, 1  ;;  %v1222_v41 = vadd.f32 %v1221_v4, %v1220_v18  ;;  %v1321_v1 = vadd.f32 %v1320_v21, %v1319_v16  ;;  %v1405_v48 = vadd.f32 %v1404_v3, %v1403_v63 }
 0x14c   : > { %v1324_v51 = vsel %vm1095_vm3, %v1262_v10, 0.0 }
 0x14d   : > { %v1506_v12 = vadd.f32 %v1505_v23, %v1504_v14  ;;  %v1224_v47 = vadd.f32 %v1223_v9, %v1222_v41  ;;  %v1323_v62 = vadd.f32 %v1322_v40, %v1321_v1 }
 0x14f   : > { %v1507_v27 = vsel %vm1333_vm4, %v1506_v12, 0.0  ;;  %v1225_v19 = vrot.slane %v1224_v47, 4  ;;  %v1325_v24 = vadd.f32 %v1324_v51, %v1323_v62 }
 0x150   : > { %v1508_v25 = vsel %vm1332_vm5, %v1405_v48, %v1507_v27 }
 0x151   : > { %1509 = vst.msk [vmem:[%s391_s26] sm:$0xff] %vm1095_vm3, %v1508_v25  ;;  %v1226_v28 = vadd.f32 %v1225_v19, %v1224_v47  ;;  %v1326_v30 = vrot.slane %v1325_v24, 4 }
 0x153   : > { %v1227_v31 = vrot.slane %v1226_v28, 2  ;;  %v1327_v32 = vadd.f32 %v1326_v30, %v1325_v24 }
 0x155   : > { %v1228_v33 = vadd.f32 %v1227_v31, %v1226_v28  ;;  %v1328_v35 = vrot.slane %v1327_v32, 2 }
 0x157   : > { %v1329_v36 = vadd.f32 %v1328_v35, %v1327_v32  ;;  %v1229_v39 = vrot.slane %v1228_v33, 1 }
 0x159   : > { %v1330_v42 = vrot.slane %v1329_v36, 1  ;;  %v1230_v45 = vadd.f32 %v1229_v39, %v1228_v33 }
 0x15b   : > { %v1331_v44 = vadd.f32 %v1330_v42, %v1329_v36 }
 0x15d   : > { %v1334_v22 = vsel %vm1333_vm4, %v1331_v44, 0.0 }
 0x15e   : > { %v1335_v37 = vsel %vm1332_vm5, %v1230_v45, %v1334_v22 }
 0x15f   : > { %1336 = vst.msk [vmem:[%s387_s29] sm:$0xff] %vm1095_vm3, %v1335_v37 }
 0x160 PF: > { %s20_s30 = sadd.s32 1, %s1929_s30  }
 0x161   : > { %p17_p5 = scmp.ge.s32.totalorder %s20_s30, 4  }
 0x163   :  { %19 = sbr.rel (!%p17_p5) target bundleno = 1 (0x1), region = 113 }

// kernel: conv_block_forward.7
= control target key start
LH: loop header
LB: loop body
LE: loop exit
PB: predicated region body
PF: predicated region fallthrough
CT: control target
= control target key end

     0   :  { %s762_s21 = smov 0   ;;  %s1069_s0 = inlined_call_operand.vmem [shape: f32[512,16], index: 0, kind: input, shape index: {}]   ;;  %s1070_s1 = inlined_call_operand.vmem [shape: f32[512,16], index: 1, kind: input, shape index: {}]   ;;  %s1071_s2 = inlined_call_operand.vmem [shape: f32[1,16], index: 2, kind: input, shape index: {}]   ;;  %s1072_s3 = inlined_call_operand.vmem [shape: f32[1,16], index: 3, kind: input, shape index: {}]   ;;  %s1073_s4 = inlined_call_operand.vmem [shape: f32[1,16], index: 4, kind: input, shape index: {}]   ;;  %s1074_s5 = inlined_call_operand.vmem [shape: f32[1,16], index: 5, kind: input, shape index: {}]   ;;  %s1075_s6 = inlined_call_operand.vmem [shape: f32[512,16], index: 6, kind: output, shape index: {}]  }
   0x1 LB: > { %s694_s22 = sadd.s32 4294967295, %s725_s21   ;;  %p698_p0 = scmp.ge.s32.totalorder %s725_s21, 1  ;;  %s725_s21 = sphi %s762_s21, %s16_s21  }
   0x2   : > { %p224_p1 = scmp.lt.s32.totalorder %s725_s21, 3 }
   0x4   : > { %p225_p2 = pnand %p698_p0, %p224_p1 }
   0x5   : > { %s699_s23 = sshll.u32 (!%p225_p2), %s694_s22, 5  ;;  %v775_v0 = vld [vmem:[%s1071_s2] ss:$0 sm:$0xff] (!%p225_p2)  ;;  %vm593_vm0 = vcmask (!%p225_p2), 130048  }
   0x6   : > { %228 = sbr.rel (%p225_p2) target bundleno = 80 (0x50), region = 44  ;;  %p260_p3 = scmp.lt.s32.totalorder (!%p225_p2), %s699_s23, 63  ;;  %v780_v1 = vld [vmem:[%s1073_s4] ss:$0 sm:$0xff] (!%p225_p2) }
   0x7   : > { %v797_v2 = vld [vmem:[%s1072_s3] ss:$0 sm:$0xff] (!%p225_p2) }
   0x8   : > { %v802_v3 = vld [vmem:[%s1074_s5] ss:$0 sm:$0xff] (!%p225_p2) }
   0xd   : > { %s1077_s23 = smov (!%p260_p3, %s699_s23), 63 }
   0xe   : > { %s770_s24 = sshll.u32 %s1077_s23, 3 }
   0xf   : > { %s786_s7 = scalar_lea.vmem %s1069_s0, %s770_s24  ;;  %s792_s10 = scalar_lea.vmem %s1070_s1, %s770_s24 }
  0x10   : > { %v277_v4 = vld [vmem:[%s786_s7] sm:$0xff]  ;;  %v278_v6 = vld [vmem:[%s786_s7 + $0x8] sm:$0xff]  ;;  %v279_v11 = vld [vmem:[%s786_s7 + $0x10] sm:$0xff]  ;;  %s841_s17 = scalar_lea.vmem %s1075_s6, %s770_s24 }
  0x11   : > { %v419_v5 = vld [vmem:[%s792_s10] sm:$0xff]  ;;  %v316_v7 = vmul.f32 %v775_v0, %v277_v4  ;;  %v317_v9 = vmul.f32 %v775_v0, %v278_v6  ;;  %v420_v10 = vld [vmem:[%s792_s10 + $0x8] sm:$0xff]  ;;  %v421_v12 = vld [vmem:[%s792_s10 + $0x10] sm:$0xff]  ;;  %v318_v14 = vmul.f32 %v775_v0, %v279_v11 }
  0x12   : > { %v458_v8 = vmul.f32 %v780_v1, %v419_v5  ;;  %v459_v13 = vmul.f32 %v780_v1, %v420_v10  ;;  %v460_v15 = vmul.f32 %v780_v1, %v421_v12  ;;  %v280_v16 = vld [vmem:[%s786_s7 + $0x18] sm:$0xff]  ;;  %v281_v18 = vld [vmem:[%s786_s7 + $0x20] sm:$0xff]  ;;  %v282_v24 = vld [vmem:[%s786_s7 + $0x28] sm:$0xff] }
  0x13   : > { %v422_v17 = vld [vmem:[%s792_s10 + $0x18] sm:$0xff]  ;;  %v355_v19 = vadd.f32 %v797_v2, %v316_v7  ;;  %v356_v21 = vadd.f32 %v797_v2, %v317_v9  ;;  %v319_v22 = vmul.f32 %v775_v0, %v280_v16  ;;  %v423_v23 = vld [vmem:[%s792_s10 + $0x20] sm:$0xff]  ;;  %v357_v26 = vadd.f32 %v797_v2, %v318_v14  ;;  %v424_v33 = vld [vmem:[%s792_s10 + $0x28] sm:$0xff] }
  0x14   : > { %v497_v20 = vadd.f32 %v802_v3, %v458_v8  ;;  %v498_v25 = vadd.f32 %v802_v3, %v459_v13  ;;  %v499_v27 = vadd.f32 %v802_v3, %v460_v15  ;;  %v461_v28 = vmul.f32 %v780_v1, %v422_v17  ;;  %v283_v42 = vld [vmem:[%s786_s7 + $0x30] sm:$0xff]  ;;  %v284_v48 = vld [vmem:[%s786_s7 + $0x38] sm:$0xff]  ;;  %v285_v54 = vld [vmem:[%s786_s7 + $0x40] sm:$0xff] }
  0x15   : > { %v387_v29 = vmax.f32 %v355_v19, 0.0  ;;  %v388_v30 = vmax.f32 %v356_v21, 0.0  ;;  %v358_v31 = vadd.f32 %v797_v2, %v319_v22  ;;  %v320_v32 = vmul.f32 %v775_v0, %v281_v18  ;;  %v425_v47 = vld [vmem:[%s792_s10 + $0x30] sm:$0xff]  ;;  %v426_v53 = vld [vmem:[%s792_s10 + $0x38] sm:$0xff]  ;;  %v427_v59 = vld [vmem:[%s792_s10 + $0x40] sm:$0xff] }
  0x16   : > { %v389_v34 = vmax.f32 %v357_v26, 0.0  ;;  %v500_v35 = vadd.f32 %v802_v3, %v461_v28  ;;  %v462_v36 = vmul.f32 %v780_v1, %v423_v23  ;;  %v321_v37 = vmul.f32 %v775_v0, %v282_v24  ;;  %v286_v8 = vld [vmem:[%s786_s7 + $0x48] sm:$0xff]  ;;  %v287_v14 = vld [vmem:[%s786_s7 + $0x50] sm:$0xff] }
  0x17   : > { %v529_v38 = vadd.f32 %v497_v20, %v387_v29  ;;  %v530_v39 = vadd.f32 %v498_v25, %v388_v30  ;;  %v390_v40 = vmax.f32 %v358_v31, 0.0  ;;  %v359_v41 = vadd.f32 %v797_v2, %v320_v32  ;;  %v428_v9 = vld [vmem:[%s792_s10 + $0x48] sm:$0xff]  ;;  %v429_v15 = vld [vmem:[%s792_s10 + $0x50] sm:$0xff]  ;;  %v288_v20 = vld [vmem:[%s786_s7 + $0x58] sm:$0xff] }
  0x18   : > { %v531_v43 = vadd.f32 %v499_v27, %v389_v34  ;;  %v501_v44 = vadd.f32 %v802_v3, %v462_v36  ;;  %v360_v45 = vadd.f32 %v797_v2, %v321_v37  ;;  %v463_v46 = vmul.f32 %v780_v1, %v424_v33  ;;  %v430_v29 = vld [vmem:[%s792_s10 + $0x58] sm:$0xff]  ;;  %v289_v34 = vld [vmem:[%s786_s7 + $0x60] sm:$0xff] }
  0x19   : > { %v561_v49 = vmax.f32 %v529_v38, 0.0  ;;  %v562_v50 = vmax.f32 %v530_v39, 0.0  ;;  %v532_v51 = vadd.f32 %v500_v35, %v390_v40  ;;  %v391_v52 = vmax.f32 %v359_v41, 0.0  ;;  %v431_v35 = vld [vmem:[%s792_s10 + $0x60] sm:$0xff]  ;;  %v290_v40 = vld [vmem:[%s786_s7 + $0x68] sm:$0xff] }
  0x1a   : > { %v563_v55 = vmax.f32 %v531_v43, 0.0  ;;  %v392_v56 = vmax.f32 %v360_v45, 0.0  ;;  %v502_v57 = vadd.f32 %v802_v3, %v463_v46  ;;  %v322_v58 = vmul.f32 %v775_v0, %v283_v42  ;;  %v432_v45 = vld [vmem:[%s792_s10 + $0x68] sm:$0xff] }
  0x1b   : > { %594 = vst.msk [vmem:[%s841_s17] sm:$0xff] %vm593_vm0, %v561_v49  ;;  %595 = vst.msk [vmem:[%s841_s17 + $0x8] sm:$0xff] %vm593_vm0, %v562_v50  ;;  %v564_v60 = vmax.f32 %v532_v51, 0.0  ;;  %v533_v61 = vadd.f32 %v501_v44, %v391_v52  ;;  %v464_v62 = vmul.f32 %v780_v1, %v425_v47  ;;  %v323_v63 = vmul.f32 %v775_v0, %v284_v48  ;;  %v291_v50 = vld [vmem:[%s786_s7 + $0x70] sm:$0xff] }
  0x1c   : > { %596 = vst.msk [vmem:[%s841_s17 + $0x10] sm:$0xff] %vm593_vm0, %v563_v55  ;;  %v534_v4 = vadd.f32 %v502_v57, %v392_v56  ;;  %v361_v5 = vadd.f32 %v797_v2, %v322_v58  ;;  %v465_v6 = vmul.f32 %v780_v1, %v426_v53  ;;  %v324_v7 = vmul.f32 %v775_v0, %v285_v54  ;;  %v433_v55 = vld [vmem:[%s792_s10 + $0x70] sm:$0xff] }
  0x1d   : > { %597 = vst.msk [vmem:[%s841_s17 + $0x18] sm:$0xff] %vm593_vm0, %v564_v60  ;;  %v565_v10 = vmax.f32 %v533_v61, 0.0  ;;  %v503_v11 = vadd.f32 %v802_v3, %v464_v62  ;;  %v362_v12 = vadd.f32 %v797_v2, %v323_v63  ;;  %v466_v13 = vmul.f32 %v780_v1, %v427_v59  ;;  %v292_v60 = vld [vmem:[%s786_s7 + $0x78] sm:$0xff] }
  0x1e   : > { %v566_v16 = vmax.f32 %v534_v4, 0.0  ;;  %v393_v17 = vmax.f32 %v361_v5, 0.0  ;;  %v504_v18 = vadd.f32 %v802_v3, %v465_v6  ;;  %v363_v19 = vadd.f32 %v797_v2, %v324_v7  ;;  %v434_v5 = vld [vmem:[%s792_s10 + $0x78] sm:$0xff]  ;;  %v293_v6 = vld [vmem:[%s786_s7 + $0x80] sm:$0xff] }
  0x1f   : > { %598 = vst.msk [vmem:[%s841_s17 + $0x20] sm:$0xff] %vm593_vm0, %v565_v10  ;;  %v394_v21 = vmax.f32 %v362_v12, 0.0  ;;  %v505_v22 = vadd.f32 %v802_v3, %v466_v13  ;;  %v325_v23 = vmul.f32 %v775_v0, %v286_v8  ;;  %v467_v24 = vmul.f32 %v780_v1, %v428_v9 }
  0x20   : > { %599 = vst.msk [vmem:[%s841_s17 + $0x28] sm:$0xff] %vm593_vm0, %v566_v16  ;;  %v535_v25 = vadd.f32 %v503_v11, %v393_v17  ;;  %v395_v26 = vmax.f32 %v363_v19, 0.0  ;;  %v326_v27 = vmul.f32 %v775_v0, %v287_v14  ;;  %v468_v28 = vmul.f32 %v780_v1, %v429_v15  ;;  %v435_v11 = vld [vmem:[%s792_s10 + $0x80] sm:$0xff]  ;;  %v294_v16 = vld [vmem:[%s786_s7 + $0x88] sm:$0xff] }
  0x21   : > { %v536_v30 = vadd.f32 %v504_v18, %v394_v21  ;;  %v364_v31 = vadd.f32 %v797_v2, %v325_v23  ;;  %v506_v32 = vadd.f32 %v802_v3, %v467_v24  ;;  %v327_v33 = vmul.f32 %v775_v0, %v288_v20 }
  0x22   : > { %v567_v36 = vmax.f32 %v535_v25, 0.0  ;;  %v537_v37 = vadd.f32 %v505_v22, %v395_v26  ;;  %v365_v38 = vadd.f32 %v797_v2, %v326_v27  ;;  %v507_v39 = vadd.f32 %v802_v3, %v468_v28  ;;  %v436_v25 = vld [vmem:[%s792_s10 + $0x88] sm:$0xff]  ;;  %v295_v26 = vld [vmem:[%s786_s7 + $0x90] sm:$0xff] }
  0x23   : > { %v568_v41 = vmax.f32 %v536_v30, 0.0  ;;  %v396_v42 = vmax.f32 %v364_v31, 0.0  ;;  %v366_v43 = vadd.f32 %v797_v2, %v327_v33  ;;  %v469_v44 = vmul.f32 %v780_v1, %v430_v29  ;;  %v437_v31 = vld [vmem:[%s792_s10 + $0x90] sm:$0xff] }
  0x24   : > { %600 = vst.msk [vmem:[%s841_s17 + $0x30] sm:$0xff] %vm593_vm0, %v567_v36  ;;  %v569_v46 = vmax.f32 %v537_v37, 0.0  ;;  %v397_v47 = vmax.f32 %v365_v38, 0.0  ;;  %v328_v48 = vmul.f32 %v775_v0, %v289_v34  ;;  %v470_v49 = vmul.f32 %v780_v1, %v431_v35 }
  0x25   : > { %601 = vst.msk [vmem:[%s841_s17 + $0x38] sm:$0xff] %vm593_vm0, %v568_v41  ;;  %v538_v51 = vadd.f32 %v506_v32, %v396_v42  ;;  %v398_v52 = vmax.f32 %v366_v43, 0.0  ;;  %v508_v53 = vadd.f32 %v802_v3, %v469_v44  ;;  %v329_v54 = vmul.f32 %v775_v0, %v290_v40  ;;  %v296_v32 = vld [vmem:[%s786_s7 + $0x98] sm:$0xff] }
  0x26   : > { %602 = vst.msk [vmem:[%s841_s17 + $0x40] sm:$0xff] %vm593_vm0, %v569_v46  ;;  %v539_v56 = vadd.f32 %v507_v39, %v397_v47  ;;  %v367_v57 = vadd.f32 %v797_v2, %v328_v48  ;;  %v509_v58 = vadd.f32 %v802_v3, %v470_v49  ;;  %v471_v59 = vmul.f32 %v780_v1, %v432_v45  ;;  %v438_v41 = vld [vmem:[%s792_s10 + $0x98] sm:$0xff]  ;;  %v297_v46 = vld [vmem:[%s786_s7 + $0xa0] sm:$0xff] }
  0x27   : > { %v570_v61 = vmax.f32 %v538_v51, 0.0  ;;  %v540_v62 = vadd.f32 %v508_v53, %v398_v52  ;;  %v368_v63 = vadd.f32 %v797_v2, %v329_v54  ;;  %v330_v4 = vmul.f32 %v775_v0, %v291_v50  ;;  %v439_v51 = vld [vmem:[%s792_s10 + $0xa0] sm:$0xff]  ;;  %v298_v52 = vld [vmem:[%s786_s7 + $0xa8] sm:$0xff] }
  0x28   : > { %v571_v7 = vmax.f32 %v539_v56, 0.0  ;;  %v399_v8 = vmax.f32 %v367_v57, 0.0  ;;  %v510_v9 = vadd.f32 %v802_v3, %v471_v59  ;;  %v472_v10 = vmul.f32 %v780_v1, %v433_v55  ;;  %v440_v57 = vld [vmem:[%s792_s10 + $0xa8] sm:$0xff] }
  0x29   : > { %603 = vst.msk [vmem:[%s841_s17 + $0x48] sm:$0xff] %vm593_vm0, %v570_v61  ;;  %v572_v12 = vmax.f32 %v540_v62, 0.0  ;;  %v400_v13 = vmax.f32 %v368_v63, 0.0  ;;  %v369_v14 = vadd.f32 %v797_v2, %v330_v4  ;;  %v331_v15 = vmul.f32 %v775_v0, %v292_v60  ;;  %v299_v62 = vld [vmem:[%s786_s7 + $0xb0] sm:$0xff] }
  0x2a   : > { %604 = vst.msk [vmem:[%s841_s17 + $0x50] sm:$0xff] %vm593_vm0, %v571_v7  ;;  %v541_v17 = vadd.f32 %v509_v58, %v399_v8  ;;  %v511_v18 = vadd.f32 %v802_v3, %v472_v10  ;;  %v473_v19 = vmul.f32 %v780_v1, %v434_v5  ;;  %v332_v20 = vmul.f32 %v775_v0, %v293_v6  ;;  %v441_v7 = vld [vmem:[%s792_s10 + $0xb0] sm:$0xff] }
  0x2b   : > { %605 = vst.msk [vmem:[%s841_s17 + $0x58] sm:$0xff] %vm593_vm0, %v572_v12  ;;  %v542_v21 = vadd.f32 %v510_v9, %v400_v13  ;;  %v401_v22 = vmax.f32 %v369_v14, 0.0  ;;  %v370_v23 = vadd.f32 %v797_v2, %v331_v15  ;;  %v474_v24 = vmul.f32 %v780_v1, %v435_v11  ;;  %v300_v12 = vld [vmem:[%s786_s7 + $0xb8] sm:$0xff] }
  0x2c   : > { %v573_v27 = vmax.f32 %v541_v17, 0.0  ;;  %v512_v28 = vadd.f32 %v802_v3, %v473_v19  ;;  %v371_v29 = vadd.f32 %v797_v2, %v332_v20  ;;  %v333_v30 = vmul.f32 %v775_v0, %v294_v16  ;;  %v442_v17 = vld [vmem:[%s792_s10 + $0xb8] sm:$0xff] }
  0x2d   : > { %v574_v33 = vmax.f32 %v542_v21, 0.0  ;;  %v543_v34 = vadd.f32 %v511_v18, %v401_v22  ;;  %v402_v35 = vmax.f32 %v370_v23, 0.0  ;;  %v513_v36 = vadd.f32 %v802_v3, %v474_v24  ;;  %v301_v18 = vld [vmem:[%s786_s7 + $0xc0] sm:$0xff] }
  0x2e   : > { %606 = vst.msk [vmem:[%s841_s17 + $0x60] sm:$0xff] %vm593_vm0, %v573_v27  ;;  %v403_v37 = vmax.f32 %v371_v29, 0.0  ;;  %v372_v38 = vadd.f32 %v797_v2, %v333_v30  ;;  %v475_v39 = vmul.f32 %v780_v1, %v436_v25  ;;  %v334_v40 = vmul.f32 %v775_v0, %v295_v26  ;;  %v443_v23 = vld [vmem:[%s792_s10 + $0xc0] sm:$0xff] }
  0x2f   : > { %607 = vst.msk [vmem:[%s841_s17 + $0x68] sm:$0xff] %vm593_vm0, %v574_v33  ;;  %v575_v42 = vmax.f32 %v543_v34, 0.0  ;;  %v544_v43 = vadd.f32 %v512_v28, %v402_v35  ;;  %v476_v44 = vmul.f32 %v780_v1, %v437_v31  ;;  %v335_v45 = vmul.f32 %v775_v0, %v296_v32  ;;  %v302_v28 = vld [vmem:[%s786_s7 + $0xc8] sm:$0xff] }
  0x30   : > { %v545_v47 = vadd.f32 %v513_v36, %v403_v37  ;;  %v404_v48 = vmax.f32 %v372_v38, 0.0  ;;  %v514_v49 = vadd.f32 %v802_v3, %v475_v39  ;;  %v373_v50 = vadd.f32 %v797_v2, %v334_v40  ;;  %v444_v37 = vld [vmem:[%s792_s10 + $0xc8] sm:$0xff]  ;;  %v303_v38 = vld [vmem:[%s786_s7 + $0xd0] sm:$0xff] }
  0x31   : > { %608 = vst.msk [vmem:[%s841_s17 + $0x70] sm:$0xff] %vm593_vm0, %v575_v42  ;;  %v576_v53 = vmax.f32 %v544_v43, 0.0  ;;  %v515_v54 = vadd.f32 %v802_v3, %v476_v44  ;;  %v374_v55 = vadd.f32 %v797_v2, %v335_v45  ;;  %v477_v56 = vmul.f32 %v780_v1, %v438_v41  ;;  %v445_v43 = vld [vmem:[%s792_s10 + $0xd0] sm:$0xff]  ;;  %v304_v44 = vld [vmem:[%s786_s7 + $0xd8] sm:$0xff] }
  0x32   : > { %v577_v58 = vmax.f32 %v545_v47, 0.0  ;;  %v546_v59 = vadd.f32 %v514_v49, %v404_v48  ;;  %v405_v60 = vmax.f32 %v373_v50, 0.0  ;;  %v336_v61 = vmul.f32 %v775_v0, %v297_v46 }
  0x33   : > { %609 = vst.msk [vmem:[%s841_s17 + $0x78] sm:$0xff] %vm593_vm0, %v576_v53  ;;  %v406_v63 = vmax.f32 %v374_v55, 0.0  ;;  %v516_v4 = vadd.f32 %v802_v3, %v477_v56  ;;  %v478_v5 = vmul.f32 %v780_v1, %v439_v51  ;;  %v337_v6 = vmul.f32 %v775_v0, %v298_v52  ;;  %v446_v53 = vld [vmem:[%s792_s10 + $0xd8] sm:$0xff] }
  0x34   : > { %610 = vst.msk [vmem:[%s841_s17 + $0x80] sm:$0xff] %vm593_vm0, %v577_v58  ;;  %v578_v8 = vmax.f32 %v546_v59, 0.0  ;;  %v547_v9 = vadd.f32 %v515_v54, %v405_v60  ;;  %v375_v10 = vadd.f32 %v797_v2, %v336_v61  ;;  %v479_v11 = vmul.f32 %v780_v1, %v440_v57  ;;  %v305_v58 = vld [vmem:[%s786_s7 + $0xe0] sm:$0xff] }
  0x35   : > { %v548_v13 = vadd.f32 %v516_v4, %v406_v63  ;;  %v517_v14 = vadd.f32 %v802_v3, %v478_v5  ;;  %v376_v15 = vadd.f32 %v797_v2, %v337_v6  ;;  %v338_v16 = vmul.f32 %v775_v0, %v299_v62  ;;  %v447_v63 = vld [vmem:[%s792_s10 + $0xe0] sm:$0xff]  ;;  %v306_v4 = vld [vmem:[%s786_s7 + $0xe8] sm:$0xff] }
  0x36   : > { %611 = vst.msk [vmem:[%s841_s17 + $0x88] sm:$0xff] %vm593_vm0, %v578_v8  ;;  %v579_v19 = vmax.f32 %v547_v9, 0.0  ;;  %v407_v20 = vmax.f32 %v375_v10, 0.0  ;;  %v518_v21 = vadd.f32 %v802_v3, %v479_v11  ;;  %v480_v22 = vmul.f32 %v780_v1, %v441_v7  ;;  %v448_v9 = vld [vmem:[%s792_s10 + $0xe8] sm:$0xff] }
  0x37   : > { %v580_v24 = vmax.f32 %v548_v13, 0.0  ;;  %v408_v25 = vmax.f32 %v376_v15, 0.0  ;;  %v377_v26 = vadd.f32 %v797_v2, %v338_v16  ;;  %v339_v27 = vmul.f32 %v775_v0, %v300_v12 }
  0x38   : > { %612 = vst.msk [vmem:[%s841_s17 + $0x90] sm:$0xff] %vm593_vm0, %v579_v19  ;;  %v549_v29 = vadd.f32 %v517_v14, %v407_v20  ;;  %v519_v30 = vadd.f32 %v802_v3, %v480_v22  ;;  %v481_v31 = vmul.f32 %v780_v1, %v442_v17  ;;  %v340_v32 = vmul.f32 %v775_v0, %v301_v18  ;;  %v307_v14 = vld [vmem:[%s786_s7 + $0xf0] sm:$0xff] }
  0x39   : > { %613 = vst.msk [vmem:[%s841_s17 + $0x98] sm:$0xff] %vm593_vm0, %v580_v24  ;;  %v550_v33 = vadd.f32 %v518_v21, %v408_v25  ;;  %v409_v34 = vmax.f32 %v377_v26, 0.0  ;;  %v378_v35 = vadd.f32 %v797_v2, %v339_v27  ;;  %v482_v36 = vmul.f32 %v780_v1, %v443_v23  ;;  %v449_v19 = vld [vmem:[%s792_s10 + $0xf0] sm:$0xff]  ;;  %v308_v24 = vld [vmem:[%s786_s7 + $0xf8] sm:$0xff] }
  0x3a   : > { %v581_v39 = vmax.f32 %v549_v29, 0.0  ;;  %v520_v40 = vadd.f32 %v802_v3, %v481_v31  ;;  %v379_v41 = vadd.f32 %v797_v2, %v340_v32  ;;  %v341_v42 = vmul.f32 %v775_v0, %v302_v28  ;;  %v450_v29 = vld [vmem:[%s792_s10 + $0xf8] sm:$0xff] }
  0x3b   : > { %v582_v45 = vmax.f32 %v550_v33, 0.0  ;;  %v551_v46 = vadd.f32 %v519_v30, %v409_v34  ;;  %v410_v47 = vmax.f32 %v378_v35, 0.0  ;;  %v521_v48 = vadd.f32 %v802_v3, %v482_v36 }
  0x3c   : > { %614 = vst.msk [vmem:[%s841_s17 + $0xa0] sm:$0xff] %vm593_vm0, %v581_v39  ;;  %v411_v49 = vmax.f32 %v379_v41, 0.0  ;;  %v380_v50 = vadd.f32 %v797_v2, %v341_v42  ;;  %v483_v51 = vmul.f32 %v780_v1, %v444_v37  ;;  %v342_v52 = vmul.f32 %v775_v0, %v303_v38 }
  0x3d   : > { %615 = vst.msk [vmem:[%s841_s17 + $0xa8] sm:$0xff] %vm593_vm0, %v582_v45  ;;  %v583_v54 = vmax.f32 %v551_v46, 0.0  ;;  %v552_v55 = vadd.f32 %v520_v40, %v410_v47  ;;  %v484_v56 = vmul.f32 %v780_v1, %v445_v43  ;;  %v343_v57 = vmul.f32 %v775_v0, %v304_v44 }
  0x3e   : > { %v553_v59 = vadd.f32 %v521_v48, %v411_v49  ;;  %v412_v60 = vmax.f32 %v380_v50, 0.0  ;;  %v522_v61 = vadd.f32 %v802_v3, %v483_v51  ;;  %v381_v62 = vadd.f32 %v797_v2, %v342_v52 }
  0x3f   : > { %616 = vst.msk [vmem:[%s841_s17 + $0xb0] sm:$0xff] %vm593_vm0, %v583_v54  ;;  %v584_v5 = vmax.f32 %v552_v55, 0.0  ;;  %v523_v6 = vadd.f32 %v802_v3, %v484_v56  ;;  %v382_v7 = vadd.f32 %v797_v2, %v343_v57  ;;  %v485_v8 = vmul.f32 %v780_v1, %v446_v53 }
  0x40   : > { %v585_v10 = vmax.f32 %v553_v59, 0.0  ;;  %v554_v11 = vadd.f32 %v522_v61, %v412_v60  ;;  %v413_v12 = vmax.f32 %v381_v62, 0.0  ;;  %v344_v13 = vmul.f32 %v775_v0, %v305_v58 }
  0x41   : > { %617 = vst.msk [vmem:[%s841_s17 + $0xb8] sm:$0xff] %vm593_vm0, %v584_v5  ;;  %v414_v15 = vmax.f32 %v382_v7, 0.0  ;;  %v524_v16 = vadd.f32 %v802_v3, %v485_v8  ;;  %v486_v17 = vmul.f32 %v780_v1, %v447_v63  ;;  %v345_v18 = vmul.f32 %v775_v0, %v306_v4 }
  0x42   : > { %618 = vst.msk [vmem:[%s841_s17 + $0xc0] sm:$0xff] %vm593_vm0, %v585_v10  ;;  %v586_v20 = vmax.f32 %v554_v11, 0.0  ;;  %v555_v21 = vadd.f32 %v523_v6, %v413_v12  ;;  %v383_v22 = vadd.f32 %v797_v2, %v344_v13  ;;  %v487_v23 = vmul.f32 %v780_v1, %v448_v9 }
  0x43   : > { %v556_v25 = vadd.f32 %v524_v16, %v414_v15  ;;  %v525_v26 = vadd.f32 %v802_v3, %v486_v17  ;;  %v384_v27 = vadd.f32 %v797_v2, %v345_v18  ;;  %v346_v28 = vmul.f32 %v775_v0, %v307_v14 }
  0x44   : > { %619 = vst.msk [vmem:[%s841_s17 + $0xc8] sm:$0xff] %vm593_vm0, %v586_v20  ;;  %v587_v30 = vmax.f32 %v555_v21, 0.0  ;;  %v415_v31 = vmax.f32 %v383_v22, 0.0  ;;  %v526_v32 = vadd.f32 %v802_v3, %v487_v23  ;;  %v488_v33 = vmul.f32 %v780_v1, %v449_v19 }
  0x45   : > { %v588_v34 = vmax.f32 %v556_v25, 0.0  ;;  %v416_v35 = vmax.f32 %v384_v27, 0.0  ;;  %v385_v36 = vadd.f32 %v797_v2, %v346_v28  ;;  %v347_v37 = vmul.f32 %v775_v0, %v308_v24 }
  0x46   : > { %620 = vst.msk [vmem:[%s841_s17 + $0xd0] sm:$0xff] %vm593_vm0, %v587_v30  ;;  %v557_v38 = vadd.f32 %v525_v26, %v415_v31  ;;  %v527_v39 = vadd.f32 %v802_v3, %v488_v33  ;;  %v489_v40 = vmul.f32 %v780_v1, %v450_v29 }
  0x47   : > { %621 = vst.msk [vmem:[%s841_s17 + $0xd8] sm:$0xff] %vm593_vm0, %v588_v34  ;;  %v558_v41 = vadd.f32 %v526_v32, %v416_v35  ;;  %v417_v42 = vmax.f32 %v385_v36, 0.0  ;;  %v386_v43 = vadd.f32 %v797_v2, %v347_v37 }
  0x48   : > { %v589_v44 = vmax.f32 %v557_v38, 0.0  ;;  %v528_v45 = vadd.f32 %v802_v3, %v489_v40 }
  0x49   : > { %v590_v46 = vmax.f32 %v558_v41, 0.0  ;;  %v559_v0 = vadd.f32 %v527_v39, %v417_v42  ;;  %v418_v47 = vmax.f32 %v386_v43, 0.0 }
  0x4a   : > { %622 = vst.msk [vmem:[%s841_s17 + $0xe0] sm:$0xff] %vm593_vm0, %v589_v44 }
  0x4b   : > { %623 = vst.msk [vmem:[%s841_s17 + $0xe8] sm:$0xff] %vm593_vm0, %v590_v46  ;;  %v591_v48 = vmax.f32 %v559_v0, 0.0  ;;  %v560_v49 = vadd.f32 %v528_v45, %v418_v47 }
  0x4d   : > { %624 = vst.msk [vmem:[%s841_s17 + $0xf0] sm:$0xff] %vm593_vm0, %v591_v48  ;;  %v592_v1 = vmax.f32 %v560_v49, 0.0 }
  0x4f   : > { %625 = vst.msk [vmem:[%s841_s17 + $0xf8] sm:$0xff] %vm593_vm0, %v592_v1 }
  0x50 PF: > { %s16_s21 = sadd.s32 1, %s725_s21  }
  0x51   : > { %p13_p4 = scmp.ge.s32.totalorder %s16_s21, 4  }
  0x53   :  { %15 = sbr.rel (!%p13_p4) target bundleno = 1 (0x1), region = 77 }

// kernel: conv_block_forward.6
= control target key start
LH: loop header
LB: loop body
LE: loop exit
PB: predicated region body
PF: predicated region fallthrough
CT: control target
= control target key end

     0   :  { %s1167_s15 = smov 0   ;;  %s1540_s0 = inlined_call_operand.vmem [shape: bf16[512,144], index: 0, kind: input, shape index: {}]   ;;  %s1541_s1 = inlined_call_operand.vmem [shape: bf16[144,16], index: 1, kind: input, shape index: {}]   ;;  %s1542_s2 = inlined_call_operand.vmem [shape: f32[1,16], index: 2, kind: input, shape index: {}]   ;;  %s1543_s3 = inlined_call_operand.vmem [shape: f32[512,16], index: 3, kind: output, shape index: {0}]   ;;  %s1544_s4 = inlined_call_operand.vmem [shape: f32[16,16], index: 4, kind: output, shape index: {1}]  }
   0x1 LB: > { %s1173_s16 = sadd.s32 4294967295, %s1139_s15   ;;  %p981_p0 = scmp.ge.s32.totalorder %s1139_s15, 1  ;;  %s1139_s15 = sphi %s1167_s15, %s15_s15  }
   0x2   : > { %p167_p1 = scmp.lt.s32.totalorder %s1139_s15, 3 }
   0x4   : > { %p168_p2 = pnand %p981_p0, %p167_p1 }
   0x5   : > { %v1076_v0 = vld [vmem:[%s1541_s1] sm:$0xff] (!%p168_p2)   ;;  %v1141_v1 = vmov (!%p168_p2), 0   ;;  %s982_s19 = sshll.u32 (!%p168_p2), %s1173_s16, 5  ;;  %v1077_v2 = vld [vmem:[%s1541_s1 + $0x8] sm:$0xff] (!%p168_p2)   ;;  %v1078_v3 = vld [vmem:[%s1541_s1 + $0x10] sm:$0xff] (!%p168_p2)   ;;  %vm471_vm0 = vcmask (!%p168_p2), 130048  }
   0x6   : > { %171 = sbr.rel (%p168_p2) target bundleno = 366 (0x16e), region = 32  ;;  %520 = vmatprep.subr.bf16.mxu0 (!%p168_p2), %v1141_v1  ;;  %1049 = vmatprep.subr.bf16.mxu1 (!%p168_p2), %v1141_v1  ;;  %p199_p3 = scmp.lt.s32.totalorder (!%p168_p2), %s982_s19, 63  ;;  %v1079_v4 = vld [vmem:[%s1541_s1 + $0x18] sm:$0xff] (!%p168_p2)   ;;  %v1080_v6 = vld [vmem:[%s1541_s1 + $0x20] sm:$0xff] (!%p168_p2)   ;;  %v1081_v8 = vld [vmem:[%s1541_s1 + $0x28] sm:$0xff] (!%p168_p2)  }
   0x7   : > { %521 = vmatpush1.bf16.msra.mxu0 (!%p168_p2), %v1076_v0  ;;  %1058 = vmatpush1.bf16.msra.mxu1 (!%p168_p2), %v1076_v0  ;;  %v1082_v9 = vld [vmem:[%s1541_s1 + $0x30] sm:$0xff] (!%p168_p2)   ;;  %v1083_v10 = vld [vmem:[%s1541_s1 + $0x38] sm:$0xff] (!%p168_p2)   ;;  %v1084_v11 = vld [vmem:[%s1541_s1 + $0x40] sm:$0xff] (!%p168_p2)   ;;  %p211_p4 = scmp.lt.s32.totalorder (!%p168_p2), %s1173_s16, 1 }
   0x8   : > { %522 = vmatprep.subr.bf16.mxu0 (!%p168_p2), %v1141_v1  ;;  %1050 = vmatprep.subr.bf16.mxu1 (!%p168_p2), %v1141_v1  ;;  %v1266_v42 = vld [vmem:[%s1542_s2] ss:$0 sm:$0xff] (!%p168_p2) }
   0xb   : > { %523 = vmatpush1.bf16.msra.mxu0 (!%p168_p2), %v1077_v2  ;;  %1059 = vmatpush1.bf16.msra.mxu1 (!%p168_p2), %v1077_v2 }
   0xc   : > { %524 = vmatprep.subr.bf16.mxu0 (!%p168_p2), %v1141_v1  ;;  %1051 = vmatprep.subr.bf16.mxu1 (!%p168_p2), %v1141_v1 }
   0xd   : > { %s1546_s19 = smov (!%p199_p3, %s982_s19), 63  ;;  %s1548_s16 = smov (!%p211_p4, %s1173_s16), 1 }
   0xe   : > { %s1048_s24 = sshll.u32 %s1546_s19, 3  ;;  %s987_s19 = sshll.u32 %s1548_s16, 3 }
   0xf   : > { %s1195_s27 = scalar_lea.vmem %s1540_s0, %s1048_s24  ;;  %525 = vmatpush1.bf16.msra.mxu0 %v1078_v3  ;;  %1060 = vmatpush1.bf16.msra.mxu1 %v1078_v3  ;;  %s1273_s21 = scalar_lea.vmem %s1543_s3, %s1048_s24 }
  0x10   : > { %v1087_v5 = vld [vmem:[%s1195_s27 + $0x4] ss:$8 sps:$4 sm:$0xff]   ;;  %526 = vmatprep.subr.bf16.mxu0 %v1141_v1  ;;  %1052 = vmatprep.subr.bf16.mxu1 %v1141_v1  ;;  %v1085_v12 = vld [vmem:[%s1195_s27] ss:$8 sps:$4 sm:$0xff]   ;;  %v1088_v14 = vld [vmem:[%s1195_s27 + $0x14] ss:$8 sps:$4 sm:$0xff]   ;;  %s214_s24 = scalar_lea.vmem %s1544_s4, %s987_s19 }
  0x11   : > { %1030 = vmatprep.mubr.msk.bf16.mxu0 %vm471_vm0, %v1087_v5  ;;  %v1099_v7 = vld [vmem:[%s1195_s27 + $0x84] ss:$8 sps:$4 sm:$0xff]   ;;  %v1097_v13 = vld [vmem:[%s1195_s27 + $0x80] ss:$8 sps:$4 sm:$0xff]   ;;  %v1103_v15 = vld [vmem:[%s1195_s27 + $0x94] ss:$8 sps:$4 sm:$0xff]  }
  0x12   : > { %1038 = vmatprep.mubr.msk.bf16.mxu1 %vm471_vm0, %v1099_v7  ;;  %v1090_v16 = vld [vmem:[%s1195_s27 + $0x10] ss:$8 sps:$4 sm:$0xff]   ;;  %v1091_v18 = vld [vmem:[%s1195_s27 + $0x24] ss:$8 sps:$4 sm:$0xff]   ;;  %v1093_v20 = vld [vmem:[%s1195_s27 + $0x20] ss:$8 sps:$4 sm:$0xff]  }
  0x13   : > { %527 = vmatpush1.bf16.msra.mxu0 %v1079_v4  ;;  %1061 = vmatpush1.bf16.msra.mxu1 %v1079_v4  ;;  %v1105_v17 = vld [vmem:[%s1195_s27 + $0x90] ss:$8 sps:$4 sm:$0xff]   ;;  %v1109_v19 = vld [vmem:[%s1195_s27 + $0xa4] ss:$8 sps:$4 sm:$0xff]   ;;  %v1111_v21 = vld [vmem:[%s1195_s27 + $0xa0] ss:$8 sps:$4 sm:$0xff]  }
  0x14   : > { %528 = vmatprep.subr.bf16.mxu0 %v1141_v1  ;;  %1053 = vmatprep.subr.bf16.mxu1 %v1141_v1  ;;  %v1094_v22 = vld [vmem:[%s1195_s27 + $0x34] ss:$8 sps:$4 sm:$0xff]   ;;  %v1096_v24 = vld [vmem:[%s1195_s27 + $0x30] ss:$8 sps:$4 sm:$0xff]   ;;  %v1100_v26 = vld [vmem:[%s1195_s27 + $0x44] ss:$8 sps:$4 sm:$0xff]  }
  0x15   : > { %v1115_v23 = vld [vmem:[%s1195_s27 + $0xb4] ss:$8 sps:$4 sm:$0xff]   ;;  %v1117_v25 = vld [vmem:[%s1195_s27 + $0xb0] ss:$8 sps:$4 sm:$0xff]   ;;  %v1121_v27 = vld [vmem:[%s1195_s27 + $0xc4] ss:$8 sps:$4 sm:$0xff]  }
  0x16   : > { %v1102_v28 = vld [vmem:[%s1195_s27 + $0x40] ss:$8 sps:$4 sm:$0xff]   ;;  %v1106_v30 = vld [vmem:[%s1195_s27 + $0x54] ss:$8 sps:$4 sm:$0xff]   ;;  %v1108_v32 = vld [vmem:[%s1195_s27 + $0x50] ss:$8 sps:$4 sm:$0xff]  }
  0x17   : > { %529 = vmatpush1.bf16.msra.mxu0 %v1080_v6  ;;  %1062 = vmatpush1.bf16.msra.mxu1 %v1080_v6  ;;  %v1123_v29 = vld [vmem:[%s1195_s27 + $0xc0] ss:$8 sps:$4 sm:$0xff]   ;;  %v1124_v31 = vld [vmem:[%s1195_s27 + $0xd4] ss:$8 sps:$4 sm:$0xff]   ;;  %v1126_v33 = vld [vmem:[%s1195_s27 + $0xd0] ss:$8 sps:$4 sm:$0xff]  }
  0x18   : > { %530 = vmatprep.subr.bf16.mxu0 %v1141_v1  ;;  %1054 = vmatprep.subr.bf16.mxu1 %v1141_v1  ;;  %v1112_v34 = vld [vmem:[%s1195_s27 + $0x64] ss:$8 sps:$4 sm:$0xff]   ;;  %v1114_v36 = vld [vmem:[%s1195_s27 + $0x60] ss:$8 sps:$4 sm:$0xff]   ;;  %v1118_v38 = vld [vmem:[%s1195_s27 + $0x74] ss:$8 sps:$4 sm:$0xff]  }
  0x19   : > { %v1127_v35 = vld [vmem:[%s1195_s27 + $0xe4] ss:$8 sps:$4 sm:$0xff]   ;;  %v1129_v37 = vld [vmem:[%s1195_s27 + $0xe0] ss:$8 sps:$4 sm:$0xff]   ;;  %v1130_v39 = vld [vmem:[%s1195_s27 + $0xf4] ss:$8 sps:$4 sm:$0xff]  }
  0x1a   : > { %v1120_v40 = vld [vmem:[%s1195_s27 + $0x70] ss:$8 sps:$4 sm:$0xff]  }
  0x1b   : > { %531 = vmatpush1.bf16.msra.mxu0 %v1081_v8  ;;  %1063 = vmatpush1.bf16.msra.mxu1 %v1081_v8  ;;  %v1132_v41 = vld [vmem:[%s1195_s27 + $0xf0] ss:$8 sps:$4 sm:$0xff]  }
  0x1c   : > { %532 = vmatprep.subr.bf16.mxu0 %v1141_v1  ;;  %1055 = vmatprep.subr.bf16.mxu1 %v1141_v1 }
  0x1f   : > { %533 = vmatpush1.bf16.msra.mxu0 %v1082_v9  ;;  %1064 = vmatpush1.bf16.msra.mxu1 %v1082_v9 }
  0x20   : > { %534 = vmatprep.subr.bf16.mxu0 %v1141_v1  ;;  %1056 = vmatprep.subr.bf16.mxu1 %v1141_v1 }
  0x23   : > { %535 = vmatpush1.bf16.msra.mxu0 %v1083_v10  ;;  %1065 = vmatpush1.bf16.msra.mxu1 %v1083_v10 }
  0x24   : > { %536 = vmatprep.subr.bf16.mxu0 %v1141_v1  ;;  %1057 = vmatprep.subr.bf16.mxu1 %v1141_v1 }
  0x27   : > { %537 = vmatpush1.bf16.msra.mxu0 %v1084_v11  ;;  %1066 = vmatpush1.bf16.msra.mxu1 %v1084_v11 }
  0x2a   : > { %553 = vmatmul.mubr.bf16.vlgmr.msra.gmra.mrb[0].mxu0 %v1085_v12  ;;  %617 = vmatmul.mubr.bf16.vlgmr.msra.gmra.mrb[0].mxu1 %v1097_v13 }
  0x2b   : > { %1031 = vmatprep.mubr.msk.bf16.mxu0 %vm471_vm0, %v1088_v14  ;;  %1039 = vmatprep.mubr.msk.bf16.mxu1 %vm471_vm0, %v1103_v15 }
  0x32   : > { %561 = vmatmul.mubr.bf16.gmra.mrb[4].mxu0 %v1090_v16  ;;  %625 = vmatmul.mubr.bf16.gmra.mrb[4].mxu1 %v1105_v17 }
  0x33   : > { %1032 = vmatprep.mubr.msk.bf16.mxu0 %vm471_vm0, %v1091_v18  ;;  %1040 = vmatprep.mubr.msk.bf16.mxu1 %vm471_vm0, %v1109_v19 }
  0x3a   : > { %569 = vmatmul.mubr.bf16.gmra.mrb[8].mxu0 %v1093_v20  ;;  %633 = vmatmul.mubr.bf16.gmra.mrb[8].mxu1 %v1111_v21 }
  0x3b   : > { %1033 = vmatprep.mubr.msk.bf16.mxu0 %vm471_vm0, %v1094_v22  ;;  %1041 = vmatprep.mubr.msk.bf16.mxu1 %vm471_vm0, %v1115_v23 }
  0x42   : > { %577 = vmatmul.mubr.bf16.gmra.mrb[12].mxu0 %v1096_v24  ;;  %641 = vmatmul.mubr.bf16.gmra.mrb[12].mxu1 %v1117_v25 }
  0x43   : > { %1034 = vmatprep.mubr.msk.bf16.mxu0 %vm471_vm0, %v1100_v26  ;;  %1042 = vmatprep.mubr.msk.bf16.mxu1 %vm471_vm0, %v1121_v27 }
  0x4a   : > { %585 = vmatmul.mubr.bf16.gmra.mrb[16].mxu0 %v1102_v28  ;;  %649 = vmatmul.mubr.bf16.gmra.mrb[16].mxu1 %v1123_v29 }
  0x4b   : > { %1035 = vmatprep.mubr.msk.bf16.mxu0 %vm471_vm0, %v1106_v30  ;;  %1043 = vmatprep.mubr.msk.bf16.mxu1 %vm471_vm0, %v1124_v31 }
  0x52   : > { %593 = vmatmul.mubr.bf16.gmra.mrb[20].mxu0 %v1108_v32  ;;  %657 = vmatmul.mubr.bf16.gmra.mrb[20].mxu1 %v1126_v33 }
  0x53   : > { %1036 = vmatprep.mubr.msk.bf16.mxu0 %vm471_vm0, %v1112_v34  ;;  %1044 = vmatprep.mubr.msk.bf16.mxu1 %vm471_vm0, %v1127_v35 }
  0x5a   : > { %601 = vmatmul.mubr.bf16.gmra.mrb[24].mxu0 %v1114_v36  ;;  %665 = vmatmul.mubr.bf16.gmra.mrb[24].mxu1 %v1129_v37 }
  0x5b   : > { %1037 = vmatprep.mubr.msk.bf16.mxu0 %vm471_vm0, %v1118_v38  ;;  %1045 = vmatprep.mubr.msk.bf16.mxu1 %vm471_vm0, %v1130_v39 }
  0x62   : > { %609 = vmatmul.mubr.bf16.gmra.mrb[28].mxu0 %v1120_v40  ;;  %673 = vmatmul.mubr.bf16.gmra.mrb[28].mxu1 %v1132_v41 }
  0xfd   : > { %v554_v43 = vpop.f32.mrb[0].mxu0  ;;  %v618_v44 = vpop.f32.mrb[0].mxu1 }
  0xfe   : > { %v555_v45 = vadd.f32 %v1266_v42, %v554_v43  ;;  %v556_v46 = vpop.f32.mrb[1].mxu0  ;;  %v1277_v47 = vadd.f32 %v1266_v42, %v618_v44  ;;  %v620_v48 = vpop.f32.mrb[1].mxu1 }
  0xff   : > { %v557_v49 = vpop.f32.mrb[2].mxu0  ;;  %v621_v50 = vpop.f32.mrb[2].mxu1 }
 0x100   : > { %681 = vst.msk [vmem:[%s1273_s21] sm:$0xff] %vm471_vm0, %v555_v45  ;;  %v784_v51 = vmul.f32 %v555_v45, %v555_v45  ;;  %v558_v52 = vadd.f32 %v1266_v42, %v557_v49  ;;  %v559_v53 = vpop.f32.mrb[3].mxu0  ;;  %697 = vst.msk [vmem:[%s1273_s21 + $0x80] sm:$0xff] %vm471_vm0, %v1277_v47  ;;  %v623_v54 = vpop.f32.mrb[3].mxu1  ;;  %v1286_v55 = vadd.f32 %v1266_v42, %v621_v50  ;;  %v715_v56 = vsel %vm471_vm0, %v555_v45, 0.0 }
 0x102   : > { %682 = vst.msk [vmem:[%s1273_s21 + $0x8] sm:$0xff] %vm471_vm0, %v558_v52  ;;  %v716_v57 = vsel %vm471_vm0, %v558_v52, 0.0  ;;  %v785_v58 = vmul.f32 %v558_v52, %v558_v52  ;;  %698 = vst.msk [vmem:[%s1273_s21 + $0x88] sm:$0xff] %vm471_vm0, %v1286_v55  ;;  %v816_v60 = vsel %vm471_vm0, %v784_v51, 0.0 }
 0x103   : > { %v717_v59 = vadd.f32 %v716_v57, %v715_v56 }
 0x104   : > { %v817_v61 = vsel %vm471_vm0, %v785_v58, 0.0 }
 0x105   : > { %v818_v62 = vadd.f32 %v817_v61, %v816_v60  ;;  %v562_v63 = vpop.f32.mrb[4].mxu0  ;;  %v626_v0 = vpop.f32.mrb[4].mxu1 }
 0x106   : > { %v563_v1 = vadd.f32 %v1266_v42, %v562_v63  ;;  %v564_v2 = vpop.f32.mrb[5].mxu0  ;;  %v1299_v3 = vadd.f32 %v1266_v42, %v626_v0  ;;  %v628_v4 = vpop.f32.mrb[5].mxu1 }
 0x107   : > { %v565_v5 = vpop.f32.mrb[6].mxu0  ;;  %v629_v6 = vpop.f32.mrb[6].mxu1 }
 0x108   : > { %683 = vst.msk [vmem:[%s1273_s21 + $0x10] sm:$0xff] %vm471_vm0, %v563_v1  ;;  %v718_v7 = vsel %vm471_vm0, %v563_v1, 0.0  ;;  %v786_v8 = vmul.f32 %v563_v1, %v563_v1  ;;  %v566_v9 = vadd.f32 %v1266_v42, %v565_v5  ;;  %v567_v10 = vpop.f32.mrb[7].mxu0  ;;  %699 = vst.msk [vmem:[%s1273_s21 + $0x90] sm:$0xff] %vm471_vm0, %v1299_v3  ;;  %v631_v11 = vpop.f32.mrb[7].mxu1  ;;  %v1309_v13 = vadd.f32 %v1266_v42, %v629_v6 }
 0x109   : > { %v719_v12 = vadd.f32 %v718_v7, %v717_v59 }
 0x10a   : > { %v819_v14 = vsel %vm471_vm0, %v786_v8, 0.0  ;;  %684 = vst.msk [vmem:[%s1273_s21 + $0x18] sm:$0xff] %vm471_vm0, %v566_v9  ;;  %v720_v15 = vsel %vm471_vm0, %v566_v9, 0.0  ;;  %v787_v16 = vmul.f32 %v566_v9, %v566_v9  ;;  %700 = vst.msk [vmem:[%s1273_s21 + $0x98] sm:$0xff] %vm471_vm0, %v1309_v13 }
 0x10b   : > { %v820_v17 = vadd.f32 %v819_v14, %v818_v62  ;;  %v721_v18 = vadd.f32 %v720_v15, %v719_v12 }
 0x10c   : > { %v821_v19 = vsel %vm471_vm0, %v787_v16, 0.0 }
 0x10d   : > { %v822_v20 = vadd.f32 %v821_v19, %v820_v17  ;;  %v570_v21 = vpop.f32.mrb[8].mxu0  ;;  %v634_v22 = vpop.f32.mrb[8].mxu1 }
 0x10e   : > { %v571_v23 = vadd.f32 %v1266_v42, %v570_v21  ;;  %v572_v24 = vpop.f32.mrb[9].mxu0  ;;  %v1321_v25 = vadd.f32 %v1266_v42, %v634_v22  ;;  %v636_v26 = vpop.f32.mrb[9].mxu1 }
 0x10f   : > { %v573_v27 = vpop.f32.mrb[10].mxu0  ;;  %v637_v28 = vpop.f32.mrb[10].mxu1 }
 0x110   : > { %685 = vst.msk [vmem:[%s1273_s21 + $0x20] sm:$0xff] %vm471_vm0, %v571_v23  ;;  %v722_v29 = vsel %vm471_vm0, %v571_v23, 0.0  ;;  %v788_v30 = vmul.f32 %v571_v23, %v571_v23  ;;  %v574_v31 = vadd.f32 %v1266_v42, %v573_v27  ;;  %v575_v32 = vpop.f32.mrb[11].mxu0  ;;  %701 = vst.msk [vmem:[%s1273_s21 + $0xa0] sm:$0xff] %vm471_vm0, %v1321_v25  ;;  %v639_v33 = vpop.f32.mrb[11].mxu1  ;;  %v1331_v35 = vadd.f32 %v1266_v42, %v637_v28 }
 0x111   : > { %v723_v34 = vadd.f32 %v722_v29, %v721_v18 }
 0x112   : > { %v823_v36 = vsel %vm471_vm0, %v788_v30, 0.0  ;;  %686 = vst.msk [vmem:[%s1273_s21 + $0x28] sm:$0xff] %vm471_vm0, %v574_v31  ;;  %v724_v37 = vsel %vm471_vm0, %v574_v31, 0.0  ;;  %v789_v38 = vmul.f32 %v574_v31, %v574_v31  ;;  %702 = vst.msk [vmem:[%s1273_s21 + $0xa8] sm:$0xff] %vm471_vm0, %v1331_v35 }
 0x113   : > { %v824_v39 = vadd.f32 %v823_v36, %v822_v20  ;;  %v725_v40 = vadd.f32 %v724_v37, %v723_v34 }
 0x114   : > { %v825_v41 = vsel %vm471_vm0, %v789_v38, 0.0 }
 0x115   : > { %v826_v43 = vadd.f32 %v825_v41, %v824_v39  ;;  %v578_v44 = vpop.f32.mrb[12].mxu0  ;;  %v642_v45 = vpop.f32.mrb[12].mxu1 }
 0x116   : > { %v579_v46 = vadd.f32 %v1266_v42, %v578_v44  ;;  %v580_v48 = vpop.f32.mrb[13].mxu0  ;;  %v1343_v49 = vadd.f32 %v1266_v42, %v642_v45  ;;  %v644_v50 = vpop.f32.mrb[13].mxu1 }
 0x117   : > { %v581_v51 = vpop.f32.mrb[14].mxu0  ;;  %v645_v52 = vpop.f32.mrb[14].mxu1 }
 0x118   : > { %687 = vst.msk [vmem:[%s1273_s21 + $0x30] sm:$0xff] %vm471_vm0, %v579_v46  ;;  %v726_v53 = vsel %vm471_vm0, %v579_v46, 0.0  ;;  %v790_v54 = vmul.f32 %v579_v46, %v579_v46  ;;  %v582_v56 = vadd.f32 %v1266_v42, %v581_v51  ;;  %v583_v57 = vpop.f32.mrb[15].mxu0  ;;  %703 = vst.msk [vmem:[%s1273_s21 + $0xb0] sm:$0xff] %vm471_vm0, %v1343_v49  ;;  %v647_v58 = vpop.f32.mrb[15].mxu1  ;;  %v1353_v60 = vadd.f32 %v1266_v42, %v645_v52 }
 0x119   : > { %v727_v59 = vadd.f32 %v726_v53, %v725_v40 }
 0x11a   : > { %v827_v61 = vsel %vm471_vm0, %v790_v54, 0.0  ;;  %688 = vst.msk [vmem:[%s1273_s21 + $0x38] sm:$0xff] %vm471_vm0, %v582_v56  ;;  %v728_v62 = vsel %vm471_vm0, %v582_v56, 0.0  ;;  %v791_v63 = vmul.f32 %v582_v56, %v582_v56  ;;  %704 = vst.msk [vmem:[%s1273_s21 + $0xb8] sm:$0xff] %vm471_vm0, %v1353_v60 }
 0x11b   : > { %v828_v0 = vadd.f32 %v827_v61, %v826_v43  ;;  %v729_v1 = vadd.f32 %v728_v62, %v727_v59 }
 0x11c   : > { %v829_v2 = vsel %vm471_vm0, %v791_v63, 0.0 }
 0x11d   : > { %v830_v4 = vadd.f32 %v829_v2, %v828_v0  ;;  %v586_v5 = vpop.f32.mrb[16].mxu0  ;;  %v650_v6 = vpop.f32.mrb[16].mxu1 }
 0x11e   : > { %v587_v7 = vadd.f32 %v1266_v42, %v586_v5  ;;  %v588_v8 = vpop.f32.mrb[17].mxu0  ;;  %v1365_v9 = vadd.f32 %v1266_v42, %v650_v6  ;;  %v652_v10 = vpop.f32.mrb[17].mxu1 }
 0x11f   : > { %v589_v11 = vpop.f32.mrb[18].mxu0  ;;  %v653_v12 = vpop.f32.mrb[18].mxu1 }
 0x120   : > { %689 = vst.msk [vmem:[%s1273_s21 + $0x40] sm:$0xff] %vm471_vm0, %v587_v7  ;;  %v730_v14 = vsel %vm471_vm0, %v587_v7, 0.0  ;;  %v792_v15 = vmul.f32 %v587_v7, %v587_v7  ;;  %v590_v16 = vadd.f32 %v1266_v42, %v589_v11  ;;  %v591_v17 = vpop.f32.mrb[19].mxu0  ;;  %705 = vst.msk [vmem:[%s1273_s21 + $0xc0] sm:$0xff] %vm471_vm0, %v1365_v9  ;;  %v655_v18 = vpop.f32.mrb[19].mxu1  ;;  %v1375_v20 = vadd.f32 %v1266_v42, %v653_v12 }
 0x121   : > { %v731_v19 = vadd.f32 %v730_v14, %v729_v1 }
 0x122   : > { %v831_v21 = vsel %vm471_vm0, %v792_v15, 0.0  ;;  %690 = vst.msk [vmem:[%s1273_s21 + $0x48] sm:$0xff] %vm471_vm0, %v590_v16  ;;  %v732_v22 = vsel %vm471_vm0, %v590_v16, 0.0  ;;  %v793_v23 = vmul.f32 %v590_v16, %v590_v16  ;;  %706 = vst.msk [vmem:[%s1273_s21 + $0xc8] sm:$0xff] %vm471_vm0, %v1375_v20 }
 0x123   : > { %v832_v24 = vadd.f32 %v831_v21, %v830_v4  ;;  %v733_v26 = vadd.f32 %v732_v22, %v731_v19 }
 0x124   : > { %v833_v27 = vsel %vm471_vm0, %v793_v23, 0.0 }
 0x125   : > { %v834_v28 = vadd.f32 %v833_v27, %v832_v24  ;;  %v594_v29 = vpop.f32.mrb[20].mxu0  ;;  %v658_v30 = vpop.f32.mrb[20].mxu1 }
 0x126   : > { %v595_v31 = vadd.f32 %v1266_v42, %v594_v29  ;;  %v596_v32 = vpop.f32.mrb[21].mxu0  ;;  %v1387_v33 = vadd.f32 %v1266_v42, %v658_v30  ;;  %v660_v34 = vpop.f32.mrb[21].mxu1 }
 0x127   : > { %v597_v36 = vpop.f32.mrb[22].mxu0  ;;  %v661_v37 = vpop.f32.mrb[22].mxu1 }
 0x128   : > { %691 = vst.msk [vmem:[%s1273_s21 + $0x50] sm:$0xff] %vm471_vm0, %v595_v31  ;;  %v734_v38 = vsel %vm471_vm0, %v595_v31, 0.0  ;;  %v794_v39 = vmul.f32 %v595_v31, %v595_v31  ;;  %v598_v40 = vadd.f32 %v1266_v42, %v597_v36  ;;  %v599_v41 = vpop.f32.mrb[23].mxu0  ;;  %707 = vst.msk [vmem:[%s1273_s21 + $0xd0] sm:$0xff] %vm471_vm0, %v1387_v33  ;;  %v663_v43 = vpop.f32.mrb[23].mxu1  ;;  %v1397_v45 = vadd.f32 %v1266_v42, %v661_v37 }
 0x129   : > { %v735_v44 = vadd.f32 %v734_v38, %v733_v26  ;;  %v800_v37 = vmul.f32 %v1277_v47, %v1277_v47 }
 0x12a   : > { %v835_v46 = vsel %vm471_vm0, %v794_v39, 0.0  ;;  %692 = vst.msk [vmem:[%s1273_s21 + $0x58] sm:$0xff] %vm471_vm0, %v598_v40  ;;  %v736_v48 = vsel %vm471_vm0, %v598_v40, 0.0  ;;  %v795_v50 = vmul.f32 %v598_v40, %v598_v40  ;;  %708 = vst.msk [vmem:[%s1273_s21 + $0xd8] sm:$0xff] %vm471_vm0, %v1397_v45 }
 0x12b   : > { %v836_v51 = vadd.f32 %v835_v46, %v834_v28  ;;  %v737_v52 = vadd.f32 %v736_v48, %v735_v44  ;;  %v746_v44 = vsel %vm471_vm0, %v1277_v47, 0.0  ;;  %v750_v47 = vsel %vm471_vm0, %v1299_v3, 0.0 }
 0x12c   : > { %v837_v53 = vsel %vm471_vm0, %v795_v50, 0.0 }
 0x12d   : > { %v838_v54 = vadd.f32 %v837_v53, %v836_v51  ;;  %v602_v56 = vpop.f32.mrb[24].mxu0  ;;  %v666_v57 = vpop.f32.mrb[24].mxu1  ;;  %v847_v51 = vsel %vm471_vm0, %v800_v37, 0.0  ;;  %v802_v53 = vmul.f32 %v1299_v3, %v1299_v3  ;;  %v754_v3 = vsel %vm471_vm0, %v1321_v25, 0.0 }
 0x12e   : > { %v603_v58 = vadd.f32 %v1266_v42, %v602_v56  ;;  %v604_v59 = vpop.f32.mrb[25].mxu0  ;;  %v1409_v61 = vadd.f32 %v1266_v42, %v666_v57  ;;  %v668_v62 = vpop.f32.mrb[25].mxu1 }
 0x12f   : > { %v605_v63 = vpop.f32.mrb[26].mxu0  ;;  %v669_v0 = vpop.f32.mrb[26].mxu1 }
 0x130   : > { %693 = vst.msk [vmem:[%s1273_s21 + $0x60] sm:$0xff] %vm471_vm0, %v603_v58  ;;  %v738_v1 = vsel %vm471_vm0, %v603_v58, 0.0  ;;  %v796_v2 = vmul.f32 %v603_v58, %v603_v58  ;;  %v606_v4 = vadd.f32 %v1266_v42, %v605_v63  ;;  %v607_v5 = vpop.f32.mrb[27].mxu0  ;;  %709 = vst.msk [vmem:[%s1273_s21 + $0xe0] sm:$0xff] %vm471_vm0, %v1409_v61  ;;  %v671_v6 = vpop.f32.mrb[27].mxu1  ;;  %v1419_v8 = vadd.f32 %v1266_v42, %v669_v0 }
 0x131   : > { %v739_v7 = vadd.f32 %v738_v1, %v737_v52  ;;  %v748_v52 = vsel %vm471_vm0, %v1286_v55, 0.0  ;;  %v803_v58 = vmul.f32 %v1309_v13, %v1309_v13  ;;  %v851_v63 = vsel %vm471_vm0, %v802_v53, 0.0 }
 0x132   : > { %v839_v10 = vsel %vm471_vm0, %v796_v2, 0.0  ;;  %694 = vst.msk [vmem:[%s1273_s21 + $0x68] sm:$0xff] %vm471_vm0, %v606_v4  ;;  %v740_v11 = vsel %vm471_vm0, %v606_v4, 0.0  ;;  %v797_v12 = vmul.f32 %v606_v4, %v606_v4  ;;  %710 = vst.msk [vmem:[%s1273_s21 + $0xe8] sm:$0xff] %vm471_vm0, %v1419_v8  ;;  %v804_v0 = vmul.f32 %v1321_v25, %v1321_v25 }
 0x133   : > { %v840_v14 = vadd.f32 %v839_v10, %v838_v54  ;;  %v741_v15 = vadd.f32 %v740_v11, %v739_v7  ;;  %v853_v4 = vsel %vm471_vm0, %v803_v58, 0.0  ;;  %v805_v5 = vmul.f32 %v1331_v35, %v1331_v35 }
 0x134   : > { %v841_v16 = vsel %vm471_vm0, %v797_v12, 0.0  ;;  %v855_v10 = vsel %vm471_vm0, %v804_v0, 0.0  ;;  %v806_v11 = vmul.f32 %v1343_v49, %v1343_v49  ;;  %v758_v25 = vsel %vm471_vm0, %v1343_v49, 0.0 }
 0x135   : > { %v842_v17 = vadd.f32 %v841_v16, %v840_v14  ;;  %v610_v18 = vpop.f32.mrb[28].mxu0  ;;  %v674_v19 = vpop.f32.mrb[28].mxu1  ;;  %v807_v16 = vmul.f32 %v1353_v60, %v1353_v60  ;;  %v762_v49 = vsel %vm471_vm0, %v1365_v9, 0.0  ;;  %v772_v53 = vsel %vm471_vm0, %v1419_v8, 0.0 }
 0x136   : > { %v611_v21 = vadd.f32 %v1266_v42, %v610_v18  ;;  %v612_v22 = vpop.f32.mrb[29].mxu0  ;;  %v1431_v23 = vadd.f32 %v1266_v42, %v674_v19  ;;  %v676_v24 = vpop.f32.mrb[29].mxu1  ;;  %v859_v19 = vsel %vm471_vm0, %v806_v11, 0.0 }
 0x137   : > { %v613_v26 = vpop.f32.mrb[30].mxu0  ;;  %v677_v27 = vpop.f32.mrb[30].mxu1 }
 0x138   : > { %695 = vst.msk [vmem:[%s1273_s21 + $0x70] sm:$0xff] %vm471_vm0, %v611_v21  ;;  %v742_v28 = vsel %vm471_vm0, %v611_v21, 0.0  ;;  %v798_v29 = vmul.f32 %v611_v21, %v611_v21  ;;  %v614_v30 = vadd.f32 %v1266_v42, %v613_v26  ;;  %v615_v31 = vpop.f32.mrb[31].mxu0  ;;  %711 = vst.msk [vmem:[%s1273_s21 + $0xf0] sm:$0xff] %vm471_vm0, %v1431_v23  ;;  %v679_v32 = vpop.f32.mrb[31].mxu1  ;;  %v1441_v36 = vadd.f32 %v1266_v42, %v677_v27 }
 0x139   : > { %v743_v34 = vadd.f32 %v742_v28, %v741_v15  ;;  %v801_v42 = vmul.f32 %v1286_v55, %v1286_v55  ;;  %v752_v55 = vsel %vm471_vm0, %v1309_v13, 0.0  ;;  %v756_v13 = vsel %vm471_vm0, %v1331_v35, 0.0 }
 0x13a   : > { %v843_v38 = vsel %vm471_vm0, %v798_v29, 0.0  ;;  %696 = vst.msk [vmem:[%s1273_s21 + $0x78] sm:$0xff] %vm471_vm0, %v614_v30  ;;  %v744_v39 = vsel %vm471_vm0, %v614_v30, 0.0  ;;  %v799_v40 = vmul.f32 %v614_v30, %v614_v30  ;;  %712 = vst.msk [vmem:[%s1273_s21 + $0xf8] sm:$0xff] %vm471_vm0, %v1441_v36  ;;  %v857_v15 = vsel %vm471_vm0, %v805_v5, 0.0 }
 0x13b   : > { %v844_v41 = vadd.f32 %v843_v38, %v842_v17  ;;  %v745_v43 = vadd.f32 %v744_v39, %v743_v34  ;;  %v849_v57 = vsel %vm471_vm0, %v801_v42, 0.0  ;;  %v760_v35 = vsel %vm471_vm0, %v1353_v60, 0.0 }
 0x13c   : > { %v845_v46 = vsel %vm471_vm0, %v799_v40, 0.0  ;;  %v808_v21 = vmul.f32 %v1365_v9, %v1365_v9  ;;  %v861_v26 = vsel %vm471_vm0, %v807_v16, 0.0  ;;  %v809_v27 = vmul.f32 %v1375_v20, %v1375_v20 }
 0x13d   : > { %v747_v48 = vadd.f32 %v746_v44, %v745_v43  ;;  %v846_v50 = vadd.f32 %v845_v46, %v844_v41  ;;  %v764_v60 = vsel %vm471_vm0, %v1375_v20, 0.0  ;;  %v810_v31 = vmul.f32 %v1387_v33, %v1387_v33 }
 0x13e   : > { %v863_v30 = vsel %vm471_vm0, %v808_v21, 0.0  ;;  %v865_v37 = vsel %vm471_vm0, %v809_v27, 0.0  ;;  %v766_v9 = vsel %vm471_vm0, %v1387_v33, 0.0  ;;  %v811_v38 = vmul.f32 %v1397_v45, %v1397_v45 }
 0x13f   : > { %v749_v54 = vadd.f32 %v748_v52, %v747_v48  ;;  %v848_v56 = vadd.f32 %v847_v51, %v846_v50  ;;  %v867_v41 = vsel %vm471_vm0, %v810_v31, 0.0  ;;  %v768_v20 = vsel %vm471_vm0, %v1397_v45, 0.0 }
 0x140   : > { %v812_v43 = vmul.f32 %v1409_v61, %v1409_v61  ;;  %v869_v46 = vsel %vm471_vm0, %v811_v38, 0.0  ;;  %v770_v33 = vsel %vm471_vm0, %v1409_v61, 0.0  ;;  %v813_v48 = vmul.f32 %v1419_v8, %v1419_v8 }
 0x141   : > { %v751_v59 = vadd.f32 %v750_v47, %v749_v54  ;;  %v850_v62 = vadd.f32 %v849_v57, %v848_v56  ;;  %v814_v50 = vmul.f32 %v1431_v23, %v1431_v23  ;;  %v774_v54 = vsel %vm471_vm0, %v1431_v23, 0.0 }
 0x142   : > { %v871_v45 = vsel %vm471_vm0, %v812_v43, 0.0  ;;  %v873_v61 = vsel %vm471_vm0, %v813_v48, 0.0  ;;  %v815_v58 = vmul.f32 %v1441_v36, %v1441_v36 }
 0x143   : > { %v753_v1 = vadd.f32 %v752_v55, %v751_v59  ;;  %v852_v2 = vadd.f32 %v851_v63, %v850_v62  ;;  %v875_v47 = vsel %vm471_vm0, %v814_v50, 0.0  ;;  %v776_v63 = vsel %vm471_vm0, %v1441_v36, 0.0 }
 0x144   : > { %v877_v0 = vsel %vm471_vm0, %v815_v58, 0.0 }
 0x145   : > { %v854_v6 = vadd.f32 %v853_v4, %v852_v2  ;;  %v755_v7 = vadd.f32 %v754_v3, %v753_v1  ;;  %v713_v3 = vlaneseq }
 0x147   : > { %v757_v12 = vadd.f32 %v756_v13, %v755_v7  ;;  %v856_v14 = vadd.f32 %v855_v10, %v854_v6  ;;  %v714_v13 = vshrl.u32 %v713_v3, 7 }
 0x149   : > { %v759_v17 = vadd.f32 %v758_v25, %v757_v12  ;;  %v858_v18 = vadd.f32 %v857_v15, %v856_v14  ;;  %vm886_vm1 = vcmp.eq.s32.totalorder %v714_v13, 1  ;;  %vm885_vm2 = vcmp.eq.s32.totalorder %v714_v13, 0 }
 0x14b   : > { %v761_v22 = vadd.f32 %v760_v35, %v759_v17  ;;  %v860_v24 = vadd.f32 %v859_v19, %v858_v18 }
 0x14d   : > { %v763_v28 = vadd.f32 %v762_v49, %v761_v22  ;;  %v862_v29 = vadd.f32 %v861_v26, %v860_v24 }
 0x14f   : > { %v864_v32 = vadd.f32 %v863_v30, %v862_v29  ;;  %v765_v34 = vadd.f32 %v764_v60, %v763_v28 }
 0x151   : > { %v866_v39 = vadd.f32 %v865_v37, %v864_v32  ;;  %v767_v40 = vadd.f32 %v766_v9, %v765_v34 }
 0x153   : > { %v868_v44 = vadd.f32 %v867_v41, %v866_v39  ;;  %v769_v42 = vadd.f32 %v768_v20, %v767_v40 }
 0x155   : > { %v870_v51 = vadd.f32 %v869_v46, %v868_v44  ;;  %v771_v52 = vadd.f32 %v770_v33, %v769_v42 }
 0x157   : > { %v872_v56 = vadd.f32 %v871_v45, %v870_v51  ;;  %v773_v57 = vadd.f32 %v772_v53, %v771_v52 }
 0x159   : > { %v874_v59 = vadd.f32 %v873_v61, %v872_v56  ;;  %v775_v62 = vadd.f32 %v774_v54, %v773_v57 }
 0x15b   : > { %v876_v55 = vadd.f32 %v875_v47, %v874_v59  ;;  %v777_v8 = vadd.f32 %v776_v63, %v775_v62 }
 0x15d   : > { %v778_v23 = vrot.slane %v777_v8, 4  ;;  %v878_v1 = vadd.f32 %v877_v0, %v876_v55 }
 0x15f   : > { %v779_v2 = vadd.f32 %v778_v23, %v777_v8  ;;  %v879_v4 = vrot.slane %v878_v1, 4 }
 0x161   : > { %v780_v5 = vrot.slane %v779_v2, 2  ;;  %v880_v6 = vadd.f32 %v879_v4, %v878_v1 }
 0x163   : > { %v781_v7 = vadd.f32 %v780_v5, %v779_v2  ;;  %v881_v10 = vrot.slane %v880_v6, 2 }
 0x165   : > { %v882_v11 = vadd.f32 %v881_v10, %v880_v6  ;;  %v782_v12 = vrot.slane %v781_v7, 1 }
 0x167   : > { %v883_v36 = vrot.slane %v882_v11, 1  ;;  %v783_v15 = vadd.f32 %v782_v12, %v781_v7 }
 0x169   : > { %v884_v14 = vadd.f32 %v883_v36, %v882_v11 }
 0x16b   : > { %v887_v25 = vsel %vm886_vm1, %v884_v14, 0.0 }
 0x16c   : > { %v888_v16 = vsel %vm885_vm2, %v783_v15, %v887_v25 }
 0x16d   : > { %889 = vst.msk [vmem:[%s214_s24] sm:$0xff] %vm471_vm0, %v888_v16 }
 0x16e PF: > { %s15_s15 = sadd.s32 1, %s1139_s15  }
 0x16f   : > { %p12_p5 = scmp.ge.s32.totalorder %s15_s15, 4  }
 0x171   :  { %14 = sbr.rel (!%p12_p5) target bundleno = 1 (0x1), region = 74 }

</bundles_post_ra>
